<compile_context>
chip_gen: v7x
topology: tpu7x:2x2x1
jax: 0.10.0
libtpu: 0.0.40
codegen_flags: <defaults>
</compile_context>

<pallas_src>
import functools

import jax
import jax.numpy as jnp
from jax.experimental import pallas as pl
from jax.experimental.pallas import tpu as pltpu


_MIN_MXU_CONTRACT = 8   # below this contraction width a VPU broadcast-FMA beats the MXU


def _cnn_kernel(N, L, C_in, hidden_sizes, K, ncls, eps,
                x_ref,
                w1a_ref, w23a_ref, gba_ref,
                w1b_ref, w23b_ref, gbb_ref,
                w1c_ref, w23c_ref, gbc_ref,
                fcw_ref, fcb_ref, out_ref):
    """Fused CNN forward.

    x_ref    : (N, L, C_in)       input, NLC
    w1*_ref  : (K*C_b, H_b)       conv_1 weight of block b, row = tap*C_b + c
    w23*_ref : (2, K*H_b, H_b)    conv_2 / conv_3 weights, same row layout
    gb*_ref  : (6, H_b)           [g1, be1, g2, be2, g3, be3] batchnorm affine params
    fcw_ref  : (H_3, ncls)        fc weight, transposed
    fcb_ref  : (1, ncls)          fc bias
    out_ref  : (N, ncls)          softmax probabilities
    """
    f32 = jnp.float32

    def swish(v):
        # v * sigmoid(v): exp + approx reciprocal on the EUP, one Newton step -> ~f32.
        d = 1.0 + jnp.exp(-v)
        r = pl.reciprocal(d, approx=True)
        r = r * (2.0 - d * r)
        return v * r

    def stack(parts):
        # stack along the sublane (row) axis; single-piece case avoids a no-op concat.
        return parts[0] if len(parts) == 1 else jnp.concatenate(parts, axis=0)

    def block(xs, w1_ref, w23_ref, gb_ref, cin, H, T):
        """One ConvNormPool block.  xs: N per-batch (T, cin) -> N per-batch (T//2, H)."""
        L1 = T - K + 1                      # 'valid' conv output length
        Lo = T // 2                         # MaxPool1d(2) output length
        inv_cnt = 1.0 / float(N * L1)

        w1 = w1_ref[...]                    # (K*cin, H)
        w2 = w23_ref[0]                     # (K*H,  H)
        w3 = w23_ref[1]                     # (K*H,  H)

        def conv(inp_list, w_mat, c):
            # Valid conv, batch stacked into the MXU M dim: K taps of (N*L1, c)@(c, H).
            # Conv biases are dropped on purpose: the training-mode BN below subtracts
            # the per-channel batch mean, which cancels them exactly.
            acc = None
            for t in range(K):
                xt = stack([inp[t:t + L1, :] for inp in inp_list])      # (N*L1, c)
                if c >= _MIN_MXU_CONTRACT:
                    z = jnp.dot(xt, w_mat[t * c:(t + 1) * c, :],
                                preferred_element_type=f32)
                else:
                    # tiny contraction (block1 conv_1, c == C_in): VPU broadcast-FMA.
                    z = xt[:, 0:1] * w_mat[t * c:t * c + 1, :]
                    for cc in range(1, c):
                        z = z + xt[:, cc:cc + 1] * w_mat[t * c + cc:t * c + cc + 1, :]
                acc = z if acc is None else acc + z
            return acc                                                   # (N*L1, H)

        def bn_swish(hstk, idx):
            # Training-mode BatchNorm1d over (batch, time) on the stacked activation
            # (one-pass stats, one axis-0 reduction), then Swish.
            g = gb_ref[2 * idx:2 * idx + 1, :]           # (1, H) gamma
            be = gb_ref[2 * idx + 1:2 * idx + 2, :]      # (1, H) beta
            s1 = jnp.sum(hstk, axis=0, keepdims=True)
            s2 = jnp.sum(hstk * hstk, axis=0, keepdims=True)
            mean = s1 * inv_cnt
            var = jnp.maximum(s2 * inv_cnt - mean * mean, 0.0)   # guard cancellation
            scale = jax.lax.rsqrt(var + eps) * g
            shift = be - mean * scale
            return swish(hstk * scale + shift)

        zpad = jnp.zeros((K - 1, H), f32)

        def pad_split(hstk):
            # F.pad(h, (K-1, 0)) along time, per batch: (N*L1, H) -> N x (T, H).
            # Register/VMEM-resident zero-block concat (no shift matmul, no scratch).
            return [jnp.concatenate([zpad, hstk[n * L1:(n + 1) * L1, :]], axis=0)
                    for n in range(N)]

        # conv_1 (valid) -> BN -> swish -> pad
        conv1 = conv(xs, w1, cin)
        h = pad_split(bn_swish(conv1, 0))
        # conv_2 -> BN -> swish -> pad
        h = pad_split(bn_swish(conv(h, w2, H), 1))
        # conv_3, skip connection, BN -> swish -> pad
        conv3 = conv(h, w3, H)
        hp = pad_split(bn_swish(conv1 + conv3, 2))

        # MaxPool1d(2): pairwise max of consecutive padded rows (O(T*H) work).
        # At realistic L this per-row unroll would become a strided-ref read or a
        # (Lo, 2, H) reshape inside a time-tiled grid.
        out = []
        for hn in hp:
            rows = [jnp.maximum(hn[2 * i:2 * i + 1, :], hn[2 * i + 1:2 * i + 2, :])
                    for i in range(Lo)]
            out.append(stack(rows))
        return out, Lo

    # ----- three ConvNormPool blocks, fully fused -----
    xs = [x_ref[n].astype(f32) for n in range(N)]
    T, cin = L, C_in
    block_refs = ((w1a_ref, w23a_ref, gba_ref),
                  (w1b_ref, w23b_ref, gbb_ref),
                  (w1c_ref, w23c_ref, gbc_ref))
    for (w1r, w23r, gbr), H in zip(block_refs, hidden_sizes):
        xs, T = block(xs, w1r, w23r, gbr, cin, H, T)
        cin = H

    # ----- head: AdaptiveAvgPool1d(1) + flatten + Linear + softmax -----
    inv_t = 1.0 / float(T)
    feats = stack([jnp.sum(xn, axis=0, keepdims=True) * inv_t for xn in xs])   # (N, C)
    logits = jnp.dot(feats, fcw_ref[...], preferred_element_type=f32) + fcb_ref[...]
    m = jnp.max(logits, axis=-1, keepdims=True)
    e = jnp.exp(logits - m)
    s = jnp.sum(e, axis=-1, keepdims=True)
    r = pl.reciprocal(s, approx=True)
    r = r * (2.0 - s * r)
    out_ref[...] = e * r                       # one dense (N, ncls) store


def _vmem_spec():
    return pl.BlockSpec(memory_space=pltpu.MemorySpace.VMEM)


def pack_cnn_params(params, kernel_size):
    """PyTorch-layout params -> flat tuple of kernel arrays.  Call ONCE, outside jit."""
    del kernel_size  # layout is independent of K (it is encoded in the weight shapes)

    def mat(w):  # (out_c, in_c, K) -> (K*in_c, out_c), row index = tap*in_c + c
        w = jnp.asarray(w, jnp.float32)
        out_c, in_c, k = w.shape
        return jnp.transpose(w, (2, 1, 0)).reshape(k * in_c, out_c)

    packed = []
    for blk in ('block1', 'block2', 'block3'):
        p = params[blk]
        packed.append(mat(p['w1']))
        packed.append(jnp.stack([mat(p['w2']), mat(p['w3'])], axis=0))
        packed.append(jnp.stack([p['g1'], p['be1'], p['g2'], p['be2'],
                                 p['g3'], p['be3']], axis=0).astype(jnp.float32))
        # conv biases b1/b2/b3 are intentionally not passed: training-mode BatchNorm
        # subtracts the per-channel batch mean, cancelling them exactly.
    packed.append(jnp.asarray(params['fc_w'], jnp.float32).T)          # (C, ncls)
    packed.append(jnp.asarray(params['fc_b'], jnp.float32).reshape(1, -1))
    return tuple(packed)


def _cnn_forward_packed(x_ncl, packed, kernel_size):
    (w1a, w23a, gba, w1b, w23b, gbb, w1c, w23c, gbc, fcw, fcb) = packed
    N, C_in, L = x_ncl.shape
    hidden_sizes = (gba.shape[1], gbb.shape[1], gbc.shape[1])
    ncls = fcw.shape[1]
    x_nlc = jnp.transpose(x_ncl, (0, 2, 1)).astype(jnp.float32)        # NCL -> NLC
    kern = functools.partial(_cnn_kernel, N, L, C_in, hidden_sizes,
                             kernel_size, ncls, 1e-5)
    return pl.pallas_call(
        kern,
        out_shape=jax.ShapeDtypeStruct((N, ncls), jnp.float32),
        in_specs=[_vmem_spec()] * 12,
        out_specs=_vmem_spec(),
    )(x_nlc, w1a, w23a, gba, w1b, w23b, gbb, w1c, w23c, gbc, fcw, fcb)


def make_cnn_forward(params, kernel_size):
    """Pack params once and return a jitted forward: x (N, C_in, L) -> (N, ncls)."""
    packed = pack_cnn_params(params, kernel_size)
    return jax.jit(lambda x: _cnn_forward_packed(x, packed, kernel_size))


# --------------------------- pure-JAX reference ---------------------------------------

def _conv_norm_pool_ref(x, p, K):
    hi = jax.lax.Precision.HIGHEST

    def conv(x, w, b):
        y = jax.lax.conv_general_dilated(
            x, w, window_strides=(1,), padding='VALID',
            dimension_numbers=('NCH', 'OIH', 'NCH'), precision=hi)
        return y + b[None, :, None]

    def bn(x, g, be):
        mean = jnp.mean(x, axis=(0, 2), keepdims=True)
        var = jnp.mean((x - mean) ** 2, axis=(0, 2), keepdims=True)
        return (x - mean) / jnp.sqrt(var + 1e-5) * g[None, :, None] + be[None, :, None]

    def swish(v):
        return v * jax.nn.sigmoid(v)

    def pad(v):
        return jnp.pad(v, ((0, 0), (0, 0), (K - 1, 0)))

    conv1 = conv(x, p['w1'], p['b1'])
    h = pad(swish(bn(conv1, p['g1'], p['be1'])))
    h = conv(h, p['w2'], p['b2'])
    h = pad(swish(bn(h, p['g2'], p['be2'])))
    conv3 = conv(h, p['w3'], p['b3'])
    h = pad(swish(bn(conv1 + conv3, p['g3'], p['be3'])))
    Lo = h.shape[-1] // 2
    h = h[:, :, :2 * Lo].reshape(h.shape[0], h.shape[1], Lo, 2)
    return jnp.max(h, axis=-1)


def _cnn_ref(x_ncl, params, K):
    h = x_ncl
    for blk in ('block1', 'block2', 'block3'):
        h = _conv_norm_pool_ref(h, params[blk], K)
    feat = jnp.mean(h, axis=2)                       # AdaptiveAvgPool1d(1) + view
    logits = jnp.dot(feat, params['fc_w'].T, precision=jax.lax.Precision.HIGHEST)
    logits = logits + params['fc_b']
    return jax.nn.softmax(logits, axis=1)


# --------------------------------- test driver ----------------------------------------

if __name__ == "__main__":
    key = jax.random.PRNGKey(0)
    N = 2               # batch
    C_in = 1            # CNN default input_size=1
    L = 16              # sequence length (16 -> 8 -> 4 -> 2 across the three blocks)
    hid = 32            # scaled-down hid_size (module default is 256)
    K = 4               # kernel_size (module default)
    ncls = 4            # num_classes

    def conv_init(k, out_c, in_c, ksz):
        bound = 1.0 / (in_c * ksz) ** 0.5
        kw, kb = jax.random.split(k)
        w = jax.random.uniform(kw, (out_c, in_c, ksz), jnp.float32, -bound, bound)
        b = jax.random.uniform(kb, (out_c,), jnp.float32, -bound, bound)
        return w, b

    def block_params(k, in_c, h):
        k1, k2, k3 = jax.random.split(k, 3)
        w1, b1 = conv_init(k1, h, in_c, K)
        w2, b2 = conv_init(k2, h, h, K)
        w3, b3 = conv_init(k3, h, h, K)
        ones = jnp.ones((h,), jnp.float32)
        zeros = jnp.zeros((h,), jnp.float32)
        return dict(w1=w1, b1=b1, g1=ones, be1=zeros,
                    w2=w2, b2=b2, g2=ones, be2=zeros,
                    w3=w3, b3=b3, g3=ones, be3=zeros)

    kb1, kb2, kb3, kfc, kx = jax.random.split(key, 5)
    params = {
        'block1': block_params(kb1, C_in, hid),
        'block2': block_params(kb2, hid, hid // 2),
        'block3': block_params(kb3, hid // 2, hid // 4),
    }
    fc_in = hid // 4
    bound = 1.0 / fc_in ** 0.5
    kfw, kfb = jax.random.split(kfc)
    params['fc_w'] = jax.random.uniform(kfw, (ncls, fc_in), jnp.float32, -bound, bound)
    params['fc_b'] = jax.random.uniform(kfb, (ncls,), jnp.float32, -bound, bound)

    x = jax.random.normal(kx, (N, C_in, L), jnp.float32)

    fwd = make_cnn_forward(params, K)          # params packed once, forward jitted
    out = jax.block_until_ready(fwd(x))

    ref = _cnn_ref(x, params, K)
    assert out.shape == ref.shape == (N, ncls), (out.shape, ref.shape)
    err = float(jnp.max(jnp.abs(out - ref)))
    # tolerance covers MXU f32 accumulation + one-pass BN stats across three blocks
    assert jnp.allclose(out, ref, atol=2e-3, rtol=2e-3), err
    assert bool(jnp.allclose(jnp.sum(out, axis=1), 1.0, atol=1e-4))

    print("KERNEL_OK")
</pallas_src>

<mosaic_0001>
module attributes {stable_mosaic.version = 11 : i64} {
  func.func @_cnn_kernel(%arg0: memref<2x16x1xf32, #tpu.memory_space<vmem>>, %arg1: memref<4x32xf32, #tpu.memory_space<vmem>>, %arg2: memref<2x128x32xf32, #tpu.memory_space<vmem>>, %arg3: memref<6x32xf32, #tpu.memory_space<vmem>>, %arg4: memref<128x16xf32, #tpu.memory_space<vmem>>, %arg5: memref<2x64x16xf32, #tpu.memory_space<vmem>>, %arg6: memref<6x16xf32, #tpu.memory_space<vmem>>, %arg7: memref<64x8xf32, #tpu.memory_space<vmem>>, %arg8: memref<2x32x8xf32, #tpu.memory_space<vmem>>, %arg9: memref<6x8xf32, #tpu.memory_space<vmem>>, %arg10: memref<8x4xf32, #tpu.memory_space<vmem>>, %arg11: memref<1x4xf32, #tpu.memory_space<vmem>>, %arg12: memref<2x4xf32, #tpu.memory_space<vmem>>) attributes {dimension_semantics = [], scalar_prefetch = 0 : i64, scratch_operands = 0 : i64, tpu.core_type = #tpu.core_type<tc>} {
    %c0 = arith.constant 0 : index
    %c0_0 = arith.constant 0 : index
    %c0_1 = arith.constant 0 : index
    %0 = vector.load %arg0[%c0, %c0_0, %c0_1] : memref<2x16x1xf32, #tpu.memory_space<vmem>>, vector<1x16x1xf32>
    %1 = vector.shape_cast %0 : vector<1x16x1xf32> to vector<16x1xf32>
    %c1 = arith.constant 1 : index
    %c0_2 = arith.constant 0 : index
    %c0_3 = arith.constant 0 : index
    %2 = vector.load %arg0[%c1, %c0_2, %c0_3] : memref<2x16x1xf32, #tpu.memory_space<vmem>>, vector<1x16x1xf32>
    %3 = vector.shape_cast %2 : vector<1x16x1xf32> to vector<16x1xf32>
    %c0_4 = arith.constant 0 : index
    %c0_5 = arith.constant 0 : index
    %4 = vector.load %arg1[%c0_4, %c0_5] : memref<4x32xf32, #tpu.memory_space<vmem>>, vector<4x32xf32>
    %c0_6 = arith.constant 0 : index
    %c0_7 = arith.constant 0 : index
    %c0_8 = arith.constant 0 : index
    %5 = vector.load %arg2[%c0_6, %c0_7, %c0_8] : memref<2x128x32xf32, #tpu.memory_space<vmem>>, vector<1x128x32xf32>
    %6 = vector.shape_cast %5 : vector<1x128x32xf32> to vector<128x32xf32>
    %c1_9 = arith.constant 1 : index
    %c0_10 = arith.constant 0 : index
    %c0_11 = arith.constant 0 : index
    %7 = vector.load %arg2[%c1_9, %c0_10, %c0_11] : memref<2x128x32xf32, #tpu.memory_space<vmem>>, vector<1x128x32xf32>
    %8 = vector.shape_cast %7 : vector<1x128x32xf32> to vector<128x32xf32>
    %cst = arith.constant 0.000000e+00 : f32
    %9 = vector.broadcast %cst : f32 to vector<3x32xf32>
    %10 = vector.extract_strided_slice %1 {offsets = [0, 0], sizes = [13, 1], strides = [1, 1]} : vector<16x1xf32> to vector<13x1xf32>
    %11 = vector.extract_strided_slice %3 {offsets = [0, 0], sizes = [13, 1], strides = [1, 1]} : vector<16x1xf32> to vector<13x1xf32>
    %12 = tpu.concatenate %10, %11 in 0 : vector<13x1xf32>, vector<13x1xf32> -> vector<26x1xf32>
    %13 = vector.extract_strided_slice %4 {offsets = [0, 0], sizes = [1, 32], strides = [1, 1]} : vector<4x32xf32> to vector<1x32xf32>
    %14 = vector.broadcast %12 : vector<26x1xf32> to vector<26x32xf32>
    %15 = vector.broadcast %13 : vector<1x32xf32> to vector<26x32xf32>
    %16 = arith.mulf %14, %15 : vector<26x32xf32>
    %17 = vector.extract_strided_slice %1 {offsets = [1, 0], sizes = [13, 1], strides = [1, 1]} : vector<16x1xf32> to vector<13x1xf32>
    %18 = vector.extract_strided_slice %3 {offsets = [1, 0], sizes = [13, 1], strides = [1, 1]} : vector<16x1xf32> to vector<13x1xf32>
    %19 = tpu.concatenate %17, %18 in 0 : vector<13x1xf32>, vector<13x1xf32> -> vector<26x1xf32>
    %20 = vector.extract_strided_slice %4 {offsets = [1, 0], sizes = [1, 32], strides = [1, 1]} : vector<4x32xf32> to vector<1x32xf32>
    %21 = vector.broadcast %19 : vector<26x1xf32> to vector<26x32xf32>
    %22 = vector.broadcast %20 : vector<1x32xf32> to vector<26x32xf32>
    %23 = arith.mulf %21, %22 : vector<26x32xf32>
    %24 = arith.addf %16, %23 : vector<26x32xf32>
    %25 = vector.extract_strided_slice %1 {offsets = [2, 0], sizes = [13, 1], strides = [1, 1]} : vector<16x1xf32> to vector<13x1xf32>
    %26 = vector.extract_strided_slice %3 {offsets = [2, 0], sizes = [13, 1], strides = [1, 1]} : vector<16x1xf32> to vector<13x1xf32>
    %27 = tpu.concatenate %25, %26 in 0 : vector<13x1xf32>, vector<13x1xf32> -> vector<26x1xf32>
    %28 = vector.extract_strided_slice %4 {offsets = [2, 0], sizes = [1, 32], strides = [1, 1]} : vector<4x32xf32> to vector<1x32xf32>
    %29 = vector.broadcast %27 : vector<26x1xf32> to vector<26x32xf32>
    %30 = vector.broadcast %28 : vector<1x32xf32> to vector<26x32xf32>
    %31 = arith.mulf %29, %30 : vector<26x32xf32>
    %32 = arith.addf %24, %31 : vector<26x32xf32>
    %33 = vector.extract_strided_slice %1 {offsets = [3, 0], sizes = [13, 1], strides = [1, 1]} : vector<16x1xf32> to vector<13x1xf32>
    %34 = vector.extract_strided_slice %3 {offsets = [3, 0], sizes = [13, 1], strides = [1, 1]} : vector<16x1xf32> to vector<13x1xf32>
    %35 = tpu.concatenate %33, %34 in 0 : vector<13x1xf32>, vector<13x1xf32> -> vector<26x1xf32>
    %36 = vector.extract_strided_slice %4 {offsets = [3, 0], sizes = [1, 32], strides = [1, 1]} : vector<4x32xf32> to vector<1x32xf32>
    %37 = vector.broadcast %35 : vector<26x1xf32> to vector<26x32xf32>
    %38 = vector.broadcast %36 : vector<1x32xf32> to vector<26x32xf32>
    %39 = arith.mulf %37, %38 : vector<26x32xf32>
    %40 = arith.addf %32, %39 : vector<26x32xf32>
    %c0_12 = arith.constant 0 : index
    %c0_13 = arith.constant 0 : index
    %41 = vector.load %arg3[%c0_12, %c0_13] : memref<6x32xf32, #tpu.memory_space<vmem>>, vector<1x32xf32>
    %c1_14 = arith.constant 1 : index
    %c0_15 = arith.constant 0 : index
    %42 = vector.load %arg3[%c1_14, %c0_15] : memref<6x32xf32, #tpu.memory_space<vmem>>, vector<1x32xf32>
    %cst_16 = arith.constant dense<0.000000e+00> : vector<32xf32>
    %43 = vector.multi_reduction <add>, %40, %cst_16 [0] : vector<26x32xf32> to vector<32xf32>
    %44 = vector.shape_cast %43 : vector<32xf32> to vector<1x32xf32>
    %45 = arith.mulf %40, %40 : vector<26x32xf32>
    %cst_17 = arith.constant dense<0.000000e+00> : vector<32xf32>
    %46 = vector.multi_reduction <add>, %45, %cst_17 [0] : vector<26x32xf32> to vector<32xf32>
    %47 = vector.shape_cast %46 : vector<32xf32> to vector<1x32xf32>
    %cst_18 = arith.constant 0.0384615399 : f32
    %48 = vector.broadcast %cst_18 : f32 to vector<1x32xf32>
    %49 = arith.mulf %44, %48 : vector<1x32xf32>
    %cst_19 = arith.constant 0.0384615399 : f32
    %50 = vector.broadcast %cst_19 : f32 to vector<1x32xf32>
    %51 = arith.mulf %47, %50 : vector<1x32xf32>
    %52 = arith.mulf %49, %49 : vector<1x32xf32>
    %53 = arith.subf %51, %52 : vector<1x32xf32>
    %cst_20 = arith.constant 0.000000e+00 : f32
    %54 = vector.broadcast %cst_20 : f32 to vector<1x32xf32>
    %55 = arith.maximumf %53, %54 : vector<1x32xf32>
    %cst_21 = arith.constant 9.99999974E-6 : f32
    %56 = vector.broadcast %cst_21 : f32 to vector<1x32xf32>
    %57 = arith.addf %55, %56 : vector<1x32xf32>
    %58 = math.rsqrt %57 : vector<1x32xf32>
    %59 = arith.mulf %58, %41 : vector<1x32xf32>
    %60 = arith.mulf %49, %59 : vector<1x32xf32>
    %61 = arith.subf %42, %60 : vector<1x32xf32>
    %62 = vector.broadcast %59 : vector<1x32xf32> to vector<26x32xf32>
    %63 = arith.mulf %40, %62 : vector<26x32xf32>
    %64 = vector.broadcast %61 : vector<1x32xf32> to vector<26x32xf32>
    %65 = arith.addf %63, %64 : vector<26x32xf32>
    %cst_22 = arith.constant 0.000000e+00 : f32
    %66 = vector.broadcast %cst_22 : f32 to vector<26x32xf32>
    %67 = arith.subf %66, %65 : vector<26x32xf32>
    %68 = math.exp %67 : vector<26x32xf32>
    %cst_23 = arith.constant 1.000000e+00 : f32
    %69 = vector.broadcast %cst_23 : f32 to vector<26x32xf32>
    %70 = arith.addf %69, %68 : vector<26x32xf32>
    %71 = tpu.reciprocal %70 {approx = true} : vector<26x32xf32> -> vector<26x32xf32>
    %72 = arith.mulf %70, %71 : vector<26x32xf32>
    %cst_24 = arith.constant 2.000000e+00 : f32
    %73 = vector.broadcast %cst_24 : f32 to vector<26x32xf32>
    %74 = arith.subf %73, %72 : vector<26x32xf32>
    %75 = arith.mulf %71, %74 : vector<26x32xf32>
    %76 = arith.mulf %65, %75 : vector<26x32xf32>
    %77 = vector.extract_strided_slice %76 {offsets = [0, 0], sizes = [13, 32], strides = [1, 1]} : vector<26x32xf32> to vector<13x32xf32>
    %78 = tpu.concatenate %9, %77 in 0 : vector<3x32xf32>, vector<13x32xf32> -> vector<16x32xf32>
    %79 = vector.extract_strided_slice %76 {offsets = [13, 0], sizes = [13, 32], strides = [1, 1]} : vector<26x32xf32> to vector<13x32xf32>
    %80 = tpu.concatenate %9, %79 in 0 : vector<3x32xf32>, vector<13x32xf32> -> vector<16x32xf32>
    %81 = vector.extract_strided_slice %78 {offsets = [0, 0], sizes = [13, 32], strides = [1, 1]} : vector<16x32xf32> to vector<13x32xf32>
    %82 = vector.extract_strided_slice %80 {offsets = [0, 0], sizes = [13, 32], strides = [1, 1]} : vector<16x32xf32> to vector<13x32xf32>
    %83 = tpu.concatenate %81, %82 in 0 : vector<13x32xf32>, vector<13x32xf32> -> vector<26x32xf32>
    %84 = vector.extract_strided_slice %6 {offsets = [0, 0], sizes = [32, 32], strides = [1, 1]} : vector<128x32xf32> to vector<32x32xf32>
    %cst_25 = arith.constant dense<0.000000e+00> : vector<26x32xf32>
    %85 = tpu.matmul %83, %84, %cst_25 {dimension_numbers = #tpu.dot_dimension_numbers<[1], [0], [0], [1], [0, 0, 1, 1], [], []>} : vector<26x32xf32>, vector<32x32xf32>, vector<26x32xf32> -> vector<26x32xf32>
    %86 = vector.extract_strided_slice %78 {offsets = [1, 0], sizes = [13, 32], strides = [1, 1]} : vector<16x32xf32> to vector<13x32xf32>
    %87 = vector.extract_strided_slice %80 {offsets = [1, 0], sizes = [13, 32], strides = [1, 1]} : vector<16x32xf32> to vector<13x32xf32>
    %88 = tpu.concatenate %86, %87 in 0 : vector<13x32xf32>, vector<13x32xf32> -> vector<26x32xf32>
    %89 = vector.extract_strided_slice %6 {offsets = [32, 0], sizes = [32, 32], strides = [1, 1]} : vector<128x32xf32> to vector<32x32xf32>
    %cst_26 = arith.constant dense<0.000000e+00> : vector<26x32xf32>
    %90 = tpu.matmul %88, %89, %cst_26 {dimension_numbers = #tpu.dot_dimension_numbers<[1], [0], [0], [1], [0, 0, 1, 1], [], []>} : vector<26x32xf32>, vector<32x32xf32>, vector<26x32xf32> -> vector<26x32xf32>
    %91 = arith.addf %85, %90 : vector<26x32xf32>
    %92 = vector.extract_strided_slice %78 {offsets = [2, 0], sizes = [13, 32], strides = [1, 1]} : vector<16x32xf32> to vector<13x32xf32>
    %93 = vector.extract_strided_slice %80 {offsets = [2, 0], sizes = [13, 32], strides = [1, 1]} : vector<16x32xf32> to vector<13x32xf32>
    %94 = tpu.concatenate %92, %93 in 0 : vector<13x32xf32>, vector<13x32xf32> -> vector<26x32xf32>
    %95 = vector.extract_strided_slice %6 {offsets = [64, 0], sizes = [32, 32], strides = [1, 1]} : vector<128x32xf32> to vector<32x32xf32>
    %cst_27 = arith.constant dense<0.000000e+00> : vector<26x32xf32>
    %96 = tpu.matmul %94, %95, %cst_27 {dimension_numbers = #tpu.dot_dimension_numbers<[1], [0], [0], [1], [0, 0, 1, 1], [], []>} : vector<26x32xf32>, vector<32x32xf32>, vector<26x32xf32> -> vector<26x32xf32>
    %97 = arith.addf %91, %96 : vector<26x32xf32>
    %98 = vector.extract_strided_slice %78 {offsets = [3, 0], sizes = [13, 32], strides = [1, 1]} : vector<16x32xf32> to vector<13x32xf32>
    %99 = vector.extract_strided_slice %80 {offsets = [3, 0], sizes = [13, 32], strides = [1, 1]} : vector<16x32xf32> to vector<13x32xf32>
    %100 = tpu.concatenate %98, %99 in 0 : vector<13x32xf32>, vector<13x32xf32> -> vector<26x32xf32>
    %101 = vector.extract_strided_slice %6 {offsets = [96, 0], sizes = [32, 32], strides = [1, 1]} : vector<128x32xf32> to vector<32x32xf32>
    %cst_28 = arith.constant dense<0.000000e+00> : vector<26x32xf32>
    %102 = tpu.matmul %100, %101, %cst_28 {dimension_numbers = #tpu.dot_dimension_numbers<[1], [0], [0], [1], [0, 0, 1, 1], [], []>} : vector<26x32xf32>, vector<32x32xf32>, vector<26x32xf32> -> vector<26x32xf32>
    %103 = arith.addf %97, %102 : vector<26x32xf32>
    %c2 = arith.constant 2 : index
    %c0_29 = arith.constant 0 : index
    %104 = vector.load %arg3[%c2, %c0_29] : memref<6x32xf32, #tpu.memory_space<vmem>>, vector<1x32xf32>
    %c3 = arith.constant 3 : index
    %c0_30 = arith.constant 0 : index
    %105 = vector.load %arg3[%c3, %c0_30] : memref<6x32xf32, #tpu.memory_space<vmem>>, vector<1x32xf32>
    %cst_31 = arith.constant dense<0.000000e+00> : vector<32xf32>
    %106 = vector.multi_reduction <add>, %103, %cst_31 [0] : vector<26x32xf32> to vector<32xf32>
    %107 = vector.shape_cast %106 : vector<32xf32> to vector<1x32xf32>
    %108 = arith.mulf %103, %103 : vector<26x32xf32>
    %cst_32 = arith.constant dense<0.000000e+00> : vector<32xf32>
    %109 = vector.multi_reduction <add>, %108, %cst_32 [0] : vector<26x32xf32> to vector<32xf32>
    %110 = vector.shape_cast %109 : vector<32xf32> to vector<1x32xf32>
    %cst_33 = arith.constant 0.0384615399 : f32
    %111 = vector.broadcast %cst_33 : f32 to vector<1x32xf32>
    %112 = arith.mulf %107, %111 : vector<1x32xf32>
    %cst_34 = arith.constant 0.0384615399 : f32
    %113 = vector.broadcast %cst_34 : f32 to vector<1x32xf32>
    %114 = arith.mulf %110, %113 : vector<1x32xf32>
    %115 = arith.mulf %112, %112 : vector<1x32xf32>
    %116 = arith.subf %114, %115 : vector<1x32xf32>
    %cst_35 = arith.constant 0.000000e+00 : f32
    %117 = vector.broadcast %cst_35 : f32 to vector<1x32xf32>
    %118 = arith.maximumf %116, %117 : vector<1x32xf32>
    %cst_36 = arith.constant 9.99999974E-6 : f32
    %119 = vector.broadcast %cst_36 : f32 to vector<1x32xf32>
    %120 = arith.addf %118, %119 : vector<1x32xf32>
    %121 = math.rsqrt %120 : vector<1x32xf32>
    %122 = arith.mulf %121, %104 : vector<1x32xf32>
    %123 = arith.mulf %112, %122 : vector<1x32xf32>
    %124 = arith.subf %105, %123 : vector<1x32xf32>
    %125 = vector.broadcast %122 : vector<1x32xf32> to vector<26x32xf32>
    %126 = arith.mulf %103, %125 : vector<26x32xf32>
    %127 = vector.broadcast %124 : vector<1x32xf32> to vector<26x32xf32>
    %128 = arith.addf %126, %127 : vector<26x32xf32>
    %cst_37 = arith.constant 0.000000e+00 : f32
    %129 = vector.broadcast %cst_37 : f32 to vector<26x32xf32>
    %130 = arith.subf %129, %128 : vector<26x32xf32>
    %131 = math.exp %130 : vector<26x32xf32>
    %cst_38 = arith.constant 1.000000e+00 : f32
    %132 = vector.broadcast %cst_38 : f32 to vector<26x32xf32>
    %133 = arith.addf %132, %131 : vector<26x32xf32>
    %134 = tpu.reciprocal %133 {approx = true} : vector<26x32xf32> -> vector<26x32xf32>
    %135 = arith.mulf %133, %134 : vector<26x32xf32>
    %cst_39 = arith.constant 2.000000e+00 : f32
    %136 = vector.broadcast %cst_39 : f32 to vector<26x32xf32>
    %137 = arith.subf %136, %135 : vector<26x32xf32>
    %138 = arith.mulf %134, %137 : vector<26x32xf32>
    %139 = arith.mulf %128, %138 : vector<26x32xf32>
    %140 = vector.extract_strided_slice %139 {offsets = [0, 0], sizes = [13, 32], strides = [1, 1]} : vector<26x32xf32> to vector<13x32xf32>
    %141 = tpu.concatenate %9, %140 in 0 : vector<3x32xf32>, vector<13x32xf32> -> vector<16x32xf32>
    %142 = vector.extract_strided_slice %139 {offsets = [13, 0], sizes = [13, 32], strides = [1, 1]} : vector<26x32xf32> to vector<13x32xf32>
    %143 = tpu.concatenate %9, %142 in 0 : vector<3x32xf32>, vector<13x32xf32> -> vector<16x32xf32>
    %144 = vector.extract_strided_slice %141 {offsets = [0, 0], sizes = [13, 32], strides = [1, 1]} : vector<16x32xf32> to vector<13x32xf32>
    %145 = vector.extract_strided_slice %143 {offsets = [0, 0], sizes = [13, 32], strides = [1, 1]} : vector<16x32xf32> to vector<13x32xf32>
    %146 = tpu.concatenate %144, %145 in 0 : vector<13x32xf32>, vector<13x32xf32> -> vector<26x32xf32>
    %147 = vector.extract_strided_slice %8 {offsets = [0, 0], sizes = [32, 32], strides = [1, 1]} : vector<128x32xf32> to vector<32x32xf32>
    %cst_40 = arith.constant dense<0.000000e+00> : vector<26x32xf32>
    %148 = tpu.matmul %146, %147, %cst_40 {dimension_numbers = #tpu.dot_dimension_numbers<[1], [0], [0], [1], [0, 0, 1, 1], [], []>} : vector<26x32xf32>, vector<32x32xf32>, vector<26x32xf32> -> vector<26x32xf32>
    %149 = vector.extract_strided_slice %141 {offsets = [1, 0], sizes = [13, 32], strides = [1, 1]} : vector<16x32xf32> to vector<13x32xf32>
    %150 = vector.extract_strided_slice %143 {offsets = [1, 0], sizes = [13, 32], strides = [1, 1]} : vector<16x32xf32> to vector<13x32xf32>
    %151 = tpu.concatenate %149, %150 in 0 : vector<13x32xf32>, vector<13x32xf32> -> vector<26x32xf32>
    %152 = vector.extract_strided_slice %8 {offsets = [32, 0], sizes = [32, 32], strides = [1, 1]} : vector<128x32xf32> to vector<32x32xf32>
    %cst_41 = arith.constant dense<0.000000e+00> : vector<26x32xf32>
    %153 = tpu.matmul %151, %152, %cst_41 {dimension_numbers = #tpu.dot_dimension_numbers<[1], [0], [0], [1], [0, 0, 1, 1], [], []>} : vector<26x32xf32>, vector<32x32xf32>, vector<26x32xf32> -> vector<26x32xf32>
    %154 = arith.addf %148, %153 : vector<26x32xf32>
    %155 = vector.extract_strided_slice %141 {offsets = [2, 0], sizes = [13, 32], strides = [1, 1]} : vector<16x32xf32> to vector<13x32xf32>
    %156 = vector.extract_strided_slice %143 {offsets = [2, 0], sizes = [13, 32], strides = [1, 1]} : vector<16x32xf32> to vector<13x32xf32>
    %157 = tpu.concatenate %155, %156 in 0 : vector<13x32xf32>, vector<13x32xf32> -> vector<26x32xf32>
    %158 = vector.extract_strided_slice %8 {offsets = [64, 0], sizes = [32, 32], strides = [1, 1]} : vector<128x32xf32> to vector<32x32xf32>
    %cst_42 = arith.constant dense<0.000000e+00> : vector<26x32xf32>
    %159 = tpu.matmul %157, %158, %cst_42 {dimension_numbers = #tpu.dot_dimension_numbers<[1], [0], [0], [1], [0, 0, 1, 1], [], []>} : vector<26x32xf32>, vector<32x32xf32>, vector<26x32xf32> -> vector<26x32xf32>
    %160 = arith.addf %154, %159 : vector<26x32xf32>
    %161 = vector.extract_strided_slice %141 {offsets = [3, 0], sizes = [13, 32], strides = [1, 1]} : vector<16x32xf32> to vector<13x32xf32>
    %162 = vector.extract_strided_slice %143 {offsets = [3, 0], sizes = [13, 32], strides = [1, 1]} : vector<16x32xf32> to vector<13x32xf32>
    %163 = tpu.concatenate %161, %162 in 0 : vector<13x32xf32>, vector<13x32xf32> -> vector<26x32xf32>
    %164 = vector.extract_strided_slice %8 {offsets = [96, 0], sizes = [32, 32], strides = [1, 1]} : vector<128x32xf32> to vector<32x32xf32>
    %cst_43 = arith.constant dense<0.000000e+00> : vector<26x32xf32>
    %165 = tpu.matmul %163, %164, %cst_43 {dimension_numbers = #tpu.dot_dimension_numbers<[1], [0], [0], [1], [0, 0, 1, 1], [], []>} : vector<26x32xf32>, vector<32x32xf32>, vector<26x32xf32> -> vector<26x32xf32>
    %166 = arith.addf %160, %165 : vector<26x32xf32>
    %167 = arith.addf %40, %166 : vector<26x32xf32>
    %c4 = arith.constant 4 : index
    %c0_44 = arith.constant 0 : index
    %168 = vector.load %arg3[%c4, %c0_44] : memref<6x32xf32, #tpu.memory_space<vmem>>, vector<1x32xf32>
    %c5 = arith.constant 5 : index
    %c0_45 = arith.constant 0 : index
    %169 = vector.load %arg3[%c5, %c0_45] : memref<6x32xf32, #tpu.memory_space<vmem>>, vector<1x32xf32>
    %cst_46 = arith.constant dense<0.000000e+00> : vector<32xf32>
    %170 = vector.multi_reduction <add>, %167, %cst_46 [0] : vector<26x32xf32> to vector<32xf32>
    %171 = vector.shape_cast %170 : vector<32xf32> to vector<1x32xf32>
    %172 = arith.mulf %167, %167 : vector<26x32xf32>
    %cst_47 = arith.constant dense<0.000000e+00> : vector<32xf32>
    %173 = vector.multi_reduction <add>, %172, %cst_47 [0] : vector<26x32xf32> to vector<32xf32>
    %174 = vector.shape_cast %173 : vector<32xf32> to vector<1x32xf32>
    %cst_48 = arith.constant 0.0384615399 : f32
    %175 = vector.broadcast %cst_48 : f32 to vector<1x32xf32>
    %176 = arith.mulf %171, %175 : vector<1x32xf32>
    %cst_49 = arith.constant 0.0384615399 : f32
    %177 = vector.broadcast %cst_49 : f32 to vector<1x32xf32>
    %178 = arith.mulf %174, %177 : vector<1x32xf32>
    %179 = arith.mulf %176, %176 : vector<1x32xf32>
    %180 = arith.subf %178, %179 : vector<1x32xf32>
    %cst_50 = arith.constant 0.000000e+00 : f32
    %181 = vector.broadcast %cst_50 : f32 to vector<1x32xf32>
    %182 = arith.maximumf %180, %181 : vector<1x32xf32>
    %cst_51 = arith.constant 9.99999974E-6 : f32
    %183 = vector.broadcast %cst_51 : f32 to vector<1x32xf32>
    %184 = arith.addf %182, %183 : vector<1x32xf32>
    %185 = math.rsqrt %184 : vector<1x32xf32>
    %186 = arith.mulf %185, %168 : vector<1x32xf32>
    %187 = arith.mulf %176, %186 : vector<1x32xf32>
    %188 = arith.subf %169, %187 : vector<1x32xf32>
    %189 = vector.broadcast %186 : vector<1x32xf32> to vector<26x32xf32>
    %190 = arith.mulf %167, %189 : vector<26x32xf32>
    %191 = vector.broadcast %188 : vector<1x32xf32> to vector<26x32xf32>
    %192 = arith.addf %190, %191 : vector<26x32xf32>
    %cst_52 = arith.constant 0.000000e+00 : f32
    %193 = vector.broadcast %cst_52 : f32 to vector<26x32xf32>
    %194 = arith.subf %193, %192 : vector<26x32xf32>
    %195 = math.exp %194 : vector<26x32xf32>
    %cst_53 = arith.constant 1.000000e+00 : f32
    %196 = vector.broadcast %cst_53 : f32 to vector<26x32xf32>
    %197 = arith.addf %196, %195 : vector<26x32xf32>
    %198 = tpu.reciprocal %197 {approx = true} : vector<26x32xf32> -> vector<26x32xf32>
    %199 = arith.mulf %197, %198 : vector<26x32xf32>
    %cst_54 = arith.constant 2.000000e+00 : f32
    %200 = vector.broadcast %cst_54 : f32 to vector<26x32xf32>
    %201 = arith.subf %200, %199 : vector<26x32xf32>
    %202 = arith.mulf %198, %201 : vector<26x32xf32>
    %203 = arith.mulf %192, %202 : vector<26x32xf32>
    %204 = vector.extract_strided_slice %203 {offsets = [0, 0], sizes = [13, 32], strides = [1, 1]} : vector<26x32xf32> to vector<13x32xf32>
    %205 = tpu.concatenate %9, %204 in 0 : vector<3x32xf32>, vector<13x32xf32> -> vector<16x32xf32>
    %206 = vector.extract_strided_slice %203 {offsets = [13, 0], sizes = [13, 32], strides = [1, 1]} : vector<26x32xf32> to vector<13x32xf32>
    %207 = tpu.concatenate %9, %206 in 0 : vector<3x32xf32>, vector<13x32xf32> -> vector<16x32xf32>
    %208 = vector.extract_strided_slice %205 {offsets = [0, 0], sizes = [1, 32], strides = [1, 1]} : vector<16x32xf32> to vector<1x32xf32>
    %209 = vector.extract_strided_slice %205 {offsets = [1, 0], sizes = [1, 32], strides = [1, 1]} : vector<16x32xf32> to vector<1x32xf32>
    %210 = arith.maximumf %208, %209 : vector<1x32xf32>
    %211 = vector.extract_strided_slice %205 {offsets = [2, 0], sizes = [1, 32], strides = [1, 1]} : vector<16x32xf32> to vector<1x32xf32>
    %212 = vector.extract_strided_slice %205 {offsets = [3, 0], sizes = [1, 32], strides = [1, 1]} : vector<16x32xf32> to vector<1x32xf32>
    %213 = arith.maximumf %211, %212 : vector<1x32xf32>
    %214 = vector.extract_strided_slice %205 {offsets = [4, 0], sizes = [1, 32], strides = [1, 1]} : vector<16x32xf32> to vector<1x32xf32>
    %215 = vector.extract_strided_slice %205 {offsets = [5, 0], sizes = [1, 32], strides = [1, 1]} : vector<16x32xf32> to vector<1x32xf32>
    %216 = arith.maximumf %214, %215 : vector<1x32xf32>
    %217 = vector.extract_strided_slice %205 {offsets = [6, 0], sizes = [1, 32], strides = [1, 1]} : vector<16x32xf32> to vector<1x32xf32>
    %218 = vector.extract_strided_slice %205 {offsets = [7, 0], sizes = [1, 32], strides = [1, 1]} : vector<16x32xf32> to vector<1x32xf32>
    %219 = arith.maximumf %217, %218 : vector<1x32xf32>
    %220 = vector.extract_strided_slice %205 {offsets = [8, 0], sizes = [1, 32], strides = [1, 1]} : vector<16x32xf32> to vector<1x32xf32>
    %221 = vector.extract_strided_slice %205 {offsets = [9, 0], sizes = [1, 32], strides = [1, 1]} : vector<16x32xf32> to vector<1x32xf32>
    %222 = arith.maximumf %220, %221 : vector<1x32xf32>
    %223 = vector.extract_strided_slice %205 {offsets = [10, 0], sizes = [1, 32], strides = [1, 1]} : vector<16x32xf32> to vector<1x32xf32>
    %224 = vector.extract_strided_slice %205 {offsets = [11, 0], sizes = [1, 32], strides = [1, 1]} : vector<16x32xf32> to vector<1x32xf32>
    %225 = arith.maximumf %223, %224 : vector<1x32xf32>
    %226 = vector.extract_strided_slice %205 {offsets = [12, 0], sizes = [1, 32], strides = [1, 1]} : vector<16x32xf32> to vector<1x32xf32>
    %227 = vector.extract_strided_slice %205 {offsets = [13, 0], sizes = [1, 32], strides = [1, 1]} : vector<16x32xf32> to vector<1x32xf32>
    %228 = arith.maximumf %226, %227 : vector<1x32xf32>
    %229 = vector.extract_strided_slice %205 {offsets = [14, 0], sizes = [1, 32], strides = [1, 1]} : vector<16x32xf32> to vector<1x32xf32>
    %230 = vector.extract_strided_slice %205 {offsets = [15, 0], sizes = [1, 32], strides = [1, 1]} : vector<16x32xf32> to vector<1x32xf32>
    %231 = arith.maximumf %229, %230 : vector<1x32xf32>
    %232 = tpu.concatenate %210, %213, %216, %219, %222, %225, %228, %231 in 0 : vector<1x32xf32>, vector<1x32xf32>, vector<1x32xf32>, vector<1x32xf32>, vector<1x32xf32>, vector<1x32xf32>, vector<1x32xf32>, vector<1x32xf32> -> vector<8x32xf32>
    %233 = vector.extract_strided_slice %207 {offsets = [0, 0], sizes = [1, 32], strides = [1, 1]} : vector<16x32xf32> to vector<1x32xf32>
    %234 = vector.extract_strided_slice %207 {offsets = [1, 0], sizes = [1, 32], strides = [1, 1]} : vector<16x32xf32> to vector<1x32xf32>
    %235 = arith.maximumf %233, %234 : vector<1x32xf32>
    %236 = vector.extract_strided_slice %207 {offsets = [2, 0], sizes = [1, 32], strides = [1, 1]} : vector<16x32xf32> to vector<1x32xf32>
    %237 = vector.extract_strided_slice %207 {offsets = [3, 0], sizes = [1, 32], strides = [1, 1]} : vector<16x32xf32> to vector<1x32xf32>
    %238 = arith.maximumf %236, %237 : vector<1x32xf32>
    %239 = vector.extract_strided_slice %207 {offsets = [4, 0], sizes = [1, 32], strides = [1, 1]} : vector<16x32xf32> to vector<1x32xf32>
    %240 = vector.extract_strided_slice %207 {offsets = [5, 0], sizes = [1, 32], strides = [1, 1]} : vector<16x32xf32> to vector<1x32xf32>
    %241 = arith.maximumf %239, %240 : vector<1x32xf32>
    %242 = vector.extract_strided_slice %207 {offsets = [6, 0], sizes = [1, 32], strides = [1, 1]} : vector<16x32xf32> to vector<1x32xf32>
    %243 = vector.extract_strided_slice %207 {offsets = [7, 0], sizes = [1, 32], strides = [1, 1]} : vector<16x32xf32> to vector<1x32xf32>
    %244 = arith.maximumf %242, %243 : vector<1x32xf32>
    %245 = vector.extract_strided_slice %207 {offsets = [8, 0], sizes = [1, 32], strides = [1, 1]} : vector<16x32xf32> to vector<1x32xf32>
    %246 = vector.extract_strided_slice %207 {offsets = [9, 0], sizes = [1, 32], strides = [1, 1]} : vector<16x32xf32> to vector<1x32xf32>
    %247 = arith.maximumf %245, %246 : vector<1x32xf32>
    %248 = vector.extract_strided_slice %207 {offsets = [10, 0], sizes = [1, 32], strides = [1, 1]} : vector<16x32xf32> to vector<1x32xf32>
    %249 = vector.extract_strided_slice %207 {offsets = [11, 0], sizes = [1, 32], strides = [1, 1]} : vector<16x32xf32> to vector<1x32xf32>
    %250 = arith.maximumf %248, %249 : vector<1x32xf32>
    %251 = vector.extract_strided_slice %207 {offsets = [12, 0], sizes = [1, 32], strides = [1, 1]} : vector<16x32xf32> to vector<1x32xf32>
    %252 = vector.extract_strided_slice %207 {offsets = [13, 0], sizes = [1, 32], strides = [1, 1]} : vector<16x32xf32> to vector<1x32xf32>
    %253 = arith.maximumf %251, %252 : vector<1x32xf32>
    %254 = vector.extract_strided_slice %207 {offsets = [14, 0], sizes = [1, 32], strides = [1, 1]} : vector<16x32xf32> to vector<1x32xf32>
    %255 = vector.extract_strided_slice %207 {offsets = [15, 0], sizes = [1, 32], strides = [1, 1]} : vector<16x32xf32> to vector<1x32xf32>
    %256 = arith.maximumf %254, %255 : vector<1x32xf32>
    %257 = tpu.concatenate %235, %238, %241, %244, %247, %250, %253, %256 in 0 : vector<1x32xf32>, vector<1x32xf32>, vector<1x32xf32>, vector<1x32xf32>, vector<1x32xf32>, vector<1x32xf32>, vector<1x32xf32>, vector<1x32xf32> -> vector<8x32xf32>
    %c0_55 = arith.constant 0 : index
    %c0_56 = arith.constant 0 : index
    %258 = vector.load %arg4[%c0_55, %c0_56] : memref<128x16xf32, #tpu.memory_space<vmem>>, vector<128x16xf32>
    %c0_57 = arith.constant 0 : index
    %c0_58 = arith.constant 0 : index
    %c0_59 = arith.constant 0 : index
    %259 = vector.load %arg5[%c0_57, %c0_58, %c0_59] : memref<2x64x16xf32, #tpu.memory_space<vmem>>, vector<1x64x16xf32>
    %260 = vector.shape_cast %259 : vector<1x64x16xf32> to vector<64x16xf32>
    %c1_60 = arith.constant 1 : index
    %c0_61 = arith.constant 0 : index
    %c0_62 = arith.constant 0 : index
    %261 = vector.load %arg5[%c1_60, %c0_61, %c0_62] : memref<2x64x16xf32, #tpu.memory_space<vmem>>, vector<1x64x16xf32>
    %262 = vector.shape_cast %261 : vector<1x64x16xf32> to vector<64x16xf32>
    %cst_63 = arith.constant 0.000000e+00 : f32
    %263 = vector.broadcast %cst_63 : f32 to vector<3x16xf32>
    %264 = vector.extract_strided_slice %232 {offsets = [0, 0], sizes = [5, 32], strides = [1, 1]} : vector<8x32xf32> to vector<5x32xf32>
    %265 = vector.extract_strided_slice %257 {offsets = [0, 0], sizes = [5, 32], strides = [1, 1]} : vector<8x32xf32> to vector<5x32xf32>
    %266 = tpu.concatenate %264, %265 in 0 : vector<5x32xf32>, vector<5x32xf32> -> vector<10x32xf32>
    %267 = vector.extract_strided_slice %258 {offsets = [0, 0], sizes = [32, 16], strides = [1, 1]} : vector<128x16xf32> to vector<32x16xf32>
    %cst_64 = arith.constant dense<0.000000e+00> : vector<10x16xf32>
    %268 = tpu.matmul %266, %267, %cst_64 {dimension_numbers = #tpu.dot_dimension_numbers<[1], [0], [0], [1], [0, 0, 1, 1], [], []>} : vector<10x32xf32>, vector<32x16xf32>, vector<10x16xf32> -> vector<10x16xf32>
    %269 = vector.extract_strided_slice %232 {offsets = [1, 0], sizes = [5, 32], strides = [1, 1]} : vector<8x32xf32> to vector<5x32xf32>
    %270 = vector.extract_strided_slice %257 {offsets = [1, 0], sizes = [5, 32], strides = [1, 1]} : vector<8x32xf32> to vector<5x32xf32>
    %271 = tpu.concatenate %269, %270 in 0 : vector<5x32xf32>, vector<5x32xf32> -> vector<10x32xf32>
    %272 = vector.extract_strided_slice %258 {offsets = [32, 0], sizes = [32, 16], strides = [1, 1]} : vector<128x16xf32> to vector<32x16xf32>
    %cst_65 = arith.constant dense<0.000000e+00> : vector<10x16xf32>
    %273 = tpu.matmul %271, %272, %cst_65 {dimension_numbers = #tpu.dot_dimension_numbers<[1], [0], [0], [1], [0, 0, 1, 1], [], []>} : vector<10x32xf32>, vector<32x16xf32>, vector<10x16xf32> -> vector<10x16xf32>
    %274 = arith.addf %268, %273 : vector<10x16xf32>
    %275 = vector.extract_strided_slice %232 {offsets = [2, 0], sizes = [5, 32], strides = [1, 1]} : vector<8x32xf32> to vector<5x32xf32>
    %276 = vector.extract_strided_slice %257 {offsets = [2, 0], sizes = [5, 32], strides = [1, 1]} : vector<8x32xf32> to vector<5x32xf32>
    %277 = tpu.concatenate %275, %276 in 0 : vector<5x32xf32>, vector<5x32xf32> -> vector<10x32xf32>
    %278 = vector.extract_strided_slice %258 {offsets = [64, 0], sizes = [32, 16], strides = [1, 1]} : vector<128x16xf32> to vector<32x16xf32>
    %cst_66 = arith.constant dense<0.000000e+00> : vector<10x16xf32>
    %279 = tpu.matmul %277, %278, %cst_66 {dimension_numbers = #tpu.dot_dimension_numbers<[1], [0], [0], [1], [0, 0, 1, 1], [], []>} : vector<10x32xf32>, vector<32x16xf32>, vector<10x16xf32> -> vector<10x16xf32>
    %280 = arith.addf %274, %279 : vector<10x16xf32>
    %281 = vector.extract_strided_slice %232 {offsets = [3, 0], sizes = [5, 32], strides = [1, 1]} : vector<8x32xf32> to vector<5x32xf32>
    %282 = vector.extract_strided_slice %257 {offsets = [3, 0], sizes = [5, 32], strides = [1, 1]} : vector<8x32xf32> to vector<5x32xf32>
    %283 = tpu.concatenate %281, %282 in 0 : vector<5x32xf32>, vector<5x32xf32> -> vector<10x32xf32>
    %284 = vector.extract_strided_slice %258 {offsets = [96, 0], sizes = [32, 16], strides = [1, 1]} : vector<128x16xf32> to vector<32x16xf32>
    %cst_67 = arith.constant dense<0.000000e+00> : vector<10x16xf32>
    %285 = tpu.matmul %283, %284, %cst_67 {dimension_numbers = #tpu.dot_dimension_numbers<[1], [0], [0], [1], [0, 0, 1, 1], [], []>} : vector<10x32xf32>, vector<32x16xf32>, vector<10x16xf32> -> vector<10x16xf32>
    %286 = arith.addf %280, %285 : vector<10x16xf32>
    %c0_68 = arith.constant 0 : index
    %c0_69 = arith.constant 0 : index
    %287 = vector.load %arg6[%c0_68, %c0_69] : memref<6x16xf32, #tpu.memory_space<vmem>>, vector<1x16xf32>
    %c1_70 = arith.constant 1 : index
    %c0_71 = arith.constant 0 : index
    %288 = vector.load %arg6[%c1_70, %c0_71] : memref<6x16xf32, #tpu.memory_space<vmem>>, vector<1x16xf32>
    %cst_72 = arith.constant dense<0.000000e+00> : vector<16xf32>
    %289 = vector.multi_reduction <add>, %286, %cst_72 [0] : vector<10x16xf32> to vector<16xf32>
    %290 = vector.shape_cast %289 : vector<16xf32> to vector<1x16xf32>
    %291 = arith.mulf %286, %286 : vector<10x16xf32>
    %cst_73 = arith.constant dense<0.000000e+00> : vector<16xf32>
    %292 = vector.multi_reduction <add>, %291, %cst_73 [0] : vector<10x16xf32> to vector<16xf32>
    %293 = vector.shape_cast %292 : vector<16xf32> to vector<1x16xf32>
    %cst_74 = arith.constant 1.000000e-01 : f32
    %294 = vector.broadcast %cst_74 : f32 to vector<1x16xf32>
    %295 = arith.mulf %290, %294 : vector<1x16xf32>
    %cst_75 = arith.constant 1.000000e-01 : f32
    %296 = vector.broadcast %cst_75 : f32 to vector<1x16xf32>
    %297 = arith.mulf %293, %296 : vector<1x16xf32>
    %298 = arith.mulf %295, %295 : vector<1x16xf32>
    %299 = arith.subf %297, %298 : vector<1x16xf32>
    %cst_76 = arith.constant 0.000000e+00 : f32
    %300 = vector.broadcast %cst_76 : f32 to vector<1x16xf32>
    %301 = arith.maximumf %299, %300 : vector<1x16xf32>
    %cst_77 = arith.constant 9.99999974E-6 : f32
    %302 = vector.broadcast %cst_77 : f32 to vector<1x16xf32>
    %303 = arith.addf %301, %302 : vector<1x16xf32>
    %304 = math.rsqrt %303 : vector<1x16xf32>
    %305 = arith.mulf %304, %287 : vector<1x16xf32>
    %306 = arith.mulf %295, %305 : vector<1x16xf32>
    %307 = arith.subf %288, %306 : vector<1x16xf32>
    %308 = vector.broadcast %305 : vector<1x16xf32> to vector<10x16xf32>
    %309 = arith.mulf %286, %308 : vector<10x16xf32>
    %310 = vector.broadcast %307 : vector<1x16xf32> to vector<10x16xf32>
    %311 = arith.addf %309, %310 : vector<10x16xf32>
    %cst_78 = arith.constant 0.000000e+00 : f32
    %312 = vector.broadcast %cst_78 : f32 to vector<10x16xf32>
    %313 = arith.subf %312, %311 : vector<10x16xf32>
    %314 = math.exp %313 : vector<10x16xf32>
    %cst_79 = arith.constant 1.000000e+00 : f32
    %315 = vector.broadcast %cst_79 : f32 to vector<10x16xf32>
    %316 = arith.addf %315, %314 : vector<10x16xf32>
    %317 = tpu.reciprocal %316 {approx = true} : vector<10x16xf32> -> vector<10x16xf32>
    %318 = arith.mulf %316, %317 : vector<10x16xf32>
    %cst_80 = arith.constant 2.000000e+00 : f32
    %319 = vector.broadcast %cst_80 : f32 to vector<10x16xf32>
    %320 = arith.subf %319, %318 : vector<10x16xf32>
    %321 = arith.mulf %317, %320 : vector<10x16xf32>
    %322 = arith.mulf %311, %321 : vector<10x16xf32>
    %323 = vector.extract_strided_slice %322 {offsets = [0, 0], sizes = [5, 16], strides = [1, 1]} : vector<10x16xf32> to vector<5x16xf32>
    %324 = tpu.concatenate %263, %323 in 0 : vector<3x16xf32>, vector<5x16xf32> -> vector<8x16xf32>
    %325 = vector.extract_strided_slice %322 {offsets = [5, 0], sizes = [5, 16], strides = [1, 1]} : vector<10x16xf32> to vector<5x16xf32>
    %326 = tpu.concatenate %263, %325 in 0 : vector<3x16xf32>, vector<5x16xf32> -> vector<8x16xf32>
    %327 = vector.extract_strided_slice %324 {offsets = [0, 0], sizes = [5, 16], strides = [1, 1]} : vector<8x16xf32> to vector<5x16xf32>
    %328 = vector.extract_strided_slice %326 {offsets = [0, 0], sizes = [5, 16], strides = [1, 1]} : vector<8x16xf32> to vector<5x16xf32>
    %329 = tpu.concatenate %327, %328 in 0 : vector<5x16xf32>, vector<5x16xf32> -> vector<10x16xf32>
    %330 = vector.extract_strided_slice %260 {offsets = [0, 0], sizes = [16, 16], strides = [1, 1]} : vector<64x16xf32> to vector<16x16xf32>
    %cst_81 = arith.constant dense<0.000000e+00> : vector<10x16xf32>
    %331 = tpu.matmul %329, %330, %cst_81 {dimension_numbers = #tpu.dot_dimension_numbers<[1], [0], [0], [1], [0, 0, 1, 1], [], []>} : vector<10x16xf32>, vector<16x16xf32>, vector<10x16xf32> -> vector<10x16xf32>
    %332 = vector.extract_strided_slice %324 {offsets = [1, 0], sizes = [5, 16], strides = [1, 1]} : vector<8x16xf32> to vector<5x16xf32>
    %333 = vector.extract_strided_slice %326 {offsets = [1, 0], sizes = [5, 16], strides = [1, 1]} : vector<8x16xf32> to vector<5x16xf32>
    %334 = tpu.concatenate %332, %333 in 0 : vector<5x16xf32>, vector<5x16xf32> -> vector<10x16xf32>
    %335 = vector.extract_strided_slice %260 {offsets = [16, 0], sizes = [16, 16], strides = [1, 1]} : vector<64x16xf32> to vector<16x16xf32>
    %cst_82 = arith.constant dense<0.000000e+00> : vector<10x16xf32>
    %336 = tpu.matmul %334, %335, %cst_82 {dimension_numbers = #tpu.dot_dimension_numbers<[1], [0], [0], [1], [0, 0, 1, 1], [], []>} : vector<10x16xf32>, vector<16x16xf32>, vector<10x16xf32> -> vector<10x16xf32>
    %337 = arith.addf %331, %336 : vector<10x16xf32>
    %338 = vector.extract_strided_slice %324 {offsets = [2, 0], sizes = [5, 16], strides = [1, 1]} : vector<8x16xf32> to vector<5x16xf32>
    %339 = vector.extract_strided_slice %326 {offsets = [2, 0], sizes = [5, 16], strides = [1, 1]} : vector<8x16xf32> to vector<5x16xf32>
    %340 = tpu.concatenate %338, %339 in 0 : vector<5x16xf32>, vector<5x16xf32> -> vector<10x16xf32>
    %341 = vector.extract_strided_slice %260 {offsets = [32, 0], sizes = [16, 16], strides = [1, 1]} : vector<64x16xf32> to vector<16x16xf32>
    %cst_83 = arith.constant dense<0.000000e+00> : vector<10x16xf32>
    %342 = tpu.matmul %340, %341, %cst_83 {dimension_numbers = #tpu.dot_dimension_numbers<[1], [0], [0], [1], [0, 0, 1, 1], [], []>} : vector<10x16xf32>, vector<16x16xf32>, vector<10x16xf32> -> vector<10x16xf32>
    %343 = arith.addf %337, %342 : vector<10x16xf32>
    %344 = vector.extract_strided_slice %324 {offsets = [3, 0], sizes = [5, 16], strides = [1, 1]} : vector<8x16xf32> to vector<5x16xf32>
    %345 = vector.extract_strided_slice %326 {offsets = [3, 0], sizes = [5, 16], strides = [1, 1]} : vector<8x16xf32> to vector<5x16xf32>
    %346 = tpu.concatenate %344, %345 in 0 : vector<5x16xf32>, vector<5x16xf32> -> vector<10x16xf32>
    %347 = vector.extract_strided_slice %260 {offsets = [48, 0], sizes = [16, 16], strides = [1, 1]} : vector<64x16xf32> to vector<16x16xf32>
    %cst_84 = arith.constant dense<0.000000e+00> : vector<10x16xf32>
    %348 = tpu.matmul %346, %347, %cst_84 {dimension_numbers = #tpu.dot_dimension_numbers<[1], [0], [0], [1], [0, 0, 1, 1], [], []>} : vector<10x16xf32>, vector<16x16xf32>, vector<10x16xf32> -> vector<10x16xf32>
    %349 = arith.addf %343, %348 : vector<10x16xf32>
    %c2_85 = arith.constant 2 : index
    %c0_86 = arith.constant 0 : index
    %350 = vector.load %arg6[%c2_85, %c0_86] : memref<6x16xf32, #tpu.memory_space<vmem>>, vector<1x16xf32>
    %c3_87 = arith.constant 3 : index
    %c0_88 = arith.constant 0 : index
    %351 = vector.load %arg6[%c3_87, %c0_88] : memref<6x16xf32, #tpu.memory_space<vmem>>, vector<1x16xf32>
    %cst_89 = arith.constant dense<0.000000e+00> : vector<16xf32>
    %352 = vector.multi_reduction <add>, %349, %cst_89 [0] : vector<10x16xf32> to vector<16xf32>
    %353 = vector.shape_cast %352 : vector<16xf32> to vector<1x16xf32>
    %354 = arith.mulf %349, %349 : vector<10x16xf32>
    %cst_90 = arith.constant dense<0.000000e+00> : vector<16xf32>
    %355 = vector.multi_reduction <add>, %354, %cst_90 [0] : vector<10x16xf32> to vector<16xf32>
    %356 = vector.shape_cast %355 : vector<16xf32> to vector<1x16xf32>
    %cst_91 = arith.constant 1.000000e-01 : f32
    %357 = vector.broadcast %cst_91 : f32 to vector<1x16xf32>
    %358 = arith.mulf %353, %357 : vector<1x16xf32>
    %cst_92 = arith.constant 1.000000e-01 : f32
    %359 = vector.broadcast %cst_92 : f32 to vector<1x16xf32>
    %360 = arith.mulf %356, %359 : vector<1x16xf32>
    %361 = arith.mulf %358, %358 : vector<1x16xf32>
    %362 = arith.subf %360, %361 : vector<1x16xf32>
    %cst_93 = arith.constant 0.000000e+00 : f32
    %363 = vector.broadcast %cst_93 : f32 to vector<1x16xf32>
    %364 = arith.maximumf %362, %363 : vector<1x16xf32>
    %cst_94 = arith.constant 9.99999974E-6 : f32
    %365 = vector.broadcast %cst_94 : f32 to vector<1x16xf32>
    %366 = arith.addf %364, %365 : vector<1x16xf32>
    %367 = math.rsqrt %366 : vector<1x16xf32>
    %368 = arith.mulf %367, %350 : vector<1x16xf32>
    %369 = arith.mulf %358, %368 : vector<1x16xf32>
    %370 = arith.subf %351, %369 : vector<1x16xf32>
    %371 = vector.broadcast %368 : vector<1x16xf32> to vector<10x16xf32>
    %372 = arith.mulf %349, %371 : vector<10x16xf32>
    %373 = vector.broadcast %370 : vector<1x16xf32> to vector<10x16xf32>
    %374 = arith.addf %372, %373 : vector<10x16xf32>
    %cst_95 = arith.constant 0.000000e+00 : f32
    %375 = vector.broadcast %cst_95 : f32 to vector<10x16xf32>
    %376 = arith.subf %375, %374 : vector<10x16xf32>
    %377 = math.exp %376 : vector<10x16xf32>
    %cst_96 = arith.constant 1.000000e+00 : f32
    %378 = vector.broadcast %cst_96 : f32 to vector<10x16xf32>
    %379 = arith.addf %378, %377 : vector<10x16xf32>
    %380 = tpu.reciprocal %379 {approx = true} : vector<10x16xf32> -> vector<10x16xf32>
    %381 = arith.mulf %379, %380 : vector<10x16xf32>
    %cst_97 = arith.constant 2.000000e+00 : f32
    %382 = vector.broadcast %cst_97 : f32 to vector<10x16xf32>
    %383 = arith.subf %382, %381 : vector<10x16xf32>
    %384 = arith.mulf %380, %383 : vector<10x16xf32>
    %385 = arith.mulf %374, %384 : vector<10x16xf32>
    %386 = vector.extract_strided_slice %385 {offsets = [0, 0], sizes = [5, 16], strides = [1, 1]} : vector<10x16xf32> to vector<5x16xf32>
    %387 = tpu.concatenate %263, %386 in 0 : vector<3x16xf32>, vector<5x16xf32> -> vector<8x16xf32>
    %388 = vector.extract_strided_slice %385 {offsets = [5, 0], sizes = [5, 16], strides = [1, 1]} : vector<10x16xf32> to vector<5x16xf32>
    %389 = tpu.concatenate %263, %388 in 0 : vector<3x16xf32>, vector<5x16xf32> -> vector<8x16xf32>
    %390 = vector.extract_strided_slice %387 {offsets = [0, 0], sizes = [5, 16], strides = [1, 1]} : vector<8x16xf32> to vector<5x16xf32>
    %391 = vector.extract_strided_slice %389 {offsets = [0, 0], sizes = [5, 16], strides = [1, 1]} : vector<8x16xf32> to vector<5x16xf32>
    %392 = tpu.concatenate %390, %391 in 0 : vector<5x16xf32>, vector<5x16xf32> -> vector<10x16xf32>
    %393 = vector.extract_strided_slice %262 {offsets = [0, 0], sizes = [16, 16], strides = [1, 1]} : vector<64x16xf32> to vector<16x16xf32>
    %cst_98 = arith.constant dense<0.000000e+00> : vector<10x16xf32>
    %394 = tpu.matmul %392, %393, %cst_98 {dimension_numbers = #tpu.dot_dimension_numbers<[1], [0], [0], [1], [0, 0, 1, 1], [], []>} : vector<10x16xf32>, vector<16x16xf32>, vector<10x16xf32> -> vector<10x16xf32>
    %395 = vector.extract_strided_slice %387 {offsets = [1, 0], sizes = [5, 16], strides = [1, 1]} : vector<8x16xf32> to vector<5x16xf32>
    %396 = vector.extract_strided_slice %389 {offsets = [1, 0], sizes = [5, 16], strides = [1, 1]} : vector<8x16xf32> to vector<5x16xf32>
    %397 = tpu.concatenate %395, %396 in 0 : vector<5x16xf32>, vector<5x16xf32> -> vector<10x16xf32>
    %398 = vector.extract_strided_slice %262 {offsets = [16, 0], sizes = [16, 16], strides = [1, 1]} : vector<64x16xf32> to vector<16x16xf32>
    %cst_99 = arith.constant dense<0.000000e+00> : vector<10x16xf32>
    %399 = tpu.matmul %397, %398, %cst_99 {dimension_numbers = #tpu.dot_dimension_numbers<[1], [0], [0], [1], [0, 0, 1, 1], [], []>} : vector<10x16xf32>, vector<16x16xf32>, vector<10x16xf32> -> vector<10x16xf32>
    %400 = arith.addf %394, %399 : vector<10x16xf32>
    %401 = vector.extract_strided_slice %387 {offsets = [2, 0], sizes = [5, 16], strides = [1, 1]} : vector<8x16xf32> to vector<5x16xf32>
    %402 = vector.extract_strided_slice %389 {offsets = [2, 0], sizes = [5, 16], strides = [1, 1]} : vector<8x16xf32> to vector<5x16xf32>
    %403 = tpu.concatenate %401, %402 in 0 : vector<5x16xf32>, vector<5x16xf32> -> vector<10x16xf32>
    %404 = vector.extract_strided_slice %262 {offsets = [32, 0], sizes = [16, 16], strides = [1, 1]} : vector<64x16xf32> to vector<16x16xf32>
    %cst_100 = arith.constant dense<0.000000e+00> : vector<10x16xf32>
    %405 = tpu.matmul %403, %404, %cst_100 {dimension_numbers = #tpu.dot_dimension_numbers<[1], [0], [0], [1], [0, 0, 1, 1], [], []>} : vector<10x16xf32>, vector<16x16xf32>, vector<10x16xf32> -> vector<10x16xf32>
    %406 = arith.addf %400, %405 : vector<10x16xf32>
    %407 = vector.extract_strided_slice %387 {offsets = [3, 0], sizes = [5, 16], strides = [1, 1]} : vector<8x16xf32> to vector<5x16xf32>
    %408 = vector.extract_strided_slice %389 {offsets = [3, 0], sizes = [5, 16], strides = [1, 1]} : vector<8x16xf32> to vector<5x16xf32>
    %409 = tpu.concatenate %407, %408 in 0 : vector<5x16xf32>, vector<5x16xf32> -> vector<10x16xf32>
    %410 = vector.extract_strided_slice %262 {offsets = [48, 0], sizes = [16, 16], strides = [1, 1]} : vector<64x16xf32> to vector<16x16xf32>
    %cst_101 = arith.constant dense<0.000000e+00> : vector<10x16xf32>
    %411 = tpu.matmul %409, %410, %cst_101 {dimension_numbers = #tpu.dot_dimension_numbers<[1], [0], [0], [1], [0, 0, 1, 1], [], []>} : vector<10x16xf32>, vector<16x16xf32>, vector<10x16xf32> -> vector<10x16xf32>
    %412 = arith.addf %406, %411 : vector<10x16xf32>
    %413 = arith.addf %286, %412 : vector<10x16xf32>
    %c4_102 = arith.constant 4 : index
    %c0_103 = arith.constant 0 : index
    %414 = vector.load %arg6[%c4_102, %c0_103] : memref<6x16xf32, #tpu.memory_space<vmem>>, vector<1x16xf32>
    %c5_104 = arith.constant 5 : index
    %c0_105 = arith.constant 0 : index
    %415 = vector.load %arg6[%c5_104, %c0_105] : memref<6x16xf32, #tpu.memory_space<vmem>>, vector<1x16xf32>
    %cst_106 = arith.constant dense<0.000000e+00> : vector<16xf32>
    %416 = vector.multi_reduction <add>, %413, %cst_106 [0] : vector<10x16xf32> to vector<16xf32>
    %417 = vector.shape_cast %416 : vector<16xf32> to vector<1x16xf32>
    %418 = arith.mulf %413, %413 : vector<10x16xf32>
    %cst_107 = arith.constant dense<0.000000e+00> : vector<16xf32>
    %419 = vector.multi_reduction <add>, %418, %cst_107 [0] : vector<10x16xf32> to vector<16xf32>
    %420 = vector.shape_cast %419 : vector<16xf32> to vector<1x16xf32>
    %cst_108 = arith.constant 1.000000e-01 : f32
    %421 = vector.broadcast %cst_108 : f32 to vector<1x16xf32>
    %422 = arith.mulf %417, %421 : vector<1x16xf32>
    %cst_109 = arith.constant 1.000000e-01 : f32
    %423 = vector.broadcast %cst_109 : f32 to vector<1x16xf32>
    %424 = arith.mulf %420, %423 : vector<1x16xf32>
    %425 = arith.mulf %422, %422 : vector<1x16xf32>
    %426 = arith.subf %424, %425 : vector<1x16xf32>
    %cst_110 = arith.constant 0.000000e+00 : f32
    %427 = vector.broadcast %cst_110 : f32 to vector<1x16xf32>
    %428 = arith.maximumf %426, %427 : vector<1x16xf32>
    %cst_111 = arith.constant 9.99999974E-6 : f32
    %429 = vector.broadcast %cst_111 : f32 to vector<1x16xf32>
    %430 = arith.addf %428, %429 : vector<1x16xf32>
    %431 = math.rsqrt %430 : vector<1x16xf32>
    %432 = arith.mulf %431, %414 : vector<1x16xf32>
    %433 = arith.mulf %422, %432 : vector<1x16xf32>
    %434 = arith.subf %415, %433 : vector<1x16xf32>
    %435 = vector.broadcast %432 : vector<1x16xf32> to vector<10x16xf32>
    %436 = arith.mulf %413, %435 : vector<10x16xf32>
    %437 = vector.broadcast %434 : vector<1x16xf32> to vector<10x16xf32>
    %438 = arith.addf %436, %437 : vector<10x16xf32>
    %cst_112 = arith.constant 0.000000e+00 : f32
    %439 = vector.broadcast %cst_112 : f32 to vector<10x16xf32>
    %440 = arith.subf %439, %438 : vector<10x16xf32>
    %441 = math.exp %440 : vector<10x16xf32>
    %cst_113 = arith.constant 1.000000e+00 : f32
    %442 = vector.broadcast %cst_113 : f32 to vector<10x16xf32>
    %443 = arith.addf %442, %441 : vector<10x16xf32>
    %444 = tpu.reciprocal %443 {approx = true} : vector<10x16xf32> -> vector<10x16xf32>
    %445 = arith.mulf %443, %444 : vector<10x16xf32>
    %cst_114 = arith.constant 2.000000e+00 : f32
    %446 = vector.broadcast %cst_114 : f32 to vector<10x16xf32>
    %447 = arith.subf %446, %445 : vector<10x16xf32>
    %448 = arith.mulf %444, %447 : vector<10x16xf32>
    %449 = arith.mulf %438, %448 : vector<10x16xf32>
    %450 = vector.extract_strided_slice %449 {offsets = [0, 0], sizes = [5, 16], strides = [1, 1]} : vector<10x16xf32> to vector<5x16xf32>
    %451 = tpu.concatenate %263, %450 in 0 : vector<3x16xf32>, vector<5x16xf32> -> vector<8x16xf32>
    %452 = vector.extract_strided_slice %449 {offsets = [5, 0], sizes = [5, 16], strides = [1, 1]} : vector<10x16xf32> to vector<5x16xf32>
    %453 = tpu.concatenate %263, %452 in 0 : vector<3x16xf32>, vector<5x16xf32> -> vector<8x16xf32>
    %454 = vector.extract_strided_slice %451 {offsets = [0, 0], sizes = [1, 16], strides = [1, 1]} : vector<8x16xf32> to vector<1x16xf32>
    %455 = vector.extract_strided_slice %451 {offsets = [1, 0], sizes = [1, 16], strides = [1, 1]} : vector<8x16xf32> to vector<1x16xf32>
    %456 = arith.maximumf %454, %455 : vector<1x16xf32>
    %457 = vector.extract_strided_slice %451 {offsets = [2, 0], sizes = [1, 16], strides = [1, 1]} : vector<8x16xf32> to vector<1x16xf32>
    %458 = vector.extract_strided_slice %451 {offsets = [3, 0], sizes = [1, 16], strides = [1, 1]} : vector<8x16xf32> to vector<1x16xf32>
    %459 = arith.maximumf %457, %458 : vector<1x16xf32>
    %460 = vector.extract_strided_slice %451 {offsets = [4, 0], sizes = [1, 16], strides = [1, 1]} : vector<8x16xf32> to vector<1x16xf32>
    %461 = vector.extract_strided_slice %451 {offsets = [5, 0], sizes = [1, 16], strides = [1, 1]} : vector<8x16xf32> to vector<1x16xf32>
    %462 = arith.maximumf %460, %461 : vector<1x16xf32>
    %463 = vector.extract_strided_slice %451 {offsets = [6, 0], sizes = [1, 16], strides = [1, 1]} : vector<8x16xf32> to vector<1x16xf32>
    %464 = vector.extract_strided_slice %451 {offsets = [7, 0], sizes = [1, 16], strides = [1, 1]} : vector<8x16xf32> to vector<1x16xf32>
    %465 = arith.maximumf %463, %464 : vector<1x16xf32>
    %466 = tpu.concatenate %456, %459, %462, %465 in 0 : vector<1x16xf32>, vector<1x16xf32>, vector<1x16xf32>, vector<1x16xf32> -> vector<4x16xf32>
    %467 = vector.extract_strided_slice %453 {offsets = [0, 0], sizes = [1, 16], strides = [1, 1]} : vector<8x16xf32> to vector<1x16xf32>
    %468 = vector.extract_strided_slice %453 {offsets = [1, 0], sizes = [1, 16], strides = [1, 1]} : vector<8x16xf32> to vector<1x16xf32>
    %469 = arith.maximumf %467, %468 : vector<1x16xf32>
    %470 = vector.extract_strided_slice %453 {offsets = [2, 0], sizes = [1, 16], strides = [1, 1]} : vector<8x16xf32> to vector<1x16xf32>
    %471 = vector.extract_strided_slice %453 {offsets = [3, 0], sizes = [1, 16], strides = [1, 1]} : vector<8x16xf32> to vector<1x16xf32>
    %472 = arith.maximumf %470, %471 : vector<1x16xf32>
    %473 = vector.extract_strided_slice %453 {offsets = [4, 0], sizes = [1, 16], strides = [1, 1]} : vector<8x16xf32> to vector<1x16xf32>
    %474 = vector.extract_strided_slice %453 {offsets = [5, 0], sizes = [1, 16], strides = [1, 1]} : vector<8x16xf32> to vector<1x16xf32>
    %475 = arith.maximumf %473, %474 : vector<1x16xf32>
    %476 = vector.extract_strided_slice %453 {offsets = [6, 0], sizes = [1, 16], strides = [1, 1]} : vector<8x16xf32> to vector<1x16xf32>
    %477 = vector.extract_strided_slice %453 {offsets = [7, 0], sizes = [1, 16], strides = [1, 1]} : vector<8x16xf32> to vector<1x16xf32>
    %478 = arith.maximumf %476, %477 : vector<1x16xf32>
    %479 = tpu.concatenate %469, %472, %475, %478 in 0 : vector<1x16xf32>, vector<1x16xf32>, vector<1x16xf32>, vector<1x16xf32> -> vector<4x16xf32>
    %c0_115 = arith.constant 0 : index
    %c0_116 = arith.constant 0 : index
    %480 = vector.load %arg7[%c0_115, %c0_116] : memref<64x8xf32, #tpu.memory_space<vmem>>, vector<64x8xf32>
    %c0_117 = arith.constant 0 : index
    %c0_118 = arith.constant 0 : index
    %c0_119 = arith.constant 0 : index
    %481 = vector.load %arg8[%c0_117, %c0_118, %c0_119] : memref<2x32x8xf32, #tpu.memory_space<vmem>>, vector<1x32x8xf32>
    %482 = vector.shape_cast %481 : vector<1x32x8xf32> to vector<32x8xf32>
    %c1_120 = arith.constant 1 : index
    %c0_121 = arith.constant 0 : index
    %c0_122 = arith.constant 0 : index
    %483 = vector.load %arg8[%c1_120, %c0_121, %c0_122] : memref<2x32x8xf32, #tpu.memory_space<vmem>>, vector<1x32x8xf32>
    %484 = vector.shape_cast %483 : vector<1x32x8xf32> to vector<32x8xf32>
    %cst_123 = arith.constant 0.000000e+00 : f32
    %485 = vector.broadcast %cst_123 : f32 to vector<3x8xf32>
    %486 = vector.extract_strided_slice %466 {offsets = [0, 0], sizes = [1, 16], strides = [1, 1]} : vector<4x16xf32> to vector<1x16xf32>
    %487 = vector.extract_strided_slice %479 {offsets = [0, 0], sizes = [1, 16], strides = [1, 1]} : vector<4x16xf32> to vector<1x16xf32>
    %488 = tpu.concatenate %486, %487 in 0 : vector<1x16xf32>, vector<1x16xf32> -> vector<2x16xf32>
    %489 = vector.extract_strided_slice %480 {offsets = [0, 0], sizes = [16, 8], strides = [1, 1]} : vector<64x8xf32> to vector<16x8xf32>
    %cst_124 = arith.constant dense<0.000000e+00> : vector<2x8xf32>
    %490 = tpu.matmul %488, %489, %cst_124 {dimension_numbers = #tpu.dot_dimension_numbers<[1], [0], [0], [1], [0, 0, 1, 1], [], []>} : vector<2x16xf32>, vector<16x8xf32>, vector<2x8xf32> -> vector<2x8xf32>
    %491 = vector.extract_strided_slice %466 {offsets = [1, 0], sizes = [1, 16], strides = [1, 1]} : vector<4x16xf32> to vector<1x16xf32>
    %492 = vector.extract_strided_slice %479 {offsets = [1, 0], sizes = [1, 16], strides = [1, 1]} : vector<4x16xf32> to vector<1x16xf32>
    %493 = tpu.concatenate %491, %492 in 0 : vector<1x16xf32>, vector<1x16xf32> -> vector<2x16xf32>
    %494 = vector.extract_strided_slice %480 {offsets = [16, 0], sizes = [16, 8], strides = [1, 1]} : vector<64x8xf32> to vector<16x8xf32>
    %cst_125 = arith.constant dense<0.000000e+00> : vector<2x8xf32>
    %495 = tpu.matmul %493, %494, %cst_125 {dimension_numbers = #tpu.dot_dimension_numbers<[1], [0], [0], [1], [0, 0, 1, 1], [], []>} : vector<2x16xf32>, vector<16x8xf32>, vector<2x8xf32> -> vector<2x8xf32>
    %496 = arith.addf %490, %495 : vector<2x8xf32>
    %497 = vector.extract_strided_slice %466 {offsets = [2, 0], sizes = [1, 16], strides = [1, 1]} : vector<4x16xf32> to vector<1x16xf32>
    %498 = vector.extract_strided_slice %479 {offsets = [2, 0], sizes = [1, 16], strides = [1, 1]} : vector<4x16xf32> to vector<1x16xf32>
    %499 = tpu.concatenate %497, %498 in 0 : vector<1x16xf32>, vector<1x16xf32> -> vector<2x16xf32>
    %500 = vector.extract_strided_slice %480 {offsets = [32, 0], sizes = [16, 8], strides = [1, 1]} : vector<64x8xf32> to vector<16x8xf32>
    %cst_126 = arith.constant dense<0.000000e+00> : vector<2x8xf32>
    %501 = tpu.matmul %499, %500, %cst_126 {dimension_numbers = #tpu.dot_dimension_numbers<[1], [0], [0], [1], [0, 0, 1, 1], [], []>} : vector<2x16xf32>, vector<16x8xf32>, vector<2x8xf32> -> vector<2x8xf32>
    %502 = arith.addf %496, %501 : vector<2x8xf32>
    %503 = vector.extract_strided_slice %466 {offsets = [3, 0], sizes = [1, 16], strides = [1, 1]} : vector<4x16xf32> to vector<1x16xf32>
    %504 = vector.extract_strided_slice %479 {offsets = [3, 0], sizes = [1, 16], strides = [1, 1]} : vector<4x16xf32> to vector<1x16xf32>
    %505 = tpu.concatenate %503, %504 in 0 : vector<1x16xf32>, vector<1x16xf32> -> vector<2x16xf32>
    %506 = vector.extract_strided_slice %480 {offsets = [48, 0], sizes = [16, 8], strides = [1, 1]} : vector<64x8xf32> to vector<16x8xf32>
    %cst_127 = arith.constant dense<0.000000e+00> : vector<2x8xf32>
    %507 = tpu.matmul %505, %506, %cst_127 {dimension_numbers = #tpu.dot_dimension_numbers<[1], [0], [0], [1], [0, 0, 1, 1], [], []>} : vector<2x16xf32>, vector<16x8xf32>, vector<2x8xf32> -> vector<2x8xf32>
    %508 = arith.addf %502, %507 : vector<2x8xf32>
    %c0_128 = arith.constant 0 : index
    %c0_129 = arith.constant 0 : index
    %509 = vector.load %arg9[%c0_128, %c0_129] : memref<6x8xf32, #tpu.memory_space<vmem>>, vector<1x8xf32>
    %c1_130 = arith.constant 1 : index
    %c0_131 = arith.constant 0 : index
    %510 = vector.load %arg9[%c1_130, %c0_131] : memref<6x8xf32, #tpu.memory_space<vmem>>, vector<1x8xf32>
    %cst_132 = arith.constant dense<0.000000e+00> : vector<8xf32>
    %511 = vector.multi_reduction <add>, %508, %cst_132 [0] : vector<2x8xf32> to vector<8xf32>
    %512 = vector.shape_cast %511 : vector<8xf32> to vector<1x8xf32>
    %513 = arith.mulf %508, %508 : vector<2x8xf32>
    %cst_133 = arith.constant dense<0.000000e+00> : vector<8xf32>
    %514 = vector.multi_reduction <add>, %513, %cst_133 [0] : vector<2x8xf32> to vector<8xf32>
    %515 = vector.shape_cast %514 : vector<8xf32> to vector<1x8xf32>
    %cst_134 = arith.constant 5.000000e-01 : f32
    %516 = vector.broadcast %cst_134 : f32 to vector<1x8xf32>
    %517 = arith.mulf %512, %516 : vector<1x8xf32>
    %cst_135 = arith.constant 5.000000e-01 : f32
    %518 = vector.broadcast %cst_135 : f32 to vector<1x8xf32>
    %519 = arith.mulf %515, %518 : vector<1x8xf32>
    %520 = arith.mulf %517, %517 : vector<1x8xf32>
    %521 = arith.subf %519, %520 : vector<1x8xf32>
    %cst_136 = arith.constant 0.000000e+00 : f32
    %522 = vector.broadcast %cst_136 : f32 to vector<1x8xf32>
    %523 = arith.maximumf %521, %522 : vector<1x8xf32>
    %cst_137 = arith.constant 9.99999974E-6 : f32
    %524 = vector.broadcast %cst_137 : f32 to vector<1x8xf32>
    %525 = arith.addf %523, %524 : vector<1x8xf32>
    %526 = math.rsqrt %525 : vector<1x8xf32>
    %527 = arith.mulf %526, %509 : vector<1x8xf32>
    %528 = arith.mulf %517, %527 : vector<1x8xf32>
    %529 = arith.subf %510, %528 : vector<1x8xf32>
    %530 = vector.broadcast %527 : vector<1x8xf32> to vector<2x8xf32>
    %531 = arith.mulf %508, %530 : vector<2x8xf32>
    %532 = vector.broadcast %529 : vector<1x8xf32> to vector<2x8xf32>
    %533 = arith.addf %531, %532 : vector<2x8xf32>
    %cst_138 = arith.constant 0.000000e+00 : f32
    %534 = vector.broadcast %cst_138 : f32 to vector<2x8xf32>
    %535 = arith.subf %534, %533 : vector<2x8xf32>
    %536 = math.exp %535 : vector<2x8xf32>
    %cst_139 = arith.constant 1.000000e+00 : f32
    %537 = vector.broadcast %cst_139 : f32 to vector<2x8xf32>
    %538 = arith.addf %537, %536 : vector<2x8xf32>
    %539 = tpu.reciprocal %538 {approx = true} : vector<2x8xf32> -> vector<2x8xf32>
    %540 = arith.mulf %538, %539 : vector<2x8xf32>
    %cst_140 = arith.constant 2.000000e+00 : f32
    %541 = vector.broadcast %cst_140 : f32 to vector<2x8xf32>
    %542 = arith.subf %541, %540 : vector<2x8xf32>
    %543 = arith.mulf %539, %542 : vector<2x8xf32>
    %544 = arith.mulf %533, %543 : vector<2x8xf32>
    %545 = vector.extract_strided_slice %544 {offsets = [0, 0], sizes = [1, 8], strides = [1, 1]} : vector<2x8xf32> to vector<1x8xf32>
    %546 = tpu.concatenate %485, %545 in 0 : vector<3x8xf32>, vector<1x8xf32> -> vector<4x8xf32>
    %547 = vector.extract_strided_slice %544 {offsets = [1, 0], sizes = [1, 8], strides = [1, 1]} : vector<2x8xf32> to vector<1x8xf32>
    %548 = tpu.concatenate %485, %547 in 0 : vector<3x8xf32>, vector<1x8xf32> -> vector<4x8xf32>
    %549 = vector.extract_strided_slice %546 {offsets = [0, 0], sizes = [1, 8], strides = [1, 1]} : vector<4x8xf32> to vector<1x8xf32>
    %550 = vector.extract_strided_slice %548 {offsets = [0, 0], sizes = [1, 8], strides = [1, 1]} : vector<4x8xf32> to vector<1x8xf32>
    %551 = tpu.concatenate %549, %550 in 0 : vector<1x8xf32>, vector<1x8xf32> -> vector<2x8xf32>
    %552 = vector.extract_strided_slice %482 {offsets = [0, 0], sizes = [8, 8], strides = [1, 1]} : vector<32x8xf32> to vector<8x8xf32>
    %cst_141 = arith.constant dense<0.000000e+00> : vector<2x8xf32>
    %553 = tpu.matmul %551, %552, %cst_141 {dimension_numbers = #tpu.dot_dimension_numbers<[1], [0], [0], [1], [0, 0, 1, 1], [], []>} : vector<2x8xf32>, vector<8x8xf32>, vector<2x8xf32> -> vector<2x8xf32>
    %554 = vector.extract_strided_slice %546 {offsets = [1, 0], sizes = [1, 8], strides = [1, 1]} : vector<4x8xf32> to vector<1x8xf32>
    %555 = vector.extract_strided_slice %548 {offsets = [1, 0], sizes = [1, 8], strides = [1, 1]} : vector<4x8xf32> to vector<1x8xf32>
    %556 = tpu.concatenate %554, %555 in 0 : vector<1x8xf32>, vector<1x8xf32> -> vector<2x8xf32>
    %557 = vector.extract_strided_slice %482 {offsets = [8, 0], sizes = [8, 8], strides = [1, 1]} : vector<32x8xf32> to vector<8x8xf32>
    %cst_142 = arith.constant dense<0.000000e+00> : vector<2x8xf32>
    %558 = tpu.matmul %556, %557, %cst_142 {dimension_numbers = #tpu.dot_dimension_numbers<[1], [0], [0], [1], [0, 0, 1, 1], [], []>} : vector<2x8xf32>, vector<8x8xf32>, vector<2x8xf32> -> vector<2x8xf32>
    %559 = arith.addf %553, %558 : vector<2x8xf32>
    %560 = vector.extract_strided_slice %546 {offsets = [2, 0], sizes = [1, 8], strides = [1, 1]} : vector<4x8xf32> to vector<1x8xf32>
    %561 = vector.extract_strided_slice %548 {offsets = [2, 0], sizes = [1, 8], strides = [1, 1]} : vector<4x8xf32> to vector<1x8xf32>
    %562 = tpu.concatenate %560, %561 in 0 : vector<1x8xf32>, vector<1x8xf32> -> vector<2x8xf32>
    %563 = vector.extract_strided_slice %482 {offsets = [16, 0], sizes = [8, 8], strides = [1, 1]} : vector<32x8xf32> to vector<8x8xf32>
    %cst_143 = arith.constant dense<0.000000e+00> : vector<2x8xf32>
    %564 = tpu.matmul %562, %563, %cst_143 {dimension_numbers = #tpu.dot_dimension_numbers<[1], [0], [0], [1], [0, 0, 1, 1], [], []>} : vector<2x8xf32>, vector<8x8xf32>, vector<2x8xf32> -> vector<2x8xf32>
    %565 = arith.addf %559, %564 : vector<2x8xf32>
    %566 = vector.extract_strided_slice %546 {offsets = [3, 0], sizes = [1, 8], strides = [1, 1]} : vector<4x8xf32> to vector<1x8xf32>
    %567 = vector.extract_strided_slice %548 {offsets = [3, 0], sizes = [1, 8], strides = [1, 1]} : vector<4x8xf32> to vector<1x8xf32>
    %568 = tpu.concatenate %566, %567 in 0 : vector<1x8xf32>, vector<1x8xf32> -> vector<2x8xf32>
    %569 = vector.extract_strided_slice %482 {offsets = [24, 0], sizes = [8, 8], strides = [1, 1]} : vector<32x8xf32> to vector<8x8xf32>
    %cst_144 = arith.constant dense<0.000000e+00> : vector<2x8xf32>
    %570 = tpu.matmul %568, %569, %cst_144 {dimension_numbers = #tpu.dot_dimension_numbers<[1], [0], [0], [1], [0, 0, 1, 1], [], []>} : vector<2x8xf32>, vector<8x8xf32>, vector<2x8xf32> -> vector<2x8xf32>
    %571 = arith.addf %565, %570 : vector<2x8xf32>
    %c2_145 = arith.constant 2 : index
    %c0_146 = arith.constant 0 : index
    %572 = vector.load %arg9[%c2_145, %c0_146] : memref<6x8xf32, #tpu.memory_space<vmem>>, vector<1x8xf32>
    %c3_147 = arith.constant 3 : index
    %c0_148 = arith.constant 0 : index
    %573 = vector.load %arg9[%c3_147, %c0_148] : memref<6x8xf32, #tpu.memory_space<vmem>>, vector<1x8xf32>
    %cst_149 = arith.constant dense<0.000000e+00> : vector<8xf32>
    %574 = vector.multi_reduction <add>, %571, %cst_149 [0] : vector<2x8xf32> to vector<8xf32>
    %575 = vector.shape_cast %574 : vector<8xf32> to vector<1x8xf32>
    %576 = arith.mulf %571, %571 : vector<2x8xf32>
    %cst_150 = arith.constant dense<0.000000e+00> : vector<8xf32>
    %577 = vector.multi_reduction <add>, %576, %cst_150 [0] : vector<2x8xf32> to vector<8xf32>
    %578 = vector.shape_cast %577 : vector<8xf32> to vector<1x8xf32>
    %cst_151 = arith.constant 5.000000e-01 : f32
    %579 = vector.broadcast %cst_151 : f32 to vector<1x8xf32>
    %580 = arith.mulf %575, %579 : vector<1x8xf32>
    %cst_152 = arith.constant 5.000000e-01 : f32
    %581 = vector.broadcast %cst_152 : f32 to vector<1x8xf32>
    %582 = arith.mulf %578, %581 : vector<1x8xf32>
    %583 = arith.mulf %580, %580 : vector<1x8xf32>
    %584 = arith.subf %582, %583 : vector<1x8xf32>
    %cst_153 = arith.constant 0.000000e+00 : f32
    %585 = vector.broadcast %cst_153 : f32 to vector<1x8xf32>
    %586 = arith.maximumf %584, %585 : vector<1x8xf32>
    %cst_154 = arith.constant 9.99999974E-6 : f32
    %587 = vector.broadcast %cst_154 : f32 to vector<1x8xf32>
    %588 = arith.addf %586, %587 : vector<1x8xf32>
    %589 = math.rsqrt %588 : vector<1x8xf32>
    %590 = arith.mulf %589, %572 : vector<1x8xf32>
    %591 = arith.mulf %580, %590 : vector<1x8xf32>
    %592 = arith.subf %573, %591 : vector<1x8xf32>
    %593 = vector.broadcast %590 : vector<1x8xf32> to vector<2x8xf32>
    %594 = arith.mulf %571, %593 : vector<2x8xf32>
    %595 = vector.broadcast %592 : vector<1x8xf32> to vector<2x8xf32>
    %596 = arith.addf %594, %595 : vector<2x8xf32>
    %cst_155 = arith.constant 0.000000e+00 : f32
    %597 = vector.broadcast %cst_155 : f32 to vector<2x8xf32>
    %598 = arith.subf %597, %596 : vector<2x8xf32>
    %599 = math.exp %598 : vector<2x8xf32>
    %cst_156 = arith.constant 1.000000e+00 : f32
    %600 = vector.broadcast %cst_156 : f32 to vector<2x8xf32>
    %601 = arith.addf %600, %599 : vector<2x8xf32>
    %602 = tpu.reciprocal %601 {approx = true} : vector<2x8xf32> -> vector<2x8xf32>
    %603 = arith.mulf %601, %602 : vector<2x8xf32>
    %cst_157 = arith.constant 2.000000e+00 : f32
    %604 = vector.broadcast %cst_157 : f32 to vector<2x8xf32>
    %605 = arith.subf %604, %603 : vector<2x8xf32>
    %606 = arith.mulf %602, %605 : vector<2x8xf32>
    %607 = arith.mulf %596, %606 : vector<2x8xf32>
    %608 = vector.extract_strided_slice %607 {offsets = [0, 0], sizes = [1, 8], strides = [1, 1]} : vector<2x8xf32> to vector<1x8xf32>
    %609 = tpu.concatenate %485, %608 in 0 : vector<3x8xf32>, vector<1x8xf32> -> vector<4x8xf32>
    %610 = vector.extract_strided_slice %607 {offsets = [1, 0], sizes = [1, 8], strides = [1, 1]} : vector<2x8xf32> to vector<1x8xf32>
    %611 = tpu.concatenate %485, %610 in 0 : vector<3x8xf32>, vector<1x8xf32> -> vector<4x8xf32>
    %612 = vector.extract_strided_slice %609 {offsets = [0, 0], sizes = [1, 8], strides = [1, 1]} : vector<4x8xf32> to vector<1x8xf32>
    %613 = vector.extract_strided_slice %611 {offsets = [0, 0], sizes = [1, 8], strides = [1, 1]} : vector<4x8xf32> to vector<1x8xf32>
    %614 = tpu.concatenate %612, %613 in 0 : vector<1x8xf32>, vector<1x8xf32> -> vector<2x8xf32>
    %615 = vector.extract_strided_slice %484 {offsets = [0, 0], sizes = [8, 8], strides = [1, 1]} : vector<32x8xf32> to vector<8x8xf32>
    %cst_158 = arith.constant dense<0.000000e+00> : vector<2x8xf32>
    %616 = tpu.matmul %614, %615, %cst_158 {dimension_numbers = #tpu.dot_dimension_numbers<[1], [0], [0], [1], [0, 0, 1, 1], [], []>} : vector<2x8xf32>, vector<8x8xf32>, vector<2x8xf32> -> vector<2x8xf32>
    %617 = vector.extract_strided_slice %609 {offsets = [1, 0], sizes = [1, 8], strides = [1, 1]} : vector<4x8xf32> to vector<1x8xf32>
    %618 = vector.extract_strided_slice %611 {offsets = [1, 0], sizes = [1, 8], strides = [1, 1]} : vector<4x8xf32> to vector<1x8xf32>
    %619 = tpu.concatenate %617, %618 in 0 : vector<1x8xf32>, vector<1x8xf32> -> vector<2x8xf32>
    %620 = vector.extract_strided_slice %484 {offsets = [8, 0], sizes = [8, 8], strides = [1, 1]} : vector<32x8xf32> to vector<8x8xf32>
    %cst_159 = arith.constant dense<0.000000e+00> : vector<2x8xf32>
    %621 = tpu.matmul %619, %620, %cst_159 {dimension_numbers = #tpu.dot_dimension_numbers<[1], [0], [0], [1], [0, 0, 1, 1], [], []>} : vector<2x8xf32>, vector<8x8xf32>, vector<2x8xf32> -> vector<2x8xf32>
    %622 = arith.addf %616, %621 : vector<2x8xf32>
    %623 = vector.extract_strided_slice %609 {offsets = [2, 0], sizes = [1, 8], strides = [1, 1]} : vector<4x8xf32> to vector<1x8xf32>
    %624 = vector.extract_strided_slice %611 {offsets = [2, 0], sizes = [1, 8], strides = [1, 1]} : vector<4x8xf32> to vector<1x8xf32>
    %625 = tpu.concatenate %623, %624 in 0 : vector<1x8xf32>, vector<1x8xf32> -> vector<2x8xf32>
    %626 = vector.extract_strided_slice %484 {offsets = [16, 0], sizes = [8, 8], strides = [1, 1]} : vector<32x8xf32> to vector<8x8xf32>
    %cst_160 = arith.constant dense<0.000000e+00> : vector<2x8xf32>
    %627 = tpu.matmul %625, %626, %cst_160 {dimension_numbers = #tpu.dot_dimension_numbers<[1], [0], [0], [1], [0, 0, 1, 1], [], []>} : vector<2x8xf32>, vector<8x8xf32>, vector<2x8xf32> -> vector<2x8xf32>
    %628 = arith.addf %622, %627 : vector<2x8xf32>
    %629 = vector.extract_strided_slice %609 {offsets = [3, 0], sizes = [1, 8], strides = [1, 1]} : vector<4x8xf32> to vector<1x8xf32>
    %630 = vector.extract_strided_slice %611 {offsets = [3, 0], sizes = [1, 8], strides = [1, 1]} : vector<4x8xf32> to vector<1x8xf32>
    %631 = tpu.concatenate %629, %630 in 0 : vector<1x8xf32>, vector<1x8xf32> -> vector<2x8xf32>
    %632 = vector.extract_strided_slice %484 {offsets = [24, 0], sizes = [8, 8], strides = [1, 1]} : vector<32x8xf32> to vector<8x8xf32>
    %cst_161 = arith.constant dense<0.000000e+00> : vector<2x8xf32>
    %633 = tpu.matmul %631, %632, %cst_161 {dimension_numbers = #tpu.dot_dimension_numbers<[1], [0], [0], [1], [0, 0, 1, 1], [], []>} : vector<2x8xf32>, vector<8x8xf32>, vector<2x8xf32> -> vector<2x8xf32>
    %634 = arith.addf %628, %633 : vector<2x8xf32>
    %635 = arith.addf %508, %634 : vector<2x8xf32>
    %c4_162 = arith.constant 4 : index
    %c0_163 = arith.constant 0 : index
    %636 = vector.load %arg9[%c4_162, %c0_163] : memref<6x8xf32, #tpu.memory_space<vmem>>, vector<1x8xf32>
    %c5_164 = arith.constant 5 : index
    %c0_165 = arith.constant 0 : index
    %637 = vector.load %arg9[%c5_164, %c0_165] : memref<6x8xf32, #tpu.memory_space<vmem>>, vector<1x8xf32>
    %cst_166 = arith.constant dense<0.000000e+00> : vector<8xf32>
    %638 = vector.multi_reduction <add>, %635, %cst_166 [0] : vector<2x8xf32> to vector<8xf32>
    %639 = vector.shape_cast %638 : vector<8xf32> to vector<1x8xf32>
    %640 = arith.mulf %635, %635 : vector<2x8xf32>
    %cst_167 = arith.constant dense<0.000000e+00> : vector<8xf32>
    %641 = vector.multi_reduction <add>, %640, %cst_167 [0] : vector<2x8xf32> to vector<8xf32>
    %642 = vector.shape_cast %641 : vector<8xf32> to vector<1x8xf32>
    %cst_168 = arith.constant 5.000000e-01 : f32
    %643 = vector.broadcast %cst_168 : f32 to vector<1x8xf32>
    %644 = arith.mulf %639, %643 : vector<1x8xf32>
    %cst_169 = arith.constant 5.000000e-01 : f32
    %645 = vector.broadcast %cst_169 : f32 to vector<1x8xf32>
    %646 = arith.mulf %642, %645 : vector<1x8xf32>
    %647 = arith.mulf %644, %644 : vector<1x8xf32>
    %648 = arith.subf %646, %647 : vector<1x8xf32>
    %cst_170 = arith.constant 0.000000e+00 : f32
    %649 = vector.broadcast %cst_170 : f32 to vector<1x8xf32>
    %650 = arith.maximumf %648, %649 : vector<1x8xf32>
    %cst_171 = arith.constant 9.99999974E-6 : f32
    %651 = vector.broadcast %cst_171 : f32 to vector<1x8xf32>
    %652 = arith.addf %650, %651 : vector<1x8xf32>
    %653 = math.rsqrt %652 : vector<1x8xf32>
    %654 = arith.mulf %653, %636 : vector<1x8xf32>
    %655 = arith.mulf %644, %654 : vector<1x8xf32>
    %656 = arith.subf %637, %655 : vector<1x8xf32>
    %657 = vector.broadcast %654 : vector<1x8xf32> to vector<2x8xf32>
    %658 = arith.mulf %635, %657 : vector<2x8xf32>
    %659 = vector.broadcast %656 : vector<1x8xf32> to vector<2x8xf32>
    %660 = arith.addf %658, %659 : vector<2x8xf32>
    %cst_172 = arith.constant 0.000000e+00 : f32
    %661 = vector.broadcast %cst_172 : f32 to vector<2x8xf32>
    %662 = arith.subf %661, %660 : vector<2x8xf32>
    %663 = math.exp %662 : vector<2x8xf32>
    %cst_173 = arith.constant 1.000000e+00 : f32
    %664 = vector.broadcast %cst_173 : f32 to vector<2x8xf32>
    %665 = arith.addf %664, %663 : vector<2x8xf32>
    %666 = tpu.reciprocal %665 {approx = true} : vector<2x8xf32> -> vector<2x8xf32>
    %667 = arith.mulf %665, %666 : vector<2x8xf32>
    %cst_174 = arith.constant 2.000000e+00 : f32
    %668 = vector.broadcast %cst_174 : f32 to vector<2x8xf32>
    %669 = arith.subf %668, %667 : vector<2x8xf32>
    %670 = arith.mulf %666, %669 : vector<2x8xf32>
    %671 = arith.mulf %660, %670 : vector<2x8xf32>
    %672 = vector.extract_strided_slice %671 {offsets = [0, 0], sizes = [1, 8], strides = [1, 1]} : vector<2x8xf32> to vector<1x8xf32>
    %673 = tpu.concatenate %485, %672 in 0 : vector<3x8xf32>, vector<1x8xf32> -> vector<4x8xf32>
    %674 = vector.extract_strided_slice %671 {offsets = [1, 0], sizes = [1, 8], strides = [1, 1]} : vector<2x8xf32> to vector<1x8xf32>
    %675 = tpu.concatenate %485, %674 in 0 : vector<3x8xf32>, vector<1x8xf32> -> vector<4x8xf32>
    %676 = vector.extract_strided_slice %673 {offsets = [0, 0], sizes = [1, 8], strides = [1, 1]} : vector<4x8xf32> to vector<1x8xf32>
    %677 = vector.extract_strided_slice %673 {offsets = [1, 0], sizes = [1, 8], strides = [1, 1]} : vector<4x8xf32> to vector<1x8xf32>
    %678 = arith.maximumf %676, %677 : vector<1x8xf32>
    %679 = vector.extract_strided_slice %673 {offsets = [2, 0], sizes = [1, 8], strides = [1, 1]} : vector<4x8xf32> to vector<1x8xf32>
    %680 = vector.extract_strided_slice %673 {offsets = [3, 0], sizes = [1, 8], strides = [1, 1]} : vector<4x8xf32> to vector<1x8xf32>
    %681 = arith.maximumf %679, %680 : vector<1x8xf32>
    %682 = tpu.concatenate %678, %681 in 0 : vector<1x8xf32>, vector<1x8xf32> -> vector<2x8xf32>
    %683 = vector.extract_strided_slice %675 {offsets = [0, 0], sizes = [1, 8], strides = [1, 1]} : vector<4x8xf32> to vector<1x8xf32>
    %684 = vector.extract_strided_slice %675 {offsets = [1, 0], sizes = [1, 8], strides = [1, 1]} : vector<4x8xf32> to vector<1x8xf32>
    %685 = arith.maximumf %683, %684 : vector<1x8xf32>
    %686 = vector.extract_strided_slice %675 {offsets = [2, 0], sizes = [1, 8], strides = [1, 1]} : vector<4x8xf32> to vector<1x8xf32>
    %687 = vector.extract_strided_slice %675 {offsets = [3, 0], sizes = [1, 8], strides = [1, 1]} : vector<4x8xf32> to vector<1x8xf32>
    %688 = arith.maximumf %686, %687 : vector<1x8xf32>
    %689 = tpu.concatenate %685, %688 in 0 : vector<1x8xf32>, vector<1x8xf32> -> vector<2x8xf32>
    %cst_175 = arith.constant dense<0.000000e+00> : vector<8xf32>
    %690 = vector.multi_reduction <add>, %682, %cst_175 [0] : vector<2x8xf32> to vector<8xf32>
    %691 = vector.shape_cast %690 : vector<8xf32> to vector<1x8xf32>
    %cst_176 = arith.constant 5.000000e-01 : f32
    %692 = vector.broadcast %cst_176 : f32 to vector<1x8xf32>
    %693 = arith.mulf %691, %692 : vector<1x8xf32>
    %cst_177 = arith.constant dense<0.000000e+00> : vector<8xf32>
    %694 = vector.multi_reduction <add>, %689, %cst_177 [0] : vector<2x8xf32> to vector<8xf32>
    %695 = vector.shape_cast %694 : vector<8xf32> to vector<1x8xf32>
    %cst_178 = arith.constant 5.000000e-01 : f32
    %696 = vector.broadcast %cst_178 : f32 to vector<1x8xf32>
    %697 = arith.mulf %695, %696 : vector<1x8xf32>
    %698 = tpu.concatenate %693, %697 in 0 : vector<1x8xf32>, vector<1x8xf32> -> vector<2x8xf32>
    %c0_179 = arith.constant 0 : index
    %c0_180 = arith.constant 0 : index
    %699 = vector.load %arg10[%c0_179, %c0_180] : memref<8x4xf32, #tpu.memory_space<vmem>>, vector<8x4xf32>
    %cst_181 = arith.constant dense<0.000000e+00> : vector<2x4xf32>
    %700 = tpu.matmul %698, %699, %cst_181 {dimension_numbers = #tpu.dot_dimension_numbers<[1], [0], [0], [1], [0, 0, 1, 1], [], []>} : vector<2x8xf32>, vector<8x4xf32>, vector<2x4xf32> -> vector<2x4xf32>
    %c0_182 = arith.constant 0 : index
    %c0_183 = arith.constant 0 : index
    %701 = vector.load %arg11[%c0_182, %c0_183] : memref<1x4xf32, #tpu.memory_space<vmem>>, vector<1x4xf32>
    %702 = vector.broadcast %701 : vector<1x4xf32> to vector<2x4xf32>
    %703 = arith.addf %700, %702 : vector<2x4xf32>
    %cst_184 = arith.constant dense<0xFF800000> : vector<2xf32>
    %704 = vector.multi_reduction <maximumf>, %703, %cst_184 [1] : vector<2x4xf32> to vector<2xf32>
    %705 = vector.shape_cast %704 : vector<2xf32> to vector<2x1xf32>
    %706 = vector.broadcast %705 : vector<2x1xf32> to vector<2x4xf32>
    %707 = arith.subf %703, %706 : vector<2x4xf32>
    %708 = math.exp %707 : vector<2x4xf32>
    %cst_185 = arith.constant dense<0.000000e+00> : vector<2xf32>
    %709 = vector.multi_reduction <add>, %708, %cst_185 [1] : vector<2x4xf32> to vector<2xf32>
    %710 = vector.shape_cast %709 : vector<2xf32> to vector<2x1xf32>
    %711 = tpu.reciprocal %710 {approx = true} : vector<2x1xf32> -> vector<2x1xf32>
    %712 = arith.mulf %710, %711 : vector<2x1xf32>
    %cst_186 = arith.constant 2.000000e+00 : f32
    %713 = vector.broadcast %cst_186 : f32 to vector<2x1xf32>
    %714 = arith.subf %713, %712 : vector<2x1xf32>
    %715 = arith.mulf %711, %714 : vector<2x1xf32>
    %716 = vector.broadcast %715 : vector<2x1xf32> to vector<2x4xf32>
    %717 = arith.mulf %708, %716 : vector<2x4xf32>
    %c0_187 = arith.constant 0 : index
    %c0_188 = arith.constant 0 : index
    %718 = vector.load %arg12[%c0_187, %c0_188] : memref<2x4xf32, #tpu.memory_space<vmem>>, vector<2x4xf32>
    tpu.vector_store %arg12[%c0_187, %c0_188], %717 {strides = array<i32>} : memref<2x4xf32, #tpu.memory_space<vmem>>, vector<2x4xf32>,
    return
  }
}

</mosaic_0001>

<bundles_post_ra>
// kernel: _lambda_.1
= control target key start
LH: loop header
LB: loop body
LE: loop exit
PB: predicated region body
PF: predicated region fallthrough
CT: control target
= control target key end

     0   :  { %17 = vsyncpa [#allocation3], 0  ;;  %s5809_s0 = inlined_call_operand.vmem [shape: f32[2,16,1], index: 0, kind: input, shape index: {}]   ;;  %s5810_s1 = inlined_call_operand.hbm [shape: f32[4,32], index: 1, kind: input, shape index: {}]   ;;  %s5811_s2 = inlined_call_operand.hbm [shape: f32[2,128,32], index: 2, kind: input, shape index: {}]   ;;  %s5812_s3 = inlined_call_operand.hbm [shape: f32[6,32], index: 3, kind: input, shape index: {}]   ;;  %s5813_s4 = inlined_call_operand.hbm [shape: f32[128,16], index: 4, kind: input, shape index: {}]   ;;  %s5814_s5 = inlined_call_operand.hbm [shape: f32[2,64,16], index: 5, kind: input, shape index: {}]   ;;  %s5815_s6 = inlined_call_operand.hbm [shape: f32[6,16], index: 6, kind: input, shape index: {}]   ;;  %s5816_s7 = inlined_call_operand.hbm [shape: f32[64,8], index: 7, kind: input, shape index: {}]   ;;  %s5817_s8 = inlined_call_operand.vmem [shape: f32[2,32,8], index: 8, kind: input, shape index: {}]   ;;  %s5818_s9 = inlined_call_operand.hbm [shape: f32[6,8], index: 9, kind: input, shape index: {}]   ;;  %s5819_s10 = inlined_call_operand.vmem [shape: f32[8,4], index: 10, kind: input, shape index: {}]   ;;  %s5820_s11 = inlined_call_operand.vmem [shape: f32[1,4], index: 11, kind: input, shape index: {}]   ;;  %s5821_s12 = inlined_call_operand.hbm [shape: f32[2,4], index: 12, kind: output, shape index: {}]  }
   0x1   :  { %18 = vsyncpa [#allocation6], 0 }
   0x2   :  { %19 = vsyncpa [#allocation9], 0 }
   0x3   :  { %20 = vsyncpa [#allocation12], 0 }
   0x4   :  { %21 = vsyncpa [#allocation15], 0 }
   0x5   :  { %22 = vsyncpa [#allocation4], 0  ;;  %s5188_s21 = smov [#allocation5]   ;;  %s4978_s25 = scalar_lea.hbm %s5811_s2, 4096 }
   0x6   :  { %s40_s22 = sshll.u32 %s5188_s21, 4  ;;  %p4979_p0 = scmp.ne.s32.totalorder %s5811_s2, %s4978_s25  ;;  %s41_s22 = int_to_ptr.vmem [resolvable:$true] %s40_s22 }
   0x7   :  { %p4982_p1 = scmp.lt.u32.totalorder %s4978_s25, %s5811_s2 }
   0x9   :  { %p4984_p2 = pnand %p4982_p1, %p4979_p0 }
   0xb   :  { %4987 = shalt.err (!%p4984_p2)
}
   0xc   :  { %s4988_s30 = scalar_lea.vmem %s41_s22, 4096  ;;  %p4993_p4 = scmp.lt.s32.totalorder %s41_s22, %s41_s22 }
   0xd   :  { %p4989_p3 = scmp.ne.s32.totalorder %s41_s22, %s4988_s30  ;;  %p4994_p5 = scmp.lt.s32.totalorder %s4988_s30, %s4988_s30 }
   0xf   :  { %p4995_p6 = por %p4994_p5, %p4993_p4 }
  0x11   :  { %p4996_p7 = pnand %p4995_p6, %p4989_p3 }
  0x13   :  { %4999 = shalt.err (!%p4996_p7)
}
  0x14   :  { %s5189_s13 = smov 128   ;;  %s5190_s14 = smov 8  }
  0x15   :  { %46 = dma.hbm_to_vmem [thread:$0]  %s5811_s2, 4096, %s41_s22, [#allocation6], %s5189_s13, %s5189_s13, %s5190_s14  }
  0x16   :  { %s5191_s17 = smov [#allocation8]   ;;  %s5192_s19 = smov [#allocation11]  }
  0x17   :  { %s62_s18 = sshll.u32 %s5191_s17, 4  ;;  %s87_s20 = sshll.u32 %s5192_s19, 4  ;;  %s63_s18 = int_to_ptr.vmem [resolvable:$true] %s62_s18  ;;  %s88_s20 = int_to_ptr.vmem [resolvable:$true] %s87_s20 }
  0x18   :  { %s5000_s24 = scalar_lea.hbm %s5813_s4, 2048 }
  0x19   :  { %p5001_p8 = scmp.ne.s32.totalorder %s5813_s4, %s5000_s24  ;;  %p5004_p9 = scmp.lt.u32.totalorder %s5000_s24, %s5813_s4 }
  0x1b   :  { %p5006_p10 = pnand %p5004_p9, %p5001_p8 }
  0x1d   :  { %5009 = shalt.err (!%p5006_p10)
}
  0x1e   :  { %s5010_s2 = scalar_lea.vmem %s63_s18, 2048  ;;  %p5015_p12 = scmp.lt.s32.totalorder %s63_s18, %s63_s18 }
  0x1f   :  { %p5011_p11 = scmp.ne.s32.totalorder %s63_s18, %s5010_s2  ;;  %p5016_p13 = scmp.lt.s32.totalorder %s5010_s2, %s5010_s2 }
  0x21   :  { %p5017_p0 = por %p5016_p13, %p5015_p12 }
  0x23   :  { %p5018_p1 = pnand %p5017_p0, %p5011_p11 }
  0x25   :  { %5021 = shalt.err (!%p5018_p1)
}
  0x26   :  { %68 = dma.hbm_to_vmem [thread:$0]  %s5813_s4, 2048, %s63_s18, [#allocation9], %s5189_s13, %s5189_s13, %s5190_s14  }
  0x27   :  { %s5022_s16 = scalar_lea.hbm %s5815_s6, 128 }
  0x28   :  { %p5023_p2 = scmp.ne.s32.totalorder %s5815_s6, %s5022_s16  ;;  %p5026_p3 = scmp.lt.u32.totalorder %s5022_s16, %s5815_s6 }
  0x2a   :  { %p5028_p4 = pnand %p5026_p3, %p5023_p2 }
  0x2c   :  { %5031 = shalt.err (!%p5028_p4)
}
  0x2d   :  { %s5032_s24 = scalar_lea.vmem %s88_s20, 128  ;;  %p5037_p6 = scmp.lt.s32.totalorder %s88_s20, %s88_s20 }
  0x2e   :  { %p5033_p5 = scmp.ne.s32.totalorder %s88_s20, %s5032_s24  ;;  %p5038_p7 = scmp.lt.s32.totalorder %s5032_s24, %s5032_s24 }
  0x30   :  { %p5039_p8 = por %p5038_p7, %p5037_p6 }
  0x32   :  { %p5040_p9 = pnand %p5039_p8, %p5033_p5 }
  0x34   :  { %5043 = shalt.err (!%p5040_p9)
}
  0x35   :  { %90 = dma.hbm_to_vmem [thread:$0]  %s5815_s6, 128, %s88_s20, [#allocation12]  }
  0x36   :  { %s5193_s25 = smov [#allocation2]   ;;  %s5194_s27 = smov [#allocation7]  }
  0x37   :  { %s31_s26 = sshll.u32 %s5193_s25, 4  ;;  %s53_s28 = sshll.u32 %s5194_s27, 4  ;;  %s32_s26 = int_to_ptr.vmem [resolvable:$true] %s31_s26  ;;  %s54_s28 = int_to_ptr.vmem [resolvable:$true] %s53_s28 }
  0x38   :  { %s5044_s29 = scalar_lea.hbm %s5810_s1, 64 }
  0x39   :  { %p5045_p10 = scmp.ne.s32.totalorder %s5810_s1, %s5044_s29  ;;  %p5048_p11 = scmp.lt.u32.totalorder %s5044_s29, %s5810_s1 }
  0x3b   :  { %p5050_p12 = pnand %p5048_p11, %p5045_p10 }
  0x3d   :  { %5053 = shalt.err (!%p5050_p12)
}
  0x3e   :  { %s5054_s6 = scalar_lea.vmem %s32_s26, 64  ;;  %p5059_p0 = scmp.lt.s32.totalorder %s32_s26, %s32_s26 }
  0x3f   :  { %p5055_p13 = scmp.ne.s32.totalorder %s32_s26, %s5054_s6  ;;  %p5060_p1 = scmp.lt.s32.totalorder %s5054_s6, %s5054_s6 }
  0x41   :  { %p5061_p2 = por %p5060_p1, %p5059_p0 }
  0x43   :  { %p5062_p3 = pnand %p5061_p2, %p5055_p13 }
  0x45   :  { %5065 = shalt.err (!%p5062_p3)
}
  0x46   :  { %34 = dma.hbm_to_vmem [thread:$0]  %s5810_s1, 64, %s32_s26, [#allocation3]  }
  0x47   :  { %s5066_s24 = scalar_lea.hbm %s5812_s3, 128 }
  0x48   :  { %p5067_p4 = scmp.ne.s32.totalorder %s5812_s3, %s5066_s24  ;;  %p5070_p5 = scmp.lt.u32.totalorder %s5066_s24, %s5812_s3 }
  0x4a   :  { %p5072_p6 = pnand %p5070_p5, %p5067_p4 }
  0x4c   :  { %5075 = shalt.err (!%p5072_p6)
}
  0x4d   :  { %s5076_s2 = scalar_lea.vmem %s54_s28, 128  ;;  %p5081_p8 = scmp.lt.s32.totalorder %s54_s28, %s54_s28 }
  0x4e   :  { %p5077_p7 = scmp.ne.s32.totalorder %s54_s28, %s5076_s2  ;;  %p5082_p9 = scmp.lt.s32.totalorder %s5076_s2, %s5076_s2 }
  0x50   :  { %p5083_p10 = por %p5082_p9, %p5081_p8 }
  0x52   :  { %p5084_p11 = pnand %p5083_p10, %p5077_p7 }
  0x54   :  { %5087 = shalt.err (!%p5084_p11)
}
  0x55   :  { %56 = dma.hbm_to_vmem [thread:$0]  %s5812_s3, 128, %s54_s28, [#allocation6]  }
  0x56   :  { %s5195_s22 = smov [#allocation10]   ;;  %s5196_s30 = smov [#allocation13]  }
  0x57   :  { %s74_s29 = sshll.u32 %s5195_s22, 4  ;;  %s96_s15 = sshll.u32 %s5196_s30, 4  ;;  %s75_s29 = int_to_ptr.vmem [resolvable:$true] %s74_s29  ;;  %s97_s15 = int_to_ptr.vmem [resolvable:$true] %s96_s15 }
  0x58   :  { %s5088_s6 = scalar_lea.hbm %s5814_s5, 2048 }
  0x59   :  { %p5089_p12 = scmp.ne.s32.totalorder %s5814_s5, %s5088_s6  ;;  %p5092_p13 = scmp.lt.u32.totalorder %s5088_s6, %s5814_s5 }
  0x5b   :  { %p5094_p0 = pnand %p5092_p13, %p5089_p12 }
  0x5d   :  { %5097 = shalt.err (!%p5094_p0)
}
  0x5e   :  { %s5098_s3 = scalar_lea.vmem %s75_s29, 2048  ;;  %p5103_p2 = scmp.lt.s32.totalorder %s75_s29, %s75_s29 }
  0x5f   :  { %p5099_p1 = scmp.ne.s32.totalorder %s75_s29, %s5098_s3  ;;  %p5104_p3 = scmp.lt.s32.totalorder %s5098_s3, %s5098_s3 }
  0x61   :  { %p5105_p4 = por %p5104_p3, %p5103_p2 }
  0x63   :  { %p5106_p5 = pnand %p5105_p4, %p5099_p1 }
  0x65   :  { %5109 = shalt.err (!%p5106_p5)
}
  0x66   :  { %80 = dma.hbm_to_vmem [thread:$0]  %s5814_s5, 2048, %s75_s29, [#allocation9], %s5189_s13, %s5189_s13, %s5190_s14  }
  0x67   :  { %s5110_s25 = scalar_lea.hbm %s5816_s7, 1024 }
  0x68   :  { %p5111_p6 = scmp.ne.s32.totalorder %s5816_s7, %s5110_s25  ;;  %p5114_p7 = scmp.lt.u32.totalorder %s5110_s25, %s5816_s7 }
  0x6a   :  { %p5116_p8 = pnand %p5114_p7, %p5111_p6 }
  0x6c   :  { %5119 = shalt.err (!%p5116_p8)
}
  0x6d   :  { %s5120_s22 = scalar_lea.vmem %s97_s15, 1024  ;;  %p5125_p10 = scmp.lt.s32.totalorder %s97_s15, %s97_s15 }
  0x6e   :  { %p5121_p9 = scmp.ne.s32.totalorder %s97_s15, %s5120_s22  ;;  %p5126_p11 = scmp.lt.s32.totalorder %s5120_s22, %s5120_s22 }
  0x70   :  { %p5127_p12 = por %p5126_p11, %p5125_p10 }
  0x72   :  { %p5128_p13 = pnand %p5127_p12, %p5121_p9 }
  0x74   :  { %5131 = shalt.err (!%p5128_p13)
}
  0x75   :  { %102 = dma.hbm_to_vmem [thread:$0]  %s5816_s7, 1024, %s97_s15, [#allocation12], %s5189_s13, %s5189_s13, %s5190_s14  }
  0x76   :  { %s5197_s30 = smov [#allocation14]   ;;  %s5132_s20 = scalar_lea.hbm %s5818_s9, 128 }
  0x77   :  { %s111_s16 = sshll.u32 %s5197_s30, 4  ;;  %p5133_p0 = scmp.ne.s32.totalorder %s5818_s9, %s5132_s20  ;;  %s112_s16 = int_to_ptr.vmem [resolvable:$true] %s111_s16 }
  0x78   :  { %p5136_p1 = scmp.lt.u32.totalorder %s5132_s20, %s5818_s9 }
  0x7a   :  { %p5138_p2 = pnand %p5136_p1, %p5133_p0 }
  0x7c   :  { %5141 = shalt.err (!%p5138_p2)
}
  0x7d   :  { %s5142_s28 = scalar_lea.vmem %s112_s16, 128  ;;  %p5147_p4 = scmp.lt.s32.totalorder %s112_s16, %s112_s16 }
  0x7e   :  { %p5143_p3 = scmp.ne.s32.totalorder %s112_s16, %s5142_s28  ;;  %p5148_p5 = scmp.lt.s32.totalorder %s5142_s28, %s5142_s28 }
  0x80   :  { %p5149_p6 = por %p5148_p5, %p5147_p4 }
  0x82   :  { %p5150_p7 = pnand %p5149_p6, %p5143_p3 }
  0x84   :  { %5153 = shalt.err (!%p5150_p7)
}
  0x85   :  { %114 = dma.hbm_to_vmem [thread:$0]  %s5818_s9, 128, %s112_s16, [#allocation15]  }
  0x86   :  { %5176 = dma.done.wait [#allocation3], 64  }
  0x87   :  { %5177 = vsyncadd [#allocation3], 4294967232 }
  0x88   :  { %5178 = dma.done.wait [#allocation6], 4224  }
  0x89   :  { %5179 = vsyncadd [#allocation6], 4294963072 }
  0x8a   :  { %5180 = dma.done.wait [#allocation9], 4096  }
  0x8b   :  { %5181 = vsyncadd [#allocation9], 4294963200 }
  0x8c   :  { %5182 = dma.done.wait [#allocation12], 1152  }
  0x8d   :  { %5183 = vsyncadd [#allocation12], 4294966144 }
  0x8e   :  { %5184 = dma.done.wait [#allocation15], 128  }
  0x8f   :  { %5185 = vsyncadd [#allocation15], 4294967168  ;;  %v5198_v0 = vmov 0   ;;  %v143_v1 = vld [vmem:[%s5809_s0] sm:$0xff]  ;;  %v144_v2 = vld [vmem:[%s5809_s0 + $0x8] sm:$0xff]  ;;  %vm217_vm0 = vcmask 1046528   ;;  %v208_v41 = vlaneseq }
  0x90   :  { %4870 = vset.pattern.permute.xlu0 %v5198_v0  ;;  %4871 = vset.pattern.permute.xlu1 %v5198_v0  ;;  %v4150_v3 = vld [vmem:[%s5809_s0 + $0x10] sm:$0xff]  ;;  %vm184_vm1 = vcmask 1044480   ;;  %v218_v4 = vrot.slane %v143_v1, 1  ;;  %v219_v5 = vrot.slane %v144_v2, 1  ;;  %v4151_v8 = vld [vmem:[%s5809_s0 + $0x18] sm:$0xff]  ;;  %vm222_vm2 = vcmask 1043456  }
  0x91   :  { %192 = vperm.xlu0 %4870, %v143_v1   ;;  %v185_v6 = vrot.slane %v4150_v3, 3  ;;  %v223_v7 = vrot.slane %v4150_v3, 4  ;;  %v186_v9 = vrot.slane %v4151_v8, 3  ;;  %v224_v13 = vrot.slane %v4151_v8, 4  ;;  %v153_v30 = vld [vmem:[#allocation5 + $0x20] sm:$0xff]  ;;  %v154_v31 = vld [vmem:[#allocation5 + $0x28] sm:$0xff] }
  0x92   :  { %v220_v10 = vsel %vm217_vm0, %v218_v4, %v219_v5  ;;  %v258_v15 = vrot.slane %v143_v1, 2  ;;  %v259_v16 = vrot.slane %v144_v2, 2  ;;  %vm257_vm3 = vcmask 1045504   ;;  %v155_v33 = vld [vmem:[#allocation5 + $0x30] sm:$0xff]  ;;  %v156_v34 = vld [vmem:[#allocation5 + $0x38] sm:$0xff]  ;;  %v149_v36 = vld [vmem:[#allocation5] sm:$0xff] }
  0x93   :  { %v189_v11 = vsel %vm184_vm1, %v144_v2, %v185_v6  ;;  %229 = vperm.xlu1 %4871, %v220_v10   ;;  %v227_v12 = vsel %vm184_vm1, %v219_v5, %v223_v7  ;;  %v187_v14 = vsel %vm184_vm1, %v185_v6, %v186_v9  ;;  %v225_v17 = vsel %vm222_vm2, %v223_v7, %v224_v13  ;;  %v150_v37 = vld [vmem:[#allocation5 + $0x8] sm:$0xff]  ;;  %v148_v51 = vld [vmem:[#allocation2] sm:$0xf] }
  0x94   :  { %v263_v18 = vrot.slane %v4150_v3, 5  ;;  %v260_v19 = vsel %vm257_vm3, %v258_v15, %v259_v16  ;;  %v264_v21 = vrot.slane %v4151_v8, 5  ;;  %vm262_vm4 = vcmask 1042432  }
  0x95   :  { %197 = vperm.xlu0 %4870, %v189_v11   ;;  %v297_v22 = vrot.slane %v143_v1, 3  ;;  %v298_v23 = vrot.slane %v144_v2, 3  ;;  %v302_v25 = vrot.slane %v4150_v3, 6  ;;  %v303_v28 = vrot.slane %v4151_v8, 6 }
  0x96   :  { %v267_v20 = vsel %vm184_vm1, %v259_v16, %v263_v18  ;;  %v265_v24 = vsel %vm262_vm4, %v263_v18, %v264_v21  ;;  %vm301_vm5 = vcmask 1041408   ;;  %v4661_v32 = vpack.c.bf16 %v154_v31, %v153_v30 }
  0x97   :  { %234 = vperm.xlu1 %4871, %v227_v12   ;;  %v299_v26 = vsel %vm184_vm1, %v297_v22, %v298_v23  ;;  %v306_v27 = vsel %vm184_vm1, %v298_v23, %v302_v25  ;;  %v304_v29 = vsel %vm301_vm5, %v302_v25, %v303_v28  ;;  %v4665_v35 = vpack.c.bf16 %v156_v34, %v155_v33 }
  0x98   :  { %4662 = vmatprep.subr.bf16.mxu0 %v4661_v32  ;;  %v5399_v38 = vpack.c.bf16 %v150_v37, %v149_v36  ;;  %v209_v44 = vshrl.u32 %v208_v41, 7  ;;  %vm338_vm6 = vcmask 261120   ;;  %vm344_vm7 = vcmask 254976  }
  0x99   :  { %201 = vperm.xlu0 %4870, %v187_v14   ;;  %4664 = vmatpush3.bf16.msra.mxu0 %v4661_v32  ;;  %vm1535_vm8 = vcmask 1040384   ;;  %vm1954_vm9 = vcmask 123904   ;;  %vm1952_vm10 = vcmask 130048   ;;  %vm5200_vm11 = vmmov 0  }
  0x9a   :  { %4666 = vmatprep.subr.bf16.mxu0 %v4665_v35  ;;  %v247_v46 = vsub.s32 1, %v209_v44  ;;  %v5402_v48 = vsub.s32 0, %v209_v44  ;;  %v287_v49 = vsub.s32 2, %v209_v44  ;;  %v326_v57 = vsub.s32 3, %v209_v44 }
  0x9b   :  { %238 = vperm.xlu1 %4871, %v225_v17   ;;  %vm3217_vm12 = vcmask 58368   ;;  %vm3277_vm13 = vcmask 64512   ;;  %vm4115_vm14 = vcmask 25600  }
  0x9c   :  { %v248_v52 = vrot.slane %v148_v51, %v247_v46  ;;  %v211_v54 = vrot.slane %v148_v51, %v5402_v48  ;;  %v288_v55 = vrot.slane %v148_v51, %v287_v49  ;;  %v327_v0 = vrot.slane %v148_v51, %v326_v57 }
  0x9d   :  { %269 = vperm.xlu0 %4870, %v260_v19   ;;  %4668 = vmatpush3.bf16.msra.mxu0 %v4665_v35 }
  0x9e   :  { %4670 = vmatprep.subr.bf16.mxu0 %v5399_v38 }
  0x9f   :  { %274 = vperm.xlu1 %4871, %v267_v20  }
  0xa1   :  { %205 = vperm.xlu0 %4870, %v186_v9  }
  0xa3   :  { %242 = vperm.xlu1 %4871, %v224_v13  }
  0xa5   :  { %278 = vperm.xlu0 %4870, %v265_v24  }
  0xa7   :  { %308 = vperm.xlu1 %4871, %v299_v26  }
  0xa9   :  { %313 = vperm.xlu0 %4870, %v306_v27  }
  0xab   :  { %282 = vperm.xlu1 %4871, %v264_v21  }
  0xad   :  { %317 = vperm.xlu0 %4870, %v304_v29  }
  0xaf   :  { %321 = vperm.xlu1 %4871, %v303_v28  }
 0x110   :  { %v193_v39 = vpop.permute.xlu0 %192 }
 0x111   :  { %v212_v61 = vmul.f32 %v211_v54, %v193_v39 }
 0x112   :  { %v230_v40 = vpop.permute.xlu1 %229 }
 0x113   :  { %v249_v58 = vmul.f32 %v248_v52, %v230_v40 }
 0x114   :  { %v198_v42 = vpop.permute.xlu0 %197 }
 0x115   :  { %v213_v1 = vmul.f32 %v211_v54, %v198_v42  ;;  %v253_v3 = vadd.f32 %v249_v58, %v212_v61 }
 0x116   :  { %v235_v43 = vpop.permute.xlu1 %234 }
 0x117   :  { %v250_v59 = vmul.f32 %v248_v52, %v235_v43 }
 0x118   :  { %v202_v45 = vpop.permute.xlu0 %201 }
 0x119   :  { %v254_v5 = vadd.f32 %v250_v59, %v213_v1  ;;  %v214_v7 = vmul.f32 %v211_v54, %v202_v45 }
 0x11a   :  { %v239_v47 = vpop.permute.xlu1 %238 }
 0x11b   :  { %v251_v4 = vmul.f32 %v248_v52, %v239_v47 }
 0x11c   :  { %v270_v50 = vpop.permute.xlu0 %269 }
 0x11d   :  { %v289_v62 = vmul.f32 %v288_v55, %v270_v50  ;;  %v255_v14 = vadd.f32 %v251_v4, %v214_v7  ;;  %v336_v4 = vld [vmem:[#allocation7] sm:$0x1]  ;;  %v337_v7 = vld [vmem:[#allocation7 + $0x1] sm:$0x1] }
 0x11e   :  { %v275_v53 = vpop.permute.xlu1 %274 }
 0x11f   :  { %v290_v2 = vmul.f32 %v288_v55, %v275_v53  ;;  %v293_v8 = vadd.f32 %v289_v62, %v253_v3 }
 0x120   :  { %v206_v56 = vpop.permute.xlu0 %205 }
 0x121   :  { %v294_v12 = vadd.f32 %v290_v2, %v254_v5  ;;  %v215_v19 = vmul.f32 %v211_v54, %v206_v56 }
 0x122   :  { %v243_v60 = vpop.permute.xlu1 %242 }
 0x123   :  { %v252_v15 = vmul.f32 %v248_v52, %v243_v60 }
 0x124   :  { %v279_v63 = vpop.permute.xlu0 %278 }
 0x125   :  { %v291_v9 = vmul.f32 %v288_v55, %v279_v63  ;;  %v256_v28 = vadd.f32 %v252_v15, %v215_v19 }
 0x126   :  { %v309_v6 = vpop.permute.xlu1 %308 }
 0x127   :  { %v328_v10 = vmul.f32 %v327_v0, %v309_v6  ;;  %v295_v20 = vadd.f32 %v291_v9, %v255_v14 }
 0x128   :  { %v314_v11 = vpop.permute.xlu0 %313 }
 0x129   :  { %v329_v13 = vmul.f32 %v327_v0, %v314_v11  ;;  %v5405_v16 = vadd.f32 %v328_v10, %v293_v8 }
 0x12a   :  { %v283_v18 = vpop.permute.xlu1 %282 }
 0x12b   :  { %v5407_v17 = vadd.f32 %v329_v13, %v294_v12  ;;  %v353_v21 = vmul.f32 %v5405_v16, %v5405_v16  ;;  %v292_v22 = vmul.f32 %v288_v55, %v283_v18  ;;  %v339_v24 = vsel %vm338_vm6, %v5405_v16, 0.0 }
 0x12c   :  { %v318_v23 = vpop.permute.xlu0 %317 }
 0x12d   :  { %v340_v25 = vsel %vm338_vm6, %v5407_v17, 0.0  ;;  %v354_v26 = vmul.f32 %v5407_v17, %v5407_v17  ;;  %v330_v27 = vmul.f32 %v327_v0, %v318_v23  ;;  %v357_v29 = vsel %vm338_vm6, %v353_v21, 0.0 }
 0x12e   :  { %v322_v32 = vpop.permute.xlu1 %321  ;;  %v341_v33 = vadd.f32 %v340_v25, %v339_v24  ;;  %v296_v34 = vadd.f32 %v292_v22, %v256_v28 }
 0x12f   :  { %v358_v30 = vsel %vm338_vm6, %v354_v26, 0.0  ;;  %v5419_v31 = vadd.f32 %v330_v27, %v295_v20  ;;  %v331_v35 = vmul.f32 %v327_v0, %v322_v32 }
 0x130   :  { %v359_v39 = vadd.f32 %v358_v30, %v357_v29 }
 0x131   :  { %v342_v36 = vsel %vm338_vm6, %v5419_v31, 0.0  ;;  %v355_v37 = vmul.f32 %v5419_v31, %v5419_v31  ;;  %v5425_v41 = vadd.f32 %v331_v35, %v296_v34 }
 0x132   :  { %v343_v40 = vadd.f32 %v342_v36, %v341_v33 }
 0x133   :  { %v360_v42 = vsel %vm338_vm6, %v355_v37, 0.0  ;;  %v345_v44 = vsel %vm344_vm7, %v5425_v41, 0.0  ;;  %v356_v45 = vmul.f32 %v5425_v41, %v5425_v41 }
 0x134   :  { %v361_v43 = vadd.f32 %v360_v42, %v359_v39  ;;  %v346_v46 = vadd.f32 %v345_v44, %v343_v40 }
 0x135   :  { %v362_v47 = vsel %vm344_vm7, %v356_v45, 0.0 }
 0x136   :  { %v347_v49 = vrot.slane %v346_v46, 4  ;;  %v363_v50 = vadd.f32 %v362_v47, %v361_v43 }
 0x138   :  { %v348_v51 = vadd.f32 %v347_v49, %v346_v46  ;;  %v364_v52 = vrot.slane %v363_v50, 4 }
 0x13a   :  { %v349_v53 = vrot.slane %v348_v51, 2  ;;  %v365_v54 = vadd.f32 %v364_v52, %v363_v50 }
 0x13c   :  { %v350_v55 = vadd.f32 %v349_v53, %v348_v51  ;;  %v366_v56 = vrot.slane %v365_v54, 2 }
 0x13e   :  { %v351_v57 = vrot.slane %v350_v55, 1  ;;  %v367_v58 = vadd.f32 %v366_v56, %v365_v54 }
 0x140   :  { %v352_v59 = vadd.f32 %v351_v57, %v350_v55  ;;  %v368_v60 = vrot.slane %v367_v58, 1 }
 0x142   :  { %v369_v61 = vadd.f32 %v368_v60, %v367_v58  ;;  %v370_v62 = vmul.f32 0.03846154, %v352_v59 }
 0x144   :  { %v371_v63 = vmul.f32 0.03846154, %v369_v61  ;;  %v372_v0 = vmul.f32 %v370_v62, %v370_v62 }
 0x146   :  { %v373_v1 = vsub.f32 %v371_v63, %v372_v0 }
 0x148   :  { %v374_v2 = vmax.f32 %v373_v1, 0.0 }
 0x14a   :  { %v375_v3 = vadd.f32 1e-05, %v374_v2 }
 0x14c   :  { %4872 = vrsqrt.f32 %v375_v3 }
 0x156   :  { %v4873_v5 = vpop.eup %4872 }
 0x157   :  { %v377_v6 = vmul.f32 %v4873_v5, %v336_v4 }
 0x159   :  { %v378_v8 = vmul.f32 %v377_v6, %v370_v62  ;;  %v383_v9 = vrot.slane %v377_v6, %v5402_v48 }
 0x15b   :  { %v379_v10 = vsub.f32 %v337_v7, %v378_v8  ;;  %v387_v11 = vmul.f32 %v383_v9, %v5425_v41  ;;  %v384_v13 = vmul.f32 %v383_v9, %v5405_v16  ;;  %v385_v14 = vmul.f32 %v383_v9, %v5407_v17 }
 0x15c   :  { %v386_v15 = vmul.f32 %v383_v9, %v5419_v31  ;;  %v151_v9 = vld [vmem:[#allocation5 + $0x10] sm:$0xff] }
 0x15d   :  { %v391_v12 = vrot.slane %v379_v10, %v5402_v48  ;;  %v152_v10 = vld [vmem:[#allocation5 + $0x18] sm:$0xff] }
 0x15f   :  { %v395_v18 = vadd.f32 %v391_v12, %v387_v11  ;;  %v392_v19 = vadd.f32 %v391_v12, %v384_v13  ;;  %v393_v20 = vadd.f32 %v391_v12, %v385_v14  ;;  %v394_v21 = vadd.f32 %v391_v12, %v386_v15 }
 0x160   :  { %v4673_v15 = vpack.c.bf16 %v152_v10, %v151_v9 }
 0x161   :  { %v399_v22 = vsub.f32 0.0, %v395_v18  ;;  %v396_v23 = vsub.f32 0.0, %v392_v19  ;;  %v397_v24 = vsub.f32 0.0, %v393_v20  ;;  %v398_v25 = vsub.f32 0.0, %v394_v21 }
 0x163   :  { %v406_v26 = vmul.f32 1.442695, %v399_v22  ;;  %v400_v27 = vmul.f32 1.442695, %v396_v23  ;;  %v402_v28 = vmul.f32 1.442695, %v397_v24 }
 0x164   :  { %v404_v29 = vmul.f32 1.442695, %v398_v25  ;;  %v159_v24 = vld [vmem:[#allocation5 + $0x50] sm:$0xff]  ;;  %v160_v25 = vld [vmem:[#allocation5 + $0x58] sm:$0xff] }
 0x165   :  { %4874 = vpow2.f32 %v406_v26 }
 0x166   :  { %4876 = vpow2.f32 %v400_v27  ;;  %v4681_v27 = vpack.c.bf16 %v160_v25, %v159_v24 }
 0x167   :  { %4878 = vpow2.f32 %v402_v28  ;;  %v161_v28 = vld [vmem:[#allocation5 + $0x60] sm:$0xff] }
 0x168   :  { %4880 = vpow2.f32 %v404_v29  ;;  %v162_v29 = vld [vmem:[#allocation5 + $0x68] sm:$0xff] }
 0x16f   :  { %v4875_v30 = vpop.eup %4874 }
 0x170   :  { %v4877_v32 = vpop.eup %4876  ;;  %v411_v33 = vadd.f32 1.0, %v4875_v30 }
 0x171   :  { %v4879_v34 = vpop.eup %4878  ;;  %v408_v35 = vadd.f32 1.0, %v4877_v32 }
 0x172   :  { %v4881_v36 = vpop.eup %4880  ;;  %4882 = vrcp.f32 %v411_v33  ;;  %v409_v37 = vadd.f32 1.0, %v4879_v34  ;;  %v4685_v34 = vpack.c.bf16 %v162_v29, %v161_v28 }
 0x173   :  { %4884 = vrcp.f32 %v408_v35  ;;  %v410_v39 = vadd.f32 1.0, %v4881_v36  ;;  %v163_v36 = vld [vmem:[#allocation5 + $0x70] sm:$0xff] }
 0x174   :  { %4886 = vrcp.f32 %v409_v37 }
 0x175   :  { %4888 = vrcp.f32 %v410_v39 }
 0x17c   :  { %v4883_v40 = vpop.eup %4882 }
 0x17d   :  { %v4885_v42 = vpop.eup %4884  ;;  %v419_v43 = vmul.f32 %v4883_v40, %v411_v33 }
 0x17e   :  { %v4887_v44 = vpop.eup %4886  ;;  %v416_v45 = vmul.f32 %v4885_v42, %v408_v35 }
 0x17f   :  { %v4889_v46 = vpop.eup %4888  ;;  %v423_v47 = vsub.f32 2.0, %v419_v43  ;;  %v417_v49 = vmul.f32 %v4887_v44, %v409_v37  ;;  %v164_v37 = vld [vmem:[#allocation5 + $0x78] sm:$0xff] }
 0x180   :  { %v420_v50 = vsub.f32 2.0, %v416_v45  ;;  %v418_v51 = vmul.f32 %v4889_v46, %v410_v39 }
 0x181   :  { %v427_v52 = vmul.f32 %v4883_v40, %v423_v47  ;;  %v421_v53 = vsub.f32 2.0, %v417_v49 }
 0x182   :  { %v424_v54 = vmul.f32 %v4885_v42, %v420_v50  ;;  %v422_v55 = vsub.f32 2.0, %v418_v51  ;;  %v4689_v42 = vpack.c.bf16 %v164_v37, %v163_v36 }
 0x183   :  { %v431_v56 = vmul.f32 %v427_v52, %v395_v18  ;;  %v425_v57 = vmul.f32 %v4887_v44, %v421_v53  ;;  %v170_v53 = vld [vmem:[#allocation5 + $0xa0] sm:$0xff] }
 0x184   :  { %v428_v58 = vmul.f32 %v424_v54, %v392_v19  ;;  %v426_v59 = vmul.f32 %v4889_v46, %v422_v55  ;;  %v171_v54 = vld [vmem:[#allocation5 + $0xa8] sm:$0xff] }
 0x185   :  { %v429_v60 = vmul.f32 %v425_v57, %v393_v20  ;;  %v445_v61 = vrot.slane %v431_v56, 2  ;;  %v157_v20 = vld [vmem:[#allocation5 + $0x40] sm:$0xff]  ;;  %v4693_v55 = vpack.c.bf16 %v171_v54, %v170_v53  ;;  %v172_v56 = vld [vmem:[#allocation5 + $0xb0] sm:$0xff]  ;;  %v173_v57 = vld [vmem:[#allocation5 + $0xb8] sm:$0xff] }
 0x186   :  { %v434_v62 = vrot.slane %v428_v58, 5  ;;  %v430_v63 = vmul.f32 %v426_v59, %v394_v21  ;;  %v158_v21 = vld [vmem:[#allocation5 + $0x48] sm:$0xff]  ;;  %v4697_v58 = vpack.c.bf16 %v173_v57, %v172_v56  ;;  %v166_v59 = vld [vmem:[#allocation5 + $0x80] sm:$0xff] }
 0x187   :  { %v435_v0 = vrot.slane %v429_v60, 5  ;;  %v442_v1 = vrot.slane %v429_v60, 2  ;;  %v4677_v22 = vpack.c.bf16 %v158_v21, %v157_v20  ;;  %4694 = vmatprep.subr.bf16.mxu1 %v4693_v55  ;;  %v167_v60 = vld [vmem:[#allocation5 + $0x88] sm:$0xff] }
 0x188   :  { %v5440_v2 = vsel %vm262_vm4, 0.0, %v434_v62  ;;  %v443_v3 = vrot.slane %v430_v63, 2  ;;  %4696 = vmatpush3.bf16.msra.mxu1 %v4693_v55 }
 0x189   :  { %v5443_v4 = vsel %vm262_vm4, %v434_v62, %v435_v0  ;;  %v456_v5 = vrot.slane %v5440_v2, 1  ;;  %v653_v32 = vrot.slane %v5440_v2, 2  ;;  %v760_v45 = vrot.slane %v5440_v2, 3  ;;  %4698 = vmatprep.subr.bf16.mxu1 %v4697_v58 }
 0x18a   :  { %v457_v6 = vrot.slane %v5443_v4, 1  ;;  %v444_v7 = vsel %vm257_vm3, %v442_v1, %v443_v3  ;;  %v5449_v8 = vsel %vm257_vm3, %v443_v3, %v445_v61  ;;  %v654_v33 = vrot.slane %v5443_v4, 2 }
 0x18b   :  { %v5452_v11 = vsel %vm262_vm4, 0.0, %v444_v7  ;;  %v461_v12 = vrot.slane %v5449_v8, 4  ;;  %v451_v26 = vrot.slane %v5449_v8, 3  ;;  %v658_v40 = vrot.slane %v5449_v8, 5 }
 0x18c   :  { %v458_v13 = vsel %vm217_vm0, %v456_v5, %v457_v6  ;;  %v460_v14 = vrot.slane %v5452_v11, 4  ;;  %v450_v23 = vrot.slane %v5452_v11, 3  ;;  %v657_v35 = vrot.slane %v5452_v11, 5  ;;  %4700 = vmatpush3.bf16.msra.mxu1 %v4697_v58 }
 0x18d   :  { %4384 = vmatprep.mubr.msk.f32.mxu0 %vm338_vm6, %v458_v13  ;;  %v655_v39 = vsel %vm257_vm3, %v653_v32, %v654_v33  ;;  %v761_v46 = vrot.slane %v5443_v4, 3  ;;  %v764_v47 = vrot.slane %v5452_v11, 6  ;;  %v765_v50 = vrot.slane %v5449_v8, 6 }
 0x18e   :  { %v464_v18 = vsel %vm184_vm1, %v457_v6, %v460_v14  ;;  %v462_v19 = vsel %vm222_vm2, %v460_v14, %v461_v12  ;;  %v452_v30 = vsel %vm184_vm1, %v450_v23, %v451_v26  ;;  %v661_v43 = vsel %vm184_vm1, %v654_v33, %v657_v35 }
 0x18f   :  { %4385 = vmatmul.mubr.msk.f32.vlgmr.msra.gmra.mrb[0].mxu0 %vm338_vm6, %v464_v18  ;;  %v659_v44 = vsel %vm262_vm4, %v657_v35, %v658_v40  ;;  %v762_v49 = vsel %vm184_vm1, %v760_v45, %v761_v46  ;;  %v768_v51 = vsel %vm184_vm1, %v761_v46, %v764_v47  ;;  %v766_v52 = vsel %vm301_vm5, %v764_v47, %v765_v50  ;;  %v868_v45 = vld [vmem:[#allocation7 + $0x3] sm:$0x1] }
 0x190   :  { %4672 = vmatpush3.bf16.msra.mxu0 %v5399_v38  ;;  %4387 = vmatprep.mubr.msk.f32.mxu0 %vm338_vm6, %v462_v19  ;;  %v454_v38 = vsel %vm184_vm1, %v5443_v4, %v450_v23  ;;  %v5496_v61 = vpack.c.bf16 %v167_v60, %v166_v59 }
 0x191   :  { %4674 = vmatprep.subr.bf16.mxu0 %v4673_v15 }
 0x192   :  { %4702 = vmatprep.subr.bf16.mxu1 %v5496_v61 }
 0x193   :  { %4388 = vmatmul.mubr.msk.f32.gmra.mrb[2].mxu0 %vm338_vm6, %v461_v12 }
 0x194   :  { %4676 = vmatpush3.bf16.msra.mxu0 %v4673_v15  ;;  %4398 = vmatprep.mubr.msk.f32.mxu0 %vm338_vm6, %v5440_v2 }
 0x195   :  { %4678 = vmatprep.subr.bf16.mxu0 %v4677_v22 }
 0x197   :  { %4399 = vmatmul.mubr.msk.f32.vlgmr.msra.gmra.mrb[0].mxu0 %vm338_vm6, %v454_v38 }
 0x198   :  { %4680 = vmatpush3.bf16.msra.mxu0 %v4677_v22  ;;  %4401 = vmatprep.mubr.msk.f32.mxu0 %vm338_vm6, %v452_v30 }
 0x199   :  { %4682 = vmatprep.subr.bf16.mxu0 %v4681_v27 }
 0x19b   :  { %4402 = vmatmul.mubr.msk.f32.gmra.mrb[2].mxu0 %vm338_vm6, %v451_v26 }
 0x19c   :  { %4684 = vmatpush3.bf16.msra.mxu0 %v4681_v27  ;;  %4412 = vmatprep.mubr.msk.f32.mxu0 %vm338_vm6, %v655_v39 }
 0x19d   :  { %4686 = vmatprep.subr.bf16.mxu0 %v4685_v34 }
 0x19f   :  { %4413 = vmatmul.mubr.msk.f32.vlgmr.msra.gmra.mrb[0].mxu0 %vm338_vm6, %v661_v43 }
 0x1a0   :  { %4688 = vmatpush3.bf16.msra.mxu0 %v4685_v34  ;;  %4415 = vmatprep.mubr.msk.f32.mxu0 %vm338_vm6, %v659_v44 }
 0x1a1   :  { %4690 = vmatprep.subr.bf16.mxu0 %v4689_v42 }
 0x1a3   :  { %4416 = vmatmul.mubr.msk.f32.gmra.mrb[2].mxu0 %vm338_vm6, %v658_v40 }
 0x1a4   :  { %4692 = vmatpush3.bf16.msra.mxu0 %v4689_v42  ;;  %4426 = vmatprep.mubr.msk.f32.mxu0 %vm338_vm6, %v762_v49  ;;  %v867_v42 = vld [vmem:[#allocation7 + $0x2] sm:$0x1] }
 0x1a7   :  { %4427 = vmatmul.mubr.msk.f32.vlgmr.msra.gmra.mrb[0].mxu0 %vm338_vm6, %v768_v51 }
 0x1a8   :  { %4429 = vmatprep.mubr.msk.f32.mxu0 %vm338_vm6, %v766_v52 }
 0x1ab   :  { %4430 = vmatmul.mubr.msk.f32.gmra.mrb[2].mxu0 %vm338_vm6, %v765_v50 }
 0x27a   :  { %v4428_v62 = vpop.f32.mrb[0].mxu0 }
 0x27b   :  { %v870_v63 = vsel %vm338_vm6, %v4428_v62, 0.0  ;;  %v883_v0 = vmul.f32 %v4428_v62, %v4428_v62  ;;  %v844_v1 = vpop.f32.mrb[1].mxu0 }
 0x27c   :  { %v869_v2 = vsel %vm338_vm6, %v844_v1, 0.0  ;;  %v882_v3 = vmul.f32 %v844_v1, %v844_v1 }
 0x27d   :  { %v887_v4 = vsel %vm338_vm6, %v883_v0, 0.0  ;;  %v871_v5 = vadd.f32 %v870_v63, %v869_v2 }
 0x27e   :  { %v886_v6 = vsel %vm338_vm6, %v882_v3, 0.0  ;;  %v4431_v7 = vpop.f32.mrb[2].mxu0 }
 0x27f   :  { %v888_v8 = vadd.f32 %v887_v4, %v886_v6  ;;  %v854_v9 = vpop.f32.mrb[3].mxu0  ;;  %v885_v10 = vmul.f32 %v4431_v7, %v4431_v7  ;;  %v874_v14 = vsel %vm344_vm7, %v4431_v7, 0.0 }
 0x280   :  { %v872_v11 = vsel %vm338_vm6, %v854_v9, 0.0  ;;  %v884_v12 = vmul.f32 %v854_v9, %v854_v9 }
 0x281   :  { %v873_v13 = vadd.f32 %v872_v11, %v871_v5  ;;  %v891_v20 = vsel %vm344_vm7, %v885_v10, 0.0 }
 0x282   :  { %v889_v15 = vsel %vm338_vm6, %v884_v12, 0.0 }
 0x283   :  { %v875_v18 = vadd.f32 %v874_v14, %v873_v13  ;;  %v890_v19 = vadd.f32 %v889_v15, %v888_v8 }
 0x285   :  { %v876_v21 = vrot.slane %v875_v18, 4  ;;  %v892_v22 = vadd.f32 %v891_v20, %v890_v19 }
 0x287   :  { %v877_v23 = vadd.f32 %v876_v21, %v875_v18  ;;  %v893_v24 = vrot.slane %v892_v22, 4 }
 0x289   :  { %v878_v25 = vrot.slane %v877_v23, 2  ;;  %v894_v26 = vadd.f32 %v893_v24, %v892_v22 }
 0x28b   :  { %v879_v27 = vadd.f32 %v878_v25, %v877_v23  ;;  %v895_v38 = vrot.slane %v894_v26, 2 }
 0x28d   :  { %v880_v28 = vrot.slane %v879_v27, 1  ;;  %v896_v29 = vadd.f32 %v895_v38, %v894_v26 }
 0x28f   :  { %v881_v30 = vadd.f32 %v880_v28, %v879_v27  ;;  %v897_v32 = vrot.slane %v896_v29, 1 }
 0x291   :  { %v898_v33 = vadd.f32 %v897_v32, %v896_v29  ;;  %v899_v34 = vmul.f32 0.03846154, %v881_v30 }
 0x293   :  { %v900_v35 = vmul.f32 0.03846154, %v898_v33  ;;  %v901_v36 = vmul.f32 %v899_v34, %v899_v34 }
 0x295   :  { %v902_v37 = vsub.f32 %v900_v35, %v901_v36 }
 0x297   :  { %v903_v39 = vmax.f32 %v902_v37, 0.0  ;;  %v168_v37 = vld [vmem:[#allocation5 + $0x90] sm:$0xff] }
 0x299   :  { %v904_v40 = vadd.f32 1e-05, %v903_v39  ;;  %v169_v39 = vld [vmem:[#allocation5 + $0x98] sm:$0xff] }
 0x29b   :  { %4890 = vrsqrt.f32 %v904_v40 }
 0x2a5   :  { %v4891_v43 = vpop.eup %4890 }
 0x2a6   :  { %v906_v44 = vmul.f32 %v4891_v43, %v867_v42 }
 0x2a8   :  { %v907_v46 = vmul.f32 %v906_v44, %v899_v34  ;;  %v912_v47 = vrot.slane %v906_v44, %v5402_v48 }
 0x2aa   :  { %v908_v49 = vsub.f32 %v868_v45, %v907_v46  ;;  %v914_v50 = vmul.f32 %v4428_v62, %v912_v47  ;;  %v915_v51 = vmul.f32 %v912_v47, %v854_v9  ;;  %v916_v52 = vmul.f32 %v4431_v7, %v912_v47 }
 0x2ab   :  { %v913_v53 = vmul.f32 %v912_v47, %v844_v1  ;;  %v4705_v47 = vpack.c.bf16 %v169_v39, %v168_v37 }
 0x2ac   :  { %v920_v54 = vrot.slane %v908_v49, %v5402_v48 }
 0x2ae   :  { %v922_v55 = vadd.f32 %v920_v54, %v914_v50  ;;  %v923_v56 = vadd.f32 %v920_v54, %v915_v51  ;;  %v921_v57 = vadd.f32 %v920_v54, %v913_v53  ;;  %v924_v58 = vadd.f32 %v920_v54, %v916_v52 }
 0x2b0   :  { %v926_v59 = vsub.f32 0.0, %v922_v55  ;;  %v927_v60 = vsub.f32 0.0, %v923_v56  ;;  %v925_v63 = vsub.f32 0.0, %v921_v57  ;;  %v928_v0 = vsub.f32 0.0, %v924_v58 }
 0x2b2   :  { %v931_v2 = vmul.f32 1.442695, %v926_v59  ;;  %v933_v3 = vmul.f32 1.442695, %v927_v60  ;;  %v929_v4 = vmul.f32 1.442695, %v925_v63 }
 0x2b3   :  { %v935_v5 = vmul.f32 1.442695, %v928_v0  ;;  %v174_v0 = vld [vmem:[#allocation5 + $0xc0] sm:$0xff] }
 0x2b4   :  { %4892 = vpow2.f32 %v931_v2  ;;  %v175_v2 = vld [vmem:[#allocation5 + $0xc8] sm:$0xff] }
 0x2b5   :  { %4894 = vpow2.f32 %v933_v3 }
 0x2b6   :  { %4896 = vpow2.f32 %v929_v4 }
 0x2b7   :  { %4898 = vpow2.f32 %v935_v5 }
 0x2be   :  { %v4893_v62 = vpop.eup %4892 }
 0x2bf   :  { %v4895_v1 = vpop.eup %4894  ;;  %v938_v6 = vadd.f32 1.0, %v4893_v62 }
 0x2c0   :  { %v4897_v7 = vpop.eup %4896  ;;  %v939_v8 = vadd.f32 1.0, %v4895_v1 }
 0x2c1   :  { %v4899_v9 = vpop.eup %4898  ;;  %4900 = vrcp.f32 %v938_v6  ;;  %v937_v10 = vadd.f32 1.0, %v4897_v7 }
 0x2c2   :  { %4902 = vrcp.f32 %v939_v8  ;;  %v940_v11 = vadd.f32 1.0, %v4899_v9 }
 0x2c3   :  { %4904 = vrcp.f32 %v937_v10 }
 0x2c4   :  { %4906 = vrcp.f32 %v940_v11 }
 0x2cb   :  { %v4901_v12 = vpop.eup %4900 }
 0x2cc   :  { %v4903_v13 = vpop.eup %4902  ;;  %v946_v14 = vmul.f32 %v4901_v12, %v938_v6 }
 0x2cd   :  { %v4905_v15 = vpop.eup %4904  ;;  %v947_v18 = vmul.f32 %v4903_v13, %v939_v8 }
 0x2ce   :  { %v4907_v19 = vpop.eup %4906  ;;  %v950_v20 = vsub.f32 2.0, %v946_v14  ;;  %v945_v21 = vmul.f32 %v4905_v15, %v937_v10  ;;  %v177_v14 = vld [vmem:[#allocation5 + $0xd8] sm:$0xff] }
 0x2cf   :  { %v951_v22 = vsub.f32 2.0, %v947_v18  ;;  %v948_v23 = vmul.f32 %v4907_v19, %v940_v11  ;;  %v4709_v11 = vpack.c.bf16 %v175_v2, %v174_v0 }
 0x2d0   :  { %v954_v24 = vmul.f32 %v4901_v12, %v950_v20  ;;  %v949_v25 = vsub.f32 2.0, %v945_v21  ;;  %v179_v20 = vld [vmem:[#allocation5 + $0xe8] sm:$0xff] }
 0x2d1   :  { %v955_v26 = vmul.f32 %v4903_v13, %v951_v22  ;;  %v952_v27 = vsub.f32 2.0, %v948_v23  ;;  %v176_v13 = vld [vmem:[#allocation5 + $0xd0] sm:$0xff]  ;;  %v181_v23 = vld [vmem:[#allocation5 + $0xf8] sm:$0xff] }
 0x2d2   :  { %v958_v38 = vmul.f32 %v954_v24, %v922_v55  ;;  %v953_v28 = vmul.f32 %v4905_v15, %v949_v25  ;;  %v180_v22 = vld [vmem:[#allocation5 + $0xf0] sm:$0xff]  ;;  %v1577_v25 = vld [vmem:[#allocation8 + $0x20] sm:$0xff] }
 0x2d3   :  { %v959_v29 = vmul.f32 %v955_v26, %v923_v56  ;;  %v956_v30 = vmul.f32 %v4907_v19, %v952_v27  ;;  %v178_v19 = vld [vmem:[#allocation5 + $0xe0] sm:$0xff]  ;;  %v4721_v24 = vpack.c.bf16 %v181_v23, %v180_v22  ;;  %v1578_v26 = vld [vmem:[#allocation8 + $0x28] sm:$0xff]  ;;  %v1579_v27 = vld [vmem:[#allocation8 + $0x30] sm:$0xff] }
 0x2d4   :  { %v971_v32 = vrot.slane %v958_v38, 2  ;;  %v957_v33 = vmul.f32 %v953_v28, %v921_v57  ;;  %v964_v34 = vrot.slane %v958_v38, 5  ;;  %v4717_v21 = vpack.c.bf16 %v179_v20, %v178_v19  ;;  %v1580_v28 = vld [vmem:[#allocation8 + $0x38] sm:$0xff] }
 0x2d5   :  { %v972_v35 = vrot.slane %v959_v29, 2  ;;  %v960_v36 = vmul.f32 %v956_v30, %v924_v58  ;;  %v4725_v38 = vpack.c.bf16 %v1578_v26, %v1577_v25  ;;  %v4729_v29 = vpack.c.bf16 %v1580_v28, %v1579_v27  ;;  %v1573_v30 = vld [vmem:[#allocation8] sm:$0xff] }
 0x2d6   :  { %v963_v40 = vrot.slane %v957_v33, 5 }
 0x2d7   :  { %v973_v42 = vsel %vm257_vm3, %v971_v32, %v972_v35  ;;  %v974_v43 = vrot.slane %v960_v36, 2  ;;  %4726 = vmatprep.subr.bf16.mxu0 %v4725_v38  ;;  %v1574_v32 = vld [vmem:[#allocation8 + $0x8] sm:$0xff] }
 0x2d8   :  { %v965_v44 = vsel %vm262_vm4, %v963_v40, %v964_v34  ;;  %v968_v45 = vsel %vm262_vm4, 0.0, %v963_v40  ;;  %v977_v46 = vsel %vm262_vm4, 0.0, %v973_v42  ;;  %4728 = vmatpush3.bf16.msra.mxu0 %v4725_v38  ;;  %v5542_v33 = vpack.c.bf16 %v1574_v32, %v1573_v30 }
 0x2d9   :  { %v985_v49 = vrot.slane %v968_v45, 1  ;;  %v986_v50 = vrot.slane %v965_v44, 1  ;;  %v989_v51 = vrot.slane %v977_v46, 4  ;;  %v975_v52 = vsel %vm257_vm3, %v972_v35, %v974_v43  ;;  %4730 = vmatprep.subr.bf16.mxu0 %v4729_v29 }
 0x2da   :  { %v990_v53 = vrot.slane %v975_v52, 4  ;;  %v979_v54 = vrot.slane %v977_v46, 3  ;;  %v980_v55 = vrot.slane %v975_v52, 3  ;;  %v1182_v56 = vrot.slane %v968_v45, 2 }
 0x2db   :  { %v987_v57 = vsel %vm217_vm0, %v985_v49, %v986_v50  ;;  %v993_v58 = vsel %vm184_vm1, %v986_v50, %v989_v51  ;;  %v1183_v59 = vrot.slane %v965_v44, 2  ;;  %v1186_v60 = vrot.slane %v977_v46, 5 }
 0x2dc   :  { %4440 = vmatprep.mubr.msk.f32.mxu1 %vm338_vm6, %v987_v57  ;;  %v991_v63 = vsel %vm222_vm2, %v989_v51, %v990_v53  ;;  %v983_v3 = vsel %vm184_vm1, %v965_v44, %v979_v54  ;;  %v981_v4 = vsel %vm184_vm1, %v979_v54, %v980_v55  ;;  %v1187_v5 = vrot.slane %v975_v52, 5  ;;  %4732 = vmatpush3.bf16.msra.mxu0 %v4729_v29 }
 0x2dd   :  { %4441 = vmatmul.mubr.msk.f32.vlgmr.msra.gmra.mrb[0].mxu1 %vm338_vm6, %v993_v58  ;;  %v1184_v62 = vsel %vm257_vm3, %v1182_v56, %v1183_v59  ;;  %v1190_v1 = vsel %vm184_vm1, %v1183_v59, %v1186_v60  ;;  %v1289_v6 = vrot.slane %v968_v45, 3  ;;  %v1290_v7 = vrot.slane %v965_v44, 3  ;;  %4734 = vmatprep.subr.bf16.mxu0 %v5542_v33 }
 0x2de   :  { %4704 = vmatpush3.bf16.msra.mxu1 %v5496_v61  ;;  %4443 = vmatprep.mubr.msk.f32.mxu1 %vm338_vm6, %v991_v63  ;;  %v1188_v8 = vsel %vm262_vm4, %v1186_v60, %v1187_v5  ;;  %v1293_v9 = vrot.slane %v977_v46, 6  ;;  %v1294_v10 = vrot.slane %v975_v52, 6  ;;  %v4713_v61 = vpack.c.bf16 %v177_v14, %v176_v13  ;;  %v1400_v14 = vld [vmem:[#allocation7 + $0x4] sm:$0x1] }
 0x2df   :  { %4706 = vmatprep.subr.bf16.mxu1 %v4705_v47  ;;  %v1291_v12 = vsel %vm184_vm1, %v1289_v6, %v1290_v7 }
 0x2e0   :  { %v1297_v15 = vsel %vm184_vm1, %v1290_v7, %v1293_v9  ;;  %v1295_v18 = vsel %vm301_vm5, %v1293_v9, %v1294_v10 }
 0x2e1   :  { %4444 = vmatmul.mubr.msk.f32.gmra.mrb[2].mxu1 %vm338_vm6, %v990_v53 }
 0x2e2   :  { %4708 = vmatpush3.bf16.msra.mxu1 %v4705_v47  ;;  %4454 = vmatprep.mubr.msk.f32.mxu1 %vm338_vm6, %v968_v45 }
 0x2e3   :  { %4710 = vmatprep.subr.bf16.mxu1 %v4709_v11 }
 0x2e5   :  { %4455 = vmatmul.mubr.msk.f32.vlgmr.msra.gmra.mrb[0].mxu1 %vm338_vm6, %v983_v3 }
 0x2e6   :  { %4712 = vmatpush3.bf16.msra.mxu1 %v4709_v11  ;;  %4457 = vmatprep.mubr.msk.f32.mxu1 %vm338_vm6, %v981_v4 }
 0x2e7   :  { %4714 = vmatprep.subr.bf16.mxu1 %v4713_v61 }
 0x2e9   :  { %4458 = vmatmul.mubr.msk.f32.gmra.mrb[2].mxu1 %vm338_vm6, %v980_v55 }
 0x2ea   :  { %4716 = vmatpush3.bf16.msra.mxu1 %v4713_v61  ;;  %4468 = vmatprep.mubr.msk.f32.mxu1 %vm338_vm6, %v1184_v62  ;;  %v1401_v61 = vld [vmem:[#allocation7 + $0x5] sm:$0x1] }
 0x2eb   :  { %4718 = vmatprep.subr.bf16.mxu1 %v4717_v21 }
 0x2ed   :  { %4469 = vmatmul.mubr.msk.f32.vlgmr.msra.gmra.mrb[0].mxu1 %vm338_vm6, %v1190_v1 }
 0x2ee   :  { %4720 = vmatpush3.bf16.msra.mxu1 %v4717_v21  ;;  %4471 = vmatprep.mubr.msk.f32.mxu1 %vm338_vm6, %v1188_v8 }
 0x2ef   :  { %4722 = vmatprep.subr.bf16.mxu1 %v4721_v24 }
 0x2f1   :  { %4472 = vmatmul.mubr.msk.f32.gmra.mrb[2].mxu1 %vm338_vm6, %v1187_v5 }
 0x2f2   :  { %4724 = vmatpush3.bf16.msra.mxu1 %v4721_v24  ;;  %4482 = vmatprep.mubr.msk.f32.mxu1 %vm338_vm6, %v1291_v12 }
 0x2f5   :  { %4483 = vmatmul.mubr.msk.f32.vlgmr.msra.gmra.mrb[0].mxu1 %vm338_vm6, %v1297_v15 }
 0x2f6   :  { %4485 = vmatprep.mubr.msk.f32.mxu1 %vm338_vm6, %v1295_v18 }
 0x2f9   :  { %4486 = vmatmul.mubr.msk.f32.gmra.mrb[2].mxu1 %vm338_vm6, %v1294_v10 }
 0x3c8   :  { %v4484_v34 = vpop.f32.mrb[0].mxu1 }
 0x3c9   :  { %v1397_v35 = vadd.f32 %v4484_v34, %v5407_v17  ;;  %v1373_v36 = vpop.f32.mrb[1].mxu1 }
 0x3ca   :  { %v1396_v37 = vadd.f32 %v1373_v36, %v5405_v16 }
 0x3cb   :  { %v1403_v39 = vsel %vm338_vm6, %v1397_v35, 0.0  ;;  %v1416_v40 = vmul.f32 %v1397_v35, %v1397_v35 }
 0x3cc   :  { %v1402_v42 = vsel %vm338_vm6, %v1396_v37, 0.0  ;;  %v1415_v43 = vmul.f32 %v1396_v37, %v1396_v37  ;;  %v4487_v44 = vpop.f32.mrb[2].mxu1 }
 0x3cd   :  { %v1420_v45 = vsel %vm338_vm6, %v1416_v40, 0.0  ;;  %v1404_v46 = vadd.f32 %v1403_v39, %v1402_v42  ;;  %v1399_v47 = vadd.f32 %v4487_v44, %v5425_v41  ;;  %v1383_v49 = vpop.f32.mrb[3].mxu1 }
 0x3ce   :  { %v1419_v50 = vsel %vm338_vm6, %v1415_v43, 0.0  ;;  %v1398_v17 = vadd.f32 %v1383_v49, %v5419_v31 }
 0x3cf   :  { %v1421_v51 = vadd.f32 %v1420_v45, %v1419_v50  ;;  %v1418_v52 = vmul.f32 %v1399_v47, %v1399_v47  ;;  %v1407_v55 = vsel %vm344_vm7, %v1399_v47, 0.0 }
 0x3d0   :  { %v1405_v16 = vsel %vm338_vm6, %v1398_v17, 0.0  ;;  %v1417_v53 = vmul.f32 %v1398_v17, %v1398_v17 }
 0x3d1   :  { %v1406_v54 = vadd.f32 %v1405_v16, %v1404_v46  ;;  %v1424_v59 = vsel %vm344_vm7, %v1418_v52, 0.0 }
 0x3d2   :  { %v1422_v56 = vsel %vm338_vm6, %v1417_v53, 0.0 }
 0x3d3   :  { %v1408_v57 = vadd.f32 %v1407_v55, %v1406_v54  ;;  %v1423_v58 = vadd.f32 %v1422_v56, %v1421_v51 }
 0x3d5   :  { %v1409_v41 = vrot.slane %v1408_v57, 4  ;;  %v1425_v60 = vadd.f32 %v1424_v59, %v1423_v58 }
 0x3d7   :  { %v1410_v63 = vadd.f32 %v1409_v41, %v1408_v57  ;;  %v1426_v0 = vrot.slane %v1425_v60, 4 }
 0x3d9   :  { %v1411_v2 = vrot.slane %v1410_v63, 2  ;;  %v1427_v31 = vadd.f32 %v1426_v0, %v1425_v60 }
 0x3db   :  { %v1412_v3 = vadd.f32 %v1411_v2, %v1410_v63  ;;  %v1428_v4 = vrot.slane %v1427_v31, 2 }
 0x3dd   :  { %v1413_v5 = vrot.slane %v1412_v3, 1  ;;  %v1429_v62 = vadd.f32 %v1428_v4, %v1427_v31 }
 0x3df   :  { %v1414_v1 = vadd.f32 %v1413_v5, %v1412_v3  ;;  %v1430_v6 = vrot.slane %v1429_v62, 1 }
 0x3e1   :  { %v1431_v7 = vadd.f32 %v1430_v6, %v1429_v62  ;;  %v1432_v8 = vmul.f32 0.03846154, %v1414_v1 }
 0x3e3   :  { %v1433_v9 = vmul.f32 0.03846154, %v1431_v7  ;;  %v1434_v10 = vmul.f32 %v1432_v8, %v1432_v8 }
 0x3e5   :  { %v1435_v11 = vsub.f32 %v1433_v9, %v1434_v10 }
 0x3e7   :  { %v1436_v12 = vmax.f32 %v1435_v11, 0.0 }
 0x3e9   :  { %v1437_v13 = vadd.f32 1e-05, %v1436_v12 }
 0x3eb   :  { %4908 = vrsqrt.f32 %v1437_v13 }
 0x3f5   :  { %v4909_v15 = vpop.eup %4908 }
 0x3f6   :  { %v1439_v18 = vmul.f32 %v4909_v15, %v1400_v14 }
 0x3f8   :  { %v1440_v19 = vmul.f32 %v1439_v18, %v1432_v8  ;;  %v1445_v20 = vrot.slane %v1439_v18, %v5402_v48 }
 0x3fa   :  { %v1441_v21 = vsub.f32 %v1401_v61, %v1440_v19  ;;  %v1446_v22 = vmul.f32 %v1445_v20, %v1396_v37  ;;  %v1447_v23 = vmul.f32 %v1445_v20, %v1397_v35  ;;  %v1448_v24 = vmul.f32 %v1445_v20, %v1398_v17 }
 0x3fb   :  { %v1449_v25 = vmul.f32 %v1445_v20, %v1399_v47 }
 0x3fc   :  { %v1453_v26 = vrot.slane %v1441_v21, %v5402_v48 }
 0x3fe   :  { %v1454_v27 = vadd.f32 %v1453_v26, %v1446_v22  ;;  %v1455_v38 = vadd.f32 %v1453_v26, %v1447_v23  ;;  %v1456_v28 = vadd.f32 %v1453_v26, %v1448_v24  ;;  %v1457_v29 = vadd.f32 %v1453_v26, %v1449_v25 }
 0x400   :  { %v1458_v30 = vsub.f32 0.0, %v1454_v27  ;;  %v1459_v32 = vsub.f32 0.0, %v1455_v38  ;;  %v1460_v34 = vsub.f32 0.0, %v1456_v28  ;;  %v1461_v36 = vsub.f32 0.0, %v1457_v29 }
 0x402   :  { %v1462_v39 = vmul.f32 1.442695, %v1458_v30  ;;  %v1464_v40 = vmul.f32 1.442695, %v1459_v32  ;;  %v1466_v42 = vmul.f32 1.442695, %v1460_v34 }
 0x403   :  { %v1468_v43 = vmul.f32 1.442695, %v1461_v36 }
 0x404   :  { %4910 = vpow2.f32 %v1462_v39 }
 0x405   :  { %4912 = vpow2.f32 %v1464_v40 }
 0x406   :  { %4914 = vpow2.f32 %v1466_v42 }
 0x407   :  { %4916 = vpow2.f32 %v1468_v43 }
 0x40e   :  { %v4911_v35 = vpop.eup %4910 }
 0x40f   :  { %v4913_v37 = vpop.eup %4912  ;;  %v1470_v44 = vadd.f32 1.0, %v4911_v35 }
 0x410   :  { %v4915_v45 = vpop.eup %4914  ;;  %v1471_v46 = vadd.f32 1.0, %v4913_v37 }
 0x411   :  { %v4917_v47 = vpop.eup %4916  ;;  %v1472_v49 = vadd.f32 1.0, %v4915_v45  ;;  %4918 = vrcp.f32 %v1470_v44 }
 0x412   :  { %v1473_v50 = vadd.f32 1.0, %v4917_v47  ;;  %4920 = vrcp.f32 %v1471_v46 }
 0x413   :  { %4922 = vrcp.f32 %v1472_v49 }
 0x414   :  { %4924 = vrcp.f32 %v1473_v50 }
 0x41b   :  { %v4919_v17 = vpop.eup %4918 }
 0x41c   :  { %v4921_v51 = vpop.eup %4920  ;;  %v1478_v52 = vmul.f32 %v4919_v17, %v1470_v44 }
 0x41d   :  { %v4923_v16 = vpop.eup %4922  ;;  %v1479_v53 = vmul.f32 %v4921_v51, %v1471_v46 }
 0x41e   :  { %v4925_v54 = vpop.eup %4924  ;;  %v1480_v55 = vmul.f32 %v4923_v16, %v1472_v49  ;;  %v1482_v56 = vsub.f32 2.0, %v1478_v52 }
 0x41f   :  { %v1481_v57 = vmul.f32 %v4925_v54, %v1473_v50  ;;  %v1483_v58 = vsub.f32 2.0, %v1479_v53  ;;  %v1575_v53 = vld [vmem:[#allocation8 + $0x10] sm:$0xff] }
 0x420   :  { %v1484_v59 = vsub.f32 2.0, %v1480_v55  ;;  %v1486_v41 = vmul.f32 %v4919_v17, %v1482_v56 }
 0x421   :  { %v1485_v60 = vsub.f32 2.0, %v1481_v57  ;;  %v1487_v63 = vmul.f32 %v4921_v51, %v1483_v58 }
 0x422   :  { %v1488_v0 = vmul.f32 %v4923_v16, %v1484_v59  ;;  %v1490_v2 = vmul.f32 %v1486_v41, %v1454_v27 }
 0x423   :  { %v1489_v31 = vmul.f32 %v4925_v54, %v1485_v60  ;;  %v1491_v3 = vmul.f32 %v1487_v63, %v1455_v38  ;;  %v1576_v54 = vld [vmem:[#allocation8 + $0x18] sm:$0xff] }
 0x424   :  { %v1492_v4 = vmul.f32 %v1488_v0, %v1456_v28  ;;  %v1496_v5 = vrot.slane %v1490_v2, 5  ;;  %v4737_v63 = vpack.c.bf16 %v1576_v54, %v1575_v53  ;;  %v1951_v53 = vld [vmem:[#allocation11 + $0x1] sm:$0x1] }
 0x425   :  { %v1493_v62 = vmul.f32 %v1489_v31, %v1457_v29  ;;  %v1497_v1 = vrot.slane %v1491_v3, 5  ;;  %v1504_v6 = vrot.slane %v1491_v3, 2 }
 0x426   :  { %v1501_v7 = vsel %vm262_vm4, 0.0, %v1496_v5  ;;  %v1505_v8 = vrot.slane %v1492_v4, 2  ;;  %v1581_v4 = vld [vmem:[#allocation8 + $0x40] sm:$0xff] }
 0x427   :  { %v1507_v9 = vrot.slane %v1493_v62, 2  ;;  %v1513_v10 = vrot.slane %v1501_v7, 1  ;;  %v1498_v11 = vsel %vm262_vm4, %v1496_v5, %v1497_v1  ;;  %v1582_v5 = vld [vmem:[#allocation8 + $0x48] sm:$0xff]  ;;  %v1583_v1 = vld [vmem:[#allocation8 + $0x50] sm:$0xff] }
 0x428   :  { %v1506_v12 = vsel %vm257_vm3, %v1504_v6, %v1505_v8  ;;  %v1516_v13 = vrot.slane %v1498_v11, 1  ;;  %v4741_v62 = vpack.c.bf16 %v1582_v5, %v1581_v4  ;;  %v1584_v6 = vld [vmem:[#allocation8 + $0x58] sm:$0xff] }
 0x429   :  { %v1508_v14 = vsel %vm257_vm3, %v1505_v8, %v1507_v9  ;;  %v1511_v15 = vsel %vm262_vm4, 0.0, %v1506_v12  ;;  %v1515_v18 = vmax.f32 %v1501_v7, %v1513_v10  ;;  %v4745_v7 = vpack.c.bf16 %v1584_v6, %v1583_v1  ;;  %v1585_v8 = vld [vmem:[#allocation8 + $0x60] sm:$0xff]  ;;  %v1586_v9 = vld [vmem:[#allocation8 + $0x68] sm:$0xff] }
 0x42a   :  { %v1544_v61 = vrot.slane %v1511_v15, 1  ;;  %v1547_v19 = vrot.slane %v1508_v14, 1  ;;  %v1518_v20 = vmax.f32 %v1498_v11, %v1516_v13  ;;  %v4749_v10 = vpack.c.bf16 %v1586_v9, %v1585_v8  ;;  %v1587_v11 = vld [vmem:[#allocation8 + $0x70] sm:$0xff] }
 0x42b   :  { %v1520_v21 = vrot.slane %v1515_v18, 1  ;;  %v1522_v22 = vrot.slane %v1515_v18, 2  ;;  %v1524_v38 = vrot.slane %v1515_v18, 3  ;;  %v1591_v13 = vld [vmem:[#allocation10 + $0x10] sm:$0xff] }
 0x42c   :  { %v1546_v23 = vmax.f32 %v1511_v15, %v1544_v61  ;;  %v1549_v24 = vmax.f32 %v1508_v14, %v1547_v19  ;;  %v1527_v28 = vrot.slane %v1518_v20, 4  ;;  %v1529_v34 = vrot.slane %v1518_v20, 5  ;;  %v1592_v14 = vld [vmem:[#allocation10 + $0x18] sm:$0xff]  ;;  %v1590_v61 = vld [vmem:[#allocation10 + $0x8] sm:$0xff] }
 0x42d   :  { %v1536_v25 = vsel %vm1535_vm8, %v1515_v18, %v1520_v21  ;;  %v1531_v40 = vrot.slane %v1518_v20, 6  ;;  %v1533_v35 = vrot.slane %v1518_v20, 7  ;;  %v4757_v15 = vpack.c.bf16 %v1592_v14, %v1591_v13  ;;  %v1589_v18 = vld [vmem:[#allocation10] sm:$0xff] }
 0x42e   :  { %v1551_v26 = vrot.slane %v1546_v23, 1  ;;  %v1553_v27 = vrot.slane %v1546_v23, 2  ;;  %v1537_v29 = vsel %vm301_vm5, %v1536_v25, %v1522_v22  ;;  %v1555_v30 = vrot.slane %v1546_v23, 3 }
 0x42f   :  { %v1538_v36 = vsel %vm262_vm4, %v1537_v29, %v1524_v38  ;;  %v1558_v39 = vrot.slane %v1549_v24, 4  ;;  %v1560_v44 = vrot.slane %v1549_v24, 5  ;;  %v1562_v47 = vrot.slane %v1549_v24, 6  ;;  %4758 = vmatprep.subr.bf16.mxu1 %v4757_v15 }
 0x430   :  { %v1566_v32 = vsel %vm1535_vm8, %v1546_v23, %v1551_v26  ;;  %v1539_v42 = vsel %vm222_vm2, %v1538_v36, %v1527_v28  ;;  %v1564_v17 = vrot.slane %v1549_v24, 7  ;;  %4760 = vmatpush3.bf16.msra.mxu1 %v4757_v15  ;;  %v5591_v19 = vpack.c.bf16 %v1590_v61, %v1589_v18 }
 0x431   :  { %v1567_v43 = vsel %vm301_vm5, %v1566_v32, %v1553_v27  ;;  %v1540_v37 = vsel %vm184_vm1, %v1539_v42, %v1529_v34 }
 0x432   :  { %v1568_v45 = vsel %vm262_vm4, %v1567_v43, %v1555_v30  ;;  %v1541_v46 = vsel %vm257_vm3, %v1540_v37, %v1531_v40  ;;  %4762 = vmatprep.subr.bf16.mxu1 %v5591_v19 }
 0x433   :  { %v1569_v49 = vsel %vm222_vm2, %v1568_v45, %v1558_v39  ;;  %v1542_v50 = vsel %vm217_vm0, %v1541_v46, %v1533_v35 }
 0x434   :  { %v1570_v51 = vsel %vm184_vm1, %v1569_v49, %v1560_v44  ;;  %v1611_v16 = vrot.slane %v1542_v50, 1  ;;  %v1776_v55 = vrot.slane %v1542_v50, 2  ;;  %v1863_v56 = vrot.slane %v1542_v50, 3 }
 0x435   :  { %v1571_v52 = vsel %vm257_vm3, %v1570_v51, %v1562_v47  ;;  %v1950_v51 = vld [vmem:[#allocation11] sm:$0x1] }
 0x436   :  { %v1572_v57 = vsel %vm217_vm0, %v1571_v52, %v1564_v17 }
 0x437   :  { %v1613_v58 = vrot.slane %v1572_v57, 4  ;;  %v1607_v59 = vrot.slane %v1572_v57, 3  ;;  %v1778_v41 = vrot.slane %v1572_v57, 5  ;;  %v1865_v60 = vrot.slane %v1572_v57, 6 }
 0x439   :  { %v1615_v0 = vsel %vm184_vm1, %v1611_v16, %v1613_v58  ;;  %v1609_v2 = vsel %vm184_vm1, %v1542_v50, %v1607_v59  ;;  %v1780_v31 = vsel %vm184_vm1, %v1776_v55, %v1778_v41  ;;  %v1867_v3 = vsel %vm184_vm1, %v1863_v56, %v1865_v60 }
 0x43a   :  { %4496 = vmatprep.mubr.msk.f32.mxu0 %vm338_vm6, %v1615_v0 }
 0x43b   :  { %4497 = vmatmul.mubr.msk.f32.vlgmr.msra.gmra.mrb[4].mxu0 %vm338_vm6, %v1613_v58 }
 0x43c   :  { %4736 = vmatpush3.bf16.msra.mxu0 %v5542_v33  ;;  %4507 = vmatprep.mubr.msk.f32.mxu0 %vm338_vm6, %v1609_v2  ;;  %v1588_v33 = vld [vmem:[#allocation8 + $0x78] sm:$0xff] }
 0x43d   :  { %4738 = vmatprep.subr.bf16.mxu0 %v4737_v63  ;;  %v4753_v12 = vpack.c.bf16 %v1588_v33, %v1587_v11 }
 0x440   :  { %4740 = vmatpush3.bf16.msra.mxu0 %v4737_v63 }
 0x441   :  { %4742 = vmatprep.subr.bf16.mxu0 %v4741_v62 }
 0x443   :  { %4508 = vmatmul.mubr.msk.f32.vlgmr.msra.gmra.mrb[4].mxu0 %vm338_vm6, %v1607_v59 }
 0x444   :  { %4744 = vmatpush3.bf16.msra.mxu0 %v4741_v62  ;;  %4518 = vmatprep.mubr.msk.f32.mxu0 %vm338_vm6, %v1780_v31 }
 0x445   :  { %4746 = vmatprep.subr.bf16.mxu0 %v4745_v7 }
 0x448   :  { %4748 = vmatpush3.bf16.msra.mxu0 %v4745_v7 }
 0x449   :  { %4750 = vmatprep.subr.bf16.mxu0 %v4749_v10 }
 0x44b   :  { %4519 = vmatmul.mubr.msk.f32.vlgmr.msra.gmra.mrb[4].mxu0 %vm338_vm6, %v1778_v41 }
 0x44c   :  { %4752 = vmatpush3.bf16.msra.mxu0 %v4749_v10  ;;  %4529 = vmatprep.mubr.msk.f32.mxu0 %vm338_vm6, %v1867_v3 }
 0x44d   :  { %4754 = vmatprep.subr.bf16.mxu0 %v4753_v12 }
 0x450   :  { %4756 = vmatpush3.bf16.msra.mxu0 %v4753_v12 }
 0x453   :  { %4530 = vmatmul.mubr.msk.f32.vlgmr.msra.gmra.mrb[4].mxu0 %vm338_vm6, %v1865_v60 }
 0x526   :  { %v5594_v20 = vpop.f32.mrb[4].mxu0 }
 0x527   :  { %v1955_v21 = vsel %vm1954_vm9, %v5594_v20, 0.0  ;;  %v1964_v22 = vmul.f32 %v5594_v20, %v5594_v20  ;;  %v5600_v23 = vpop.f32.mrb[5].mxu0 }
 0x528   :  { %v1953_v24 = vsel %vm1952_vm10, %v5600_v23, 0.0  ;;  %v1963_v25 = vmul.f32 %v5600_v23, %v5600_v23 }
 0x529   :  { %v1966_v26 = vsel %vm1954_vm9, %v1964_v22, 0.0  ;;  %v1956_v27 = vadd.f32 %v1955_v21, %v1953_v24  ;;  %v1593_v24 = vld [vmem:[#allocation10 + $0x20] sm:$0xff] }
 0x52a   :  { %v1965_v38 = vsel %vm1952_vm10, %v1963_v25, 0.0  ;;  %v1594_v25 = vld [vmem:[#allocation10 + $0x28] sm:$0xff] }
 0x52b   :  { %v1957_v28 = vrot.slane %v1956_v27, 4  ;;  %v1967_v29 = vadd.f32 %v1966_v26, %v1965_v38 }
 0x52d   :  { %v1958_v30 = vadd.f32 %v1957_v28, %v1956_v27  ;;  %v1968_v32 = vrot.slane %v1967_v29, 4 }
 0x52f   :  { %v1959_v34 = vrot.slane %v1958_v30, 2  ;;  %v1969_v36 = vadd.f32 %v1968_v32, %v1967_v29 }
 0x531   :  { %v1960_v39 = vadd.f32 %v1959_v34, %v1958_v30  ;;  %v1970_v40 = vrot.slane %v1969_v36, 2  ;;  %v4765_v34 = vpack.c.bf16 %v1594_v25, %v1593_v24 }
 0x533   :  { %v1961_v42 = vrot.slane %v1960_v39, 1  ;;  %v1971_v43 = vadd.f32 %v1970_v40, %v1969_v36 }
 0x535   :  { %v1962_v35 = vadd.f32 %v1961_v42, %v1960_v39  ;;  %v1972_v37 = vrot.slane %v1971_v43, 1 }
 0x537   :  { %v1973_v44 = vadd.f32 %v1972_v37, %v1971_v43  ;;  %v1974_v45 = vmul.f32 0.1, %v1962_v35  ;;  %v1595_v43 = vld [vmem:[#allocation10 + $0x30] sm:$0xff]  ;;  %v1596_v35 = vld [vmem:[#allocation10 + $0x38] sm:$0xff] }
 0x538   :  { %v4769_v37 = vpack.c.bf16 %v1596_v35, %v1595_v43 }
 0x539   :  { %v1975_v46 = vmul.f32 0.1, %v1973_v44  ;;  %v1976_v47 = vmul.f32 %v1974_v45, %v1974_v45  ;;  %v1601_v44 = vld [vmem:[#allocation10 + $0x58] sm:$0xff] }
 0x53b   :  { %v1977_v49 = vsub.f32 %v1975_v46, %v1976_v47  ;;  %v1598_v46 = vld [vmem:[#allocation10 + $0x40] sm:$0xff]  ;;  %v1599_v47 = vld [vmem:[#allocation10 + $0x48] sm:$0xff] }
 0x53d   :  { %v1978_v50 = vmax.f32 %v1977_v49, 0.0  ;;  %v5628_v49 = vpack.c.bf16 %v1599_v47, %v1598_v46 }
 0x53f   :  { %v1979_v17 = vadd.f32 1e-05, %v1978_v50 }
 0x541   :  { %4926 = vrsqrt.f32 %v1979_v17 }
 0x54b   :  { %v4927_v52 = vpop.eup %4926 }
 0x54c   :  { %v1981_v16 = vmul.f32 %v4927_v52, %v1950_v51 }
 0x54e   :  { %v1982_v54 = vmul.f32 %v1981_v16, %v1974_v45  ;;  %v1987_v55 = vrot.slane %v1981_v16, %v5402_v48 }
 0x550   :  { %v1983_v56 = vsub.f32 %v1951_v53, %v1982_v54  ;;  %v1988_v57 = vmul.f32 %v1987_v55, %v5600_v23  ;;  %v1989_v58 = vmul.f32 %v5594_v20, %v1987_v55 }
 0x552   :  { %v1993_v59 = vrot.slane %v1983_v56, %v5402_v48 }
 0x554   :  { %v1994_v41 = vadd.f32 %v1993_v59, %v1988_v57  ;;  %v1995_v60 = vadd.f32 %v1993_v59, %v1989_v58 }
 0x556   :  { %v1996_v63 = vsub.f32 0.0, %v1994_v41  ;;  %v1997_v0 = vsub.f32 0.0, %v1995_v60 }
 0x558   :  { %v1998_v2 = vmul.f32 1.442695, %v1996_v63  ;;  %v2000_v31 = vmul.f32 1.442695, %v1997_v0 }
 0x55a   :  { %4928 = vpow2.f32 %v1998_v2 }
 0x55b   :  { %4930 = vpow2.f32 %v2000_v31 }
 0x564   :  { %v4929_v3 = vpop.eup %4928 }
 0x565   :  { %v4931_v4 = vpop.eup %4930  ;;  %v2002_v5 = vadd.f32 1.0, %v4929_v3 }
 0x566   :  { %v2003_v62 = vadd.f32 1.0, %v4931_v4 }
 0x567   :  { %4932 = vrcp.f32 %v2002_v5 }
 0x568   :  { %4934 = vrcp.f32 %v2003_v62 }
 0x571   :  { %v4933_v1 = vpop.eup %4932 }
 0x572   :  { %v4935_v6 = vpop.eup %4934  ;;  %v2006_v7 = vmul.f32 %v4933_v1, %v2002_v5 }
 0x573   :  { %v2007_v8 = vmul.f32 %v4935_v6, %v2003_v62 }
 0x574   :  { %v2008_v9 = vsub.f32 2.0, %v2006_v7 }
 0x575   :  { %v2009_v10 = vsub.f32 2.0, %v2007_v8 }
 0x576   :  { %v2010_v11 = vmul.f32 %v4933_v1, %v2008_v9 }
 0x577   :  { %v2011_v33 = vmul.f32 %v4935_v6, %v2009_v10 }
 0x578   :  { %v2012_v12 = vmul.f32 %v2010_v11, %v1994_v41  ;;  %v2368_v11 = vld [vmem:[#allocation11 + $0x2] sm:$0x1] }
 0x579   :  { %v2013_v13 = vmul.f32 %v2011_v33, %v1995_v60 }
 0x57a   :  { %v2015_v14 = vrot.slane %v2012_v12, 5  ;;  %v2019_v15 = vrot.slane %v2012_v12, 2 }
 0x57b   :  { %v2020_v18 = vrot.slane %v2013_v13, 2  ;;  %v2369_v13 = vld [vmem:[#allocation11 + $0x3] sm:$0x1] }
 0x57c   :  { %v2017_v61 = vsel %vm262_vm4, 0.0, %v2015_v14 }
 0x57d   :  { %v2021_v21 = vsel %vm257_vm3, %v2019_v15, %v2020_v18  ;;  %v2029_v22 = vrot.slane %v2017_v61, 1  ;;  %v2194_v26 = vrot.slane %v2017_v61, 2  ;;  %v2281_v27 = vrot.slane %v2017_v61, 3 }
 0x57e   :  { %v2023_v38 = vsel %vm262_vm4, 0.0, %v2021_v21 }
 0x57f   :  { %v2031_v28 = vrot.slane %v2023_v38, 4  ;;  %v2025_v29 = vrot.slane %v2023_v38, 3  ;;  %v2196_v30 = vrot.slane %v2023_v38, 5  ;;  %v2283_v32 = vrot.slane %v2023_v38, 6 }
 0x581   :  { %v2033_v36 = vsel %vm184_vm1, %v2029_v22, %v2031_v28  ;;  %v2027_v39 = vsel %vm184_vm1, %v2017_v61, %v2025_v29  ;;  %v2198_v40 = vsel %vm184_vm1, %v2194_v26, %v2196_v30  ;;  %v2285_v42 = vsel %vm184_vm1, %v2281_v27, %v2283_v32 }
 0x582   :  { %4536 = vmatprep.mubr.msk.f32.mxu1 %vm1952_vm10, %v2033_v36 }
 0x583   :  { %4537 = vmatmul.mubr.msk.f32.vlgmr.msra.gmra.mrb[4].mxu1 %vm1952_vm10, %v2031_v28 }
 0x584   :  { %4764 = vmatpush3.bf16.msra.mxu1 %v5591_v19  ;;  %4543 = vmatprep.mubr.msk.f32.mxu1 %vm1952_vm10, %v2027_v39  ;;  %v1600_v19 = vld [vmem:[#allocation10 + $0x50] sm:$0xff] }
 0x585   :  { %4766 = vmatprep.subr.bf16.mxu1 %v4765_v34  ;;  %v4773_v45 = vpack.c.bf16 %v1601_v44, %v1600_v19 }
 0x58b   :  { %4544 = vmatmul.mubr.msk.f32.vlgmr.msra.gmra.mrb[4].mxu1 %vm1952_vm10, %v2025_v29 }
 0x58c   :  { %4768 = vmatpush3.bf16.msra.mxu1 %v4765_v34  ;;  %4550 = vmatprep.mubr.msk.f32.mxu1 %vm1952_vm10, %v2198_v40 }
 0x58d   :  { %4770 = vmatprep.subr.bf16.mxu1 %v4769_v37 }
 0x593   :  { %4551 = vmatmul.mubr.msk.f32.vlgmr.msra.gmra.mrb[4].mxu1 %vm1952_vm10, %v2196_v30 }
 0x594   :  { %4772 = vmatpush3.bf16.msra.mxu1 %v4769_v37  ;;  %4557 = vmatprep.mubr.msk.f32.mxu1 %vm1952_vm10, %v2285_v42 }
 0x595   :  { %4774 = vmatprep.subr.bf16.mxu1 %v4773_v45 }
 0x59b   :  { %4558 = vmatmul.mubr.msk.f32.vlgmr.msra.gmra.mrb[4].mxu1 %vm1952_vm10, %v2283_v32 }
 0x59c   :  { %4776 = vmatpush3.bf16.msra.mxu1 %v4773_v45 }
 0x59d   :  { %4778 = vmatprep.subr.bf16.mxu1 %v5628_v49 }
 0x66e   :  { %v4559_v50 = vpop.f32.mrb[4].mxu1 }
 0x66f   :  { %v2371_v17 = vsel %vm1954_vm9, %v4559_v50, 0.0  ;;  %v2380_v51 = vmul.f32 %v4559_v50, %v4559_v50  ;;  %v2357_v52 = vpop.f32.mrb[5].mxu1 }
 0x670   :  { %v2370_v16 = vsel %vm1952_vm10, %v2357_v52, 0.0  ;;  %v2379_v53 = vmul.f32 %v2357_v52, %v2357_v52 }
 0x671   :  { %v2382_v54 = vsel %vm1954_vm9, %v2380_v51, 0.0  ;;  %v2372_v55 = vadd.f32 %v2371_v17, %v2370_v16  ;;  %v1602_v16 = vld [vmem:[#allocation10 + $0x60] sm:$0xff] }
 0x672   :  { %v2381_v56 = vsel %vm1952_vm10, %v2379_v53, 0.0  ;;  %v1603_v53 = vld [vmem:[#allocation10 + $0x68] sm:$0xff] }
 0x673   :  { %v2373_v57 = vrot.slane %v2372_v55, 4  ;;  %v2383_v58 = vadd.f32 %v2382_v54, %v2381_v56 }
 0x675   :  { %v2374_v59 = vadd.f32 %v2373_v57, %v2372_v55  ;;  %v2384_v41 = vrot.slane %v2383_v58, 4 }
 0x677   :  { %v2375_v60 = vrot.slane %v2374_v59, 2  ;;  %v2385_v63 = vadd.f32 %v2384_v41, %v2383_v58 }
 0x679   :  { %v2376_v0 = vadd.f32 %v2375_v60, %v2374_v59  ;;  %v2386_v2 = vrot.slane %v2385_v63, 2  ;;  %v4781_v60 = vpack.c.bf16 %v1603_v53, %v1602_v16 }
 0x67b   :  { %v2377_v31 = vrot.slane %v2376_v0, 1  ;;  %v2387_v3 = vadd.f32 %v2386_v2, %v2385_v63 }
 0x67d   :  { %v2378_v4 = vadd.f32 %v2377_v31, %v2376_v0  ;;  %v2388_v5 = vrot.slane %v2387_v3, 1 }
 0x67f   :  { %v2389_v62 = vadd.f32 %v2388_v5, %v2387_v3  ;;  %v2390_v1 = vmul.f32 0.1, %v2378_v4  ;;  %v1604_v3 = vld [vmem:[#allocation10 + $0x70] sm:$0xff]  ;;  %v1605_v4 = vld [vmem:[#allocation10 + $0x78] sm:$0xff] }
 0x680   :  { %v4785_v5 = vpack.c.bf16 %v1605_v4, %v1604_v3 }
 0x681   :  { %v2391_v6 = vmul.f32 0.1, %v2389_v62  ;;  %v2392_v7 = vmul.f32 %v2390_v1, %v2390_v1  ;;  %v2889_v62 = vld [vmem:[#allocation13 + $0x18] sm:$0xff] }
 0x683   :  { %v2393_v8 = vsub.f32 %v2391_v6, %v2392_v7  ;;  %v5201_v7 = vmov 0.0  }
 0x684   :  { %4592 = vmatprep.mubr.msk.f32.mxu0 %vm5200_vm11, %v5201_v7 }
 0x685   :  { %v2394_v9 = vmax.f32 %v2393_v8, 0.0 }
 0x687   :  { %v2395_v10 = vadd.f32 1e-05, %v2394_v9 }
 0x689   :  { %4936 = vrsqrt.f32 %v2395_v10 }
 0x693   :  { %v4937_v33 = vpop.eup %4936 }
 0x694   :  { %v2397_v12 = vmul.f32 %v4937_v33, %v2368_v11 }
 0x696   :  { %v2398_v14 = vmul.f32 %v2397_v12, %v2390_v1  ;;  %v2403_v15 = vrot.slane %v2397_v12, %v5402_v48  ;;  %v5199_v1 = vmov 0.0|0.0  }
 0x697   :  { %4789 = vmatprep.subr.bf16.mxu0 %v5199_v1 }
 0x698   :  { %v2399_v18 = vsub.f32 %v2369_v13, %v2398_v14  ;;  %v2404_v61 = vmul.f32 %v2403_v15, %v2357_v52  ;;  %v2405_v21 = vmul.f32 %v4559_v50, %v2403_v15 }
 0x69a   :  { %v2409_v22 = vrot.slane %v2399_v18, %v5402_v48 }
 0x69c   :  { %v2410_v24 = vadd.f32 %v2409_v22, %v2404_v61  ;;  %v2411_v25 = vadd.f32 %v2409_v22, %v2405_v21 }
 0x69e   :  { %v2412_v26 = vsub.f32 0.0, %v2410_v24  ;;  %v2413_v27 = vsub.f32 0.0, %v2411_v25 }
 0x6a0   :  { %v2414_v38 = vmul.f32 1.442695, %v2412_v26  ;;  %v2416_v28 = vmul.f32 1.442695, %v2413_v27 }
 0x6a2   :  { %4938 = vpow2.f32 %v2414_v38 }
 0x6a3   :  { %4940 = vpow2.f32 %v2416_v28 }
 0x6ac   :  { %v4939_v29 = vpop.eup %4938 }
 0x6ad   :  { %v4941_v30 = vpop.eup %4940  ;;  %v2418_v32 = vadd.f32 1.0, %v4939_v29 }
 0x6ae   :  { %v2419_v34 = vadd.f32 1.0, %v4941_v30 }
 0x6af   :  { %4942 = vrcp.f32 %v2418_v32 }
 0x6b0   :  { %4944 = vrcp.f32 %v2419_v34 }
 0x6b9   :  { %v4943_v36 = vpop.eup %4942 }
 0x6ba   :  { %v4945_v39 = vpop.eup %4944  ;;  %v2422_v40 = vmul.f32 %v4943_v36, %v2418_v32 }
 0x6bb   :  { %v2423_v42 = vmul.f32 %v4945_v39, %v2419_v34 }
 0x6bc   :  { %v2424_v43 = vsub.f32 2.0, %v2422_v40 }
 0x6bd   :  { %v2425_v35 = vsub.f32 2.0, %v2423_v42 }
 0x6be   :  { %v2426_v37 = vmul.f32 %v4943_v36, %v2424_v43 }
 0x6bf   :  { %v2427_v19 = vmul.f32 %v4945_v39, %v2425_v35  ;;  %v2786_v35 = vld [vmem:[#allocation11 + $0x4] sm:$0x1] }
 0x6c0   :  { %v2428_v44 = vmul.f32 %v2426_v37, %v2410_v24 }
 0x6c1   :  { %v2429_v45 = vmul.f32 %v2427_v19, %v2411_v25 }
 0x6c2   :  { %v2431_v46 = vrot.slane %v2428_v44, 5  ;;  %v2435_v47 = vrot.slane %v2428_v44, 2  ;;  %v2787_v44 = vld [vmem:[#allocation11 + $0x5] sm:$0x1] }
 0x6c3   :  { %v2436_v50 = vrot.slane %v2429_v45, 2 }
 0x6c4   :  { %v2433_v17 = vsel %vm262_vm4, 0.0, %v2431_v46 }
 0x6c5   :  { %v2437_v51 = vsel %vm257_vm3, %v2435_v47, %v2436_v50  ;;  %v2445_v52 = vrot.slane %v2433_v17, 1  ;;  %v2610_v54 = vrot.slane %v2433_v17, 2  ;;  %v2697_v55 = vrot.slane %v2433_v17, 3 }
 0x6c6   :  { %v2439_v56 = vsel %vm262_vm4, 0.0, %v2437_v51 }
 0x6c7   :  { %v2447_v57 = vrot.slane %v2439_v56, 4  ;;  %v2441_v58 = vrot.slane %v2439_v56, 3  ;;  %v2612_v59 = vrot.slane %v2439_v56, 5  ;;  %v2699_v41 = vrot.slane %v2439_v56, 6 }
 0x6c9   :  { %v2449_v63 = vsel %vm184_vm1, %v2445_v52, %v2447_v57  ;;  %v2443_v0 = vsel %vm184_vm1, %v2433_v17, %v2441_v58  ;;  %v2614_v2 = vsel %vm184_vm1, %v2610_v54, %v2612_v59  ;;  %v2701_v31 = vsel %vm184_vm1, %v2697_v55, %v2699_v41 }
 0x6ca   :  { %4564 = vmatprep.mubr.msk.f32.mxu1 %vm1952_vm10, %v2449_v63 }
 0x6cb   :  { %4565 = vmatmul.mubr.msk.f32.vlgmr.msra.gmra.mrb[6].mxu1 %vm1952_vm10, %v2447_v57 }
 0x6cc   :  { %4780 = vmatpush3.bf16.msra.mxu1 %v5628_v49  ;;  %4571 = vmatprep.mubr.msk.f32.mxu1 %vm1952_vm10, %v2443_v0  ;;  %v2888_v49 = vld [vmem:[#allocation13 + $0x10] sm:$0xff] }
 0x6cd   :  { %4782 = vmatprep.subr.bf16.mxu1 %v4781_v60  ;;  %v4790_v6 = vpack.c.bf16 %v2889_v62, %v2888_v49 }
 0x6cf   :  { %4791 = vmatpush3.bf16.msra.mxu0 %v4790_v6 }
 0x6d0   :  { %4792 = vmatprep.subr.bf16.mxu0 %v5199_v1 }
 0x6d3   :  { %4572 = vmatmul.mubr.msk.f32.vlgmr.msra.gmra.mrb[6].mxu1 %vm1952_vm10, %v2441_v58 }
 0x6d4   :  { %4784 = vmatpush3.bf16.msra.mxu1 %v4781_v60  ;;  %4578 = vmatprep.mubr.msk.f32.mxu1 %vm1952_vm10, %v2614_v2 }
 0x6d5   :  { %4786 = vmatprep.subr.bf16.mxu1 %v4785_v5 }
 0x6db   :  { %4579 = vmatmul.mubr.msk.f32.vlgmr.msra.gmra.mrb[6].mxu1 %vm1952_vm10, %v2612_v59 }
 0x6dc   :  { %4788 = vmatpush3.bf16.msra.mxu1 %v4785_v5  ;;  %4585 = vmatprep.mubr.msk.f32.mxu1 %vm1952_vm10, %v2701_v31 }
 0x6dd   :  { %4616 = vmatprep.subr.mxu1 %v5201_v7 }
 0x6e3   :  { %4586 = vmatmul.mubr.msk.f32.vlgmr.msra.gmra.mrb[6].mxu1 %vm1952_vm10, %v2699_v41 }
 0x6e4   :  { %4618 = vmatprep.mubr.msk.f32.mxu1 %vm5200_vm11, %v5201_v7 }
 0x7b6   :  { %v4587_v8 = vpop.f32.mrb[6].mxu1 }
 0x7b7   :  { %v2785_v9 = vadd.f32 %v4587_v8, %v5594_v20  ;;  %v2773_v10 = vpop.f32.mrb[7].mxu1 }
 0x7b8   :  { %v2784_v11 = vadd.f32 %v2773_v10, %v5600_v23 }
 0x7b9   :  { %v2789_v33 = vsel %vm1954_vm9, %v2785_v9, 0.0  ;;  %v2798_v12 = vmul.f32 %v2785_v9, %v2785_v9 }
 0x7ba   :  { %v2788_v13 = vsel %vm1952_vm10, %v2784_v11, 0.0  ;;  %v2797_v14 = vmul.f32 %v2784_v11, %v2784_v11 }
 0x7bb   :  { %v2800_v15 = vsel %vm1954_vm9, %v2798_v12, 0.0  ;;  %v2790_v18 = vadd.f32 %v2789_v33, %v2788_v13 }
 0x7bc   :  { %v2799_v61 = vsel %vm1952_vm10, %v2797_v14, 0.0 }
 0x7bd   :  { %v2791_v21 = vrot.slane %v2790_v18, 4  ;;  %v2801_v22 = vadd.f32 %v2800_v15, %v2799_v61 }
 0x7bf   :  { %v2792_v24 = vadd.f32 %v2791_v21, %v2790_v18  ;;  %v2802_v25 = vrot.slane %v2801_v22, 4  ;;  %v2886_v21 = vld [vmem:[#allocation13] sm:$0xff] }
 0x7c1   :  { %v2793_v26 = vrot.slane %v2792_v24, 2  ;;  %v2803_v20 = vadd.f32 %v2802_v25, %v2801_v22  ;;  %v2887_v22 = vld [vmem:[#allocation13 + $0x8] sm:$0xff] }
 0x7c3   :  { %v2794_v27 = vadd.f32 %v2793_v26, %v2792_v24  ;;  %v2804_v38 = vrot.slane %v2803_v20, 2 }
 0x7c5   :  { %v2795_v23 = vrot.slane %v2794_v27, 1  ;;  %v2805_v28 = vadd.f32 %v2804_v38, %v2803_v20 }
 0x7c7   :  { %v2796_v29 = vadd.f32 %v2795_v23, %v2794_v27  ;;  %v2806_v30 = vrot.slane %v2805_v28, 1 }
 0x7c9   :  { %v2807_v32 = vadd.f32 %v2806_v30, %v2805_v28  ;;  %v2808_v34 = vmul.f32 0.1, %v2796_v29  ;;  %v4793_v29 = vpack.c.bf16 %v2887_v22, %v2886_v21 }
 0x7cb   :  { %v2809_v36 = vmul.f32 0.1, %v2807_v32  ;;  %v2810_v39 = vmul.f32 %v2808_v34, %v2808_v34 }
 0x7cd   :  { %v2811_v40 = vsub.f32 %v2809_v36, %v2810_v39 }
 0x7cf   :  { %v2812_v42 = vmax.f32 %v2811_v40, 0.0 }
 0x7d1   :  { %v2813_v43 = vadd.f32 1e-05, %v2812_v42 }
 0x7d3   :  { %4946 = vrsqrt.f32 %v2813_v43 }
 0x7dd   :  { %v4947_v37 = vpop.eup %4946 }
 0x7de   :  { %v2815_v19 = vmul.f32 %v4947_v37, %v2786_v35 }
 0x7e0   :  { %v2816_v45 = vmul.f32 %v2815_v19, %v2808_v34  ;;  %v2821_v46 = vrot.slane %v2815_v19, %v5402_v48 }
 0x7e2   :  { %v2817_v47 = vsub.f32 %v2787_v44, %v2816_v45  ;;  %v2822_v50 = vmul.f32 %v2821_v46, %v2784_v11  ;;  %v2823_v17 = vmul.f32 %v2821_v46, %v2785_v9  ;;  %v2890_v45 = vld [vmem:[#allocation13 + $0x20] sm:$0xff]  ;;  %v2891_v46 = vld [vmem:[#allocation13 + $0x28] sm:$0xff] }
 0x7e4   :  { %v2827_v51 = vrot.slane %v2817_v47, %v5402_v48  ;;  %v4796_v47 = vpack.c.bf16 %v2891_v46, %v2890_v45 }
 0x7e6   :  { %v2828_v52 = vadd.f32 %v2827_v51, %v2822_v50  ;;  %v2829_v16 = vadd.f32 %v2827_v51, %v2823_v17  ;;  %v2892_v50 = vld [vmem:[#allocation13 + $0x30] sm:$0xff]  ;;  %v2893_v17 = vld [vmem:[#allocation13 + $0x38] sm:$0xff] }
 0x7e7   :  { %v4799_v51 = vpack.c.bf16 %v2893_v17, %v2892_v50  ;;  %v4209_v17 = vld [vmem:[%s5817_s8 + $0x28] sm:$0xff] }
 0x7e8   :  { %v2830_v53 = vsub.f32 0.0, %v2828_v52  ;;  %v2831_v54 = vsub.f32 0.0, %v2829_v16 }
 0x7ea   :  { %v2832_v55 = vmul.f32 1.442695, %v2830_v53  ;;  %v2834_v56 = vmul.f32 1.442695, %v2831_v54 }
 0x7ec   :  { %4948 = vpow2.f32 %v2832_v55 }
 0x7ed   :  { %4950 = vpow2.f32 %v2834_v56 }
 0x7f6   :  { %v4949_v57 = vpop.eup %4948 }
 0x7f7   :  { %v4951_v58 = vpop.eup %4950  ;;  %v2836_v59 = vadd.f32 1.0, %v4949_v57 }
 0x7f8   :  { %v2837_v41 = vadd.f32 1.0, %v4951_v58 }
 0x7f9   :  { %4952 = vrcp.f32 %v2836_v59 }
 0x7fa   :  { %4954 = vrcp.f32 %v2837_v41 }
 0x803   :  { %v4953_v60 = vpop.eup %4952 }
 0x804   :  { %v4955_v63 = vpop.eup %4954  ;;  %v2840_v0 = vmul.f32 %v4953_v60, %v2836_v59 }
 0x805   :  { %v2841_v2 = vmul.f32 %v4955_v63, %v2837_v41 }
 0x806   :  { %v2842_v31 = vsub.f32 2.0, %v2840_v0 }
 0x807   :  { %v2843_v3 = vsub.f32 2.0, %v2841_v2 }
 0x808   :  { %v2844_v4 = vmul.f32 %v4953_v60, %v2842_v31 }
 0x809   :  { %v2845_v5 = vmul.f32 %v4955_v63, %v2843_v3 }
 0x80a   :  { %v2846_v49 = vmul.f32 %v2844_v4, %v2828_v52 }
 0x80b   :  { %v2847_v62 = vmul.f32 %v2845_v5, %v2829_v16 }
 0x80c   :  { %v2849_v6 = vrot.slane %v2846_v49, 5  ;;  %v2853_v8 = vrot.slane %v2846_v49, 2 }
 0x80d   :  { %v2854_v9 = vrot.slane %v2847_v62, 2 }
 0x80e   :  { %v2851_v10 = vsel %vm262_vm4, 0.0, %v2849_v6 }
 0x80f   :  { %v2855_v11 = vsel %vm257_vm3, %v2853_v8, %v2854_v9  ;;  %v2859_v33 = vrot.slane %v2851_v10, 1 }
 0x810   :  { %v2857_v12 = vsel %vm262_vm4, 0.0, %v2855_v11 }
 0x811   :  { %v2861_v13 = vmax.f32 %v2851_v10, %v2859_v33  ;;  %v2873_v14 = vrot.slane %v2857_v12, 1  ;;  %v3215_v10 = vld [vmem:[#allocation14] sm:$0x1] }
 0x813   :  { %v2863_v15 = vrot.slane %v2861_v13, 1  ;;  %v2875_v18 = vmax.f32 %v2857_v12, %v2873_v14  ;;  %v2865_v61 = vrot.slane %v2861_v13, 2  ;;  %v2867_v24 = vrot.slane %v2861_v13, 3  ;;  %v3216_v12 = vld [vmem:[#allocation14 + $0x1] sm:$0x1] }
 0x815   :  { %v2869_v25 = vsel %vm1535_vm8, %v2861_v13, %v2863_v15  ;;  %v2877_v26 = vrot.slane %v2875_v18, 1  ;;  %v2879_v20 = vrot.slane %v2875_v18, 2  ;;  %v2881_v23 = vrot.slane %v2875_v18, 3 }
 0x816   :  { %v2870_v27 = vsel %vm301_vm5, %v2869_v25, %v2865_v61 }
 0x817   :  { %v2871_v38 = vsel %vm262_vm4, %v2870_v27, %v2867_v24  ;;  %v2883_v28 = vsel %vm1535_vm8, %v2875_v18, %v2877_v26 }
 0x818   :  { %v2884_v30 = vsel %vm301_vm5, %v2883_v28, %v2879_v20  ;;  %v2908_v32 = vrot.slane %v2871_v38, 1  ;;  %v3057_v34 = vrot.slane %v2871_v38, 2  ;;  %v3136_v36 = vrot.slane %v2871_v38, 3 }
 0x819   :  { %v2885_v39 = vsel %vm262_vm4, %v2884_v30, %v2881_v23 }
 0x81a   :  { %v2910_v40 = vsel %vm1535_vm8, %v2908_v32, %v2885_v39  ;;  %v2904_v42 = vrot.slane %v2885_v39, 7  ;;  %v3059_v43 = vrot.slane %v2885_v39, 1  ;;  %v3138_v35 = vrot.slane %v2885_v39, 2  ;;  %v2894_v39 = vld [vmem:[%s5817_s8] sm:$0xff] }
 0x81b   :  { %4593 = vmatmul.mubr.msk.f32.vlgmr.msra.gmra.mrb[6].mxu0 %vm1952_vm10, %v2910_v40 }
 0x81c   :  { %4794 = vmatpush3.bf16.msra.mxu0 %v4793_v29  ;;  %4599 = vmatprep.mubr.msk.f32.mxu0 %vm5200_vm11, %v5201_v7  ;;  %v2906_v37 = vsel %vm1535_vm8, %v2871_v38, %v2904_v42  ;;  %v3061_v19 = vsel %vm1535_vm8, %v3057_v34, %v3059_v43  ;;  %v3140_v44 = vsel %vm1535_vm8, %v3136_v36, %v3138_v35  ;;  %v2896_v43 = vld [vmem:[%s5817_s8 + $0x10] sm:$0xff] }
 0x81d   :  { %4795 = vmatprep.subr.bf16.mxu0 %v5199_v1 }
 0x823   :  { %4600 = vmatmul.mubr.msk.f32.vlgmr.msra.gmra.mrb[6].mxu0 %vm1952_vm10, %v2906_v37 }
 0x824   :  { %4797 = vmatpush3.bf16.msra.mxu0 %v4796_v47  ;;  %4606 = vmatprep.mubr.msk.f32.mxu0 %vm5200_vm11, %v5201_v7 }
 0x825   :  { %4798 = vmatprep.subr.bf16.mxu0 %v5199_v1  ;;  %v2895_v1 = vld [vmem:[%s5817_s8 + $0x8] sm:$0xff] }
 0x826   :  { %4617 = vmatpush3.msra.mxu1 %v2895_v1 }
 0x827   :  { %4621 = vmatprep.subr.mxu1 %v5201_v7 }
 0x82b   :  { %4607 = vmatmul.mubr.msk.f32.vlgmr.msra.gmra.mrb[6].mxu0 %vm1952_vm10, %v3061_v19 }
 0x82c   :  { %4800 = vmatpush3.bf16.msra.mxu0 %v4799_v51  ;;  %4613 = vmatprep.mubr.msk.f32.mxu0 %vm5200_vm11, %v5201_v7  ;;  %v4210_v51 = vld [vmem:[%s5817_s8 + $0x30] sm:$0xff] }
 0x82d   :  { %4636 = vmatprep.subr.mxu0 %v5201_v7 }
 0x833   :  { %4614 = vmatmul.mubr.msk.f32.vlgmr.msra.gmra.mrb[6].mxu0 %vm1952_vm10, %v3140_v44  ;;  %v2897_v44 = vld [vmem:[%s5817_s8 + $0x18] sm:$0xff] }
 0x834   :  { %4638 = vmatprep.mubr.msk.f32.mxu0 %vm5200_vm11, %v5201_v7  ;;  %4637 = vmatpush3.msra.mxu0 %v4209_v17 }
 0x835   :  { %4641 = vmatprep.subr.mxu0 %v5201_v7 }
 0x906   :  { %v5700_v52 = vpop.f32.mrb[6].mxu0 }
 0x907   :  { %v3218_v16 = vsel %vm3217_vm12, %v5700_v52, 0.0  ;;  %v3225_v53 = vmul.f32 %v5700_v52, %v5700_v52  ;;  %v4615_v54 = vpop.f32.mrb[7].mxu0 }
 0x908   :  { %v3219_v55 = vrot.slane %v3218_v16, 4 }
 0x909   :  { %v3226_v56 = vsel %vm3217_vm12, %v3225_v53, 0.0 }
 0x90a   :  { %v3220_v57 = vadd.f32 %v3219_v55, %v3218_v16  ;;  %v3227_v58 = vrot.slane %v3226_v56, 4 }
 0x90c   :  { %v3221_v59 = vrot.slane %v3220_v57, 2  ;;  %v3228_v41 = vadd.f32 %v3227_v58, %v3226_v56 }
 0x90e   :  { %v3222_v60 = vadd.f32 %v3221_v59, %v3220_v57  ;;  %v3229_v63 = vrot.slane %v3228_v41, 2 }
 0x910   :  { %v3223_v0 = vrot.slane %v3222_v60, 1  ;;  %v3230_v2 = vadd.f32 %v3229_v63, %v3228_v41 }
 0x912   :  { %v3224_v31 = vadd.f32 %v3223_v0, %v3222_v60  ;;  %v3231_v3 = vrot.slane %v3230_v2, 1 }
 0x914   :  { %v3232_v4 = vadd.f32 %v3231_v3, %v3230_v2  ;;  %v3233_v5 = vmul.f32 0.5, %v3224_v31 }
 0x916   :  { %v3234_v49 = vmul.f32 0.5, %v3232_v4  ;;  %v3235_v62 = vmul.f32 %v3233_v5, %v3233_v5 }
 0x918   :  { %v3236_v6 = vsub.f32 %v3234_v49, %v3235_v62 }
 0x91a   :  { %v3237_v8 = vmax.f32 %v3236_v6, 0.0 }
 0x91c   :  { %v3238_v9 = vadd.f32 1e-05, %v3237_v8 }
 0x91e   :  { %4956 = vrsqrt.f32 %v3238_v9 }
 0x928   :  { %v4957_v11 = vpop.eup %4956 }
 0x929   :  { %v3240_v33 = vmul.f32 %v4957_v11, %v3215_v10  ;;  %v3582_v10 = vld [vmem:[#allocation14 + $0x2] sm:$0x1] }
 0x92b   :  { %v3241_v13 = vmul.f32 %v3240_v33, %v3233_v5  ;;  %v3246_v14 = vrot.slane %v3240_v33, %v5402_v48 }
 0x92d   :  { %v3242_v15 = vsub.f32 %v3216_v12, %v3241_v13  ;;  %v3247_v18 = vmul.f32 %v3246_v14, %v5700_v52  ;;  %v3583_v12 = vld [vmem:[#allocation14 + $0x3] sm:$0x1] }
 0x92f   :  { %v3251_v61 = vrot.slane %v3242_v15, %v5402_v48 }
 0x931   :  { %v3252_v21 = vadd.f32 %v3251_v61, %v3247_v18 }
 0x933   :  { %v3253_v22 = vsub.f32 0.0, %v3252_v21 }
 0x935   :  { %v3254_v24 = vmul.f32 1.442695, %v3253_v22 }
 0x937   :  { %4958 = vpow2.f32 %v3254_v24 }
 0x941   :  { %v4959_v25 = vpop.eup %4958 }
 0x942   :  { %v3256_v26 = vadd.f32 1.0, %v4959_v25 }
 0x944   :  { %4960 = vrcp.f32 %v3256_v26 }
 0x94e   :  { %v4961_v20 = vpop.eup %4960 }
 0x94f   :  { %v3258_v27 = vmul.f32 %v4961_v20, %v3256_v26 }
 0x951   :  { %v3259_v38 = vsub.f32 2.0, %v3258_v27 }
 0x953   :  { %v3260_v23 = vmul.f32 %v4961_v20, %v3259_v38 }
 0x955   :  { %v3261_v28 = vmul.f32 %v3260_v23, %v3252_v21 }
 0x957   :  { %v3263_v29 = vrot.slane %v3261_v28, 5  ;;  %v3266_v30 = vrot.slane %v3261_v28, 6 }
 0x959   :  { %v3265_v32 = vsel %vm262_vm4, 0.0, %v3263_v29  ;;  %v3268_v36 = vsel %vm262_vm4, 0.0, %v3266_v30 }
 0x95a   :  { %v3274_v34 = vrot.slane %v3265_v32, 1  ;;  %v3270_v42 = vrot.slane %v3268_v36, 7  ;;  %v3424_v37 = vrot.slane %v3265_v32, 2  ;;  %v3426_v19 = vrot.slane %v3268_v36, 1 }
 0x95b   :  { %v3503_v46 = vrot.slane %v3265_v32, 3  ;;  %v3505_v47 = vrot.slane %v3268_v36, 2 }
 0x95c   :  { %v3276_v40 = vsel %vm1535_vm8, %v3274_v34, %v3268_v36  ;;  %v3272_v35 = vsel %vm1535_vm8, %v3265_v32, %v3270_v42  ;;  %v3428_v45 = vsel %vm1535_vm8, %v3424_v37, %v3426_v19  ;;  %v4208_v42 = vld [vmem:[%s5817_s8 + $0x20] sm:$0xff]  ;;  %v4211_v19 = vld [vmem:[%s5817_s8 + $0x38] sm:$0xff] }
 0x95d   :  { %4619 = vmatmul.mubr.msk.f32.vlgmr.msra.gmra.mrb[8].mxu1 %vm3277_vm13, %v3276_v40  ;;  %v3507_v50 = vsel %vm1535_vm8, %v3503_v46, %v3505_v47 }
 0x95e   :  { %4622 = vmatpush3.msra.mxu1 %v2894_v39  ;;  %4623 = vmatprep.mubr.msk.f32.mxu1 %vm5200_vm11, %v5201_v7 }
 0x95f   :  { %4626 = vmatprep.subr.mxu1 %v5201_v7 }
 0x965   :  { %4624 = vmatmul.mubr.msk.f32.vlgmr.msra.gmra.mrb[8].mxu1 %vm3277_vm13, %v3272_v35 }
 0x966   :  { %4627 = vmatpush3.msra.mxu1 %v2896_v43  ;;  %4628 = vmatprep.mubr.msk.f32.mxu1 %vm5200_vm11, %v5201_v7 }
 0x967   :  { %4631 = vmatprep.subr.mxu1 %v5201_v7 }
 0x96d   :  { %4629 = vmatmul.mubr.msk.f32.vlgmr.msra.gmra.mrb[8].mxu1 %vm3277_vm13, %v3428_v45 }
 0x96e   :  { %4632 = vmatpush3.msra.mxu1 %v2897_v44  ;;  %4633 = vmatprep.mubr.msk.f32.mxu1 %vm5200_vm11, %v5201_v7 }
 0x96f   :  { %4646 = vmatprep.subr.mxu1 %v5201_v7 }
 0x975   :  { %4634 = vmatmul.mubr.msk.f32.vlgmr.msra.gmra.mrb[8].mxu1 %vm3277_vm13, %v3507_v50  ;;  %v4034_v50 = vld [vmem:[%s5819_s10] sm:$0xff] }
 0x976   :  { %4648 = vmatprep.mubr.msk.f32.mxu1 %vm5200_vm11, %v5201_v7  ;;  %4647 = vmatpush3.msra.mxu1 %v4210_v51 }
 0x977   :  { %4656 = vmatprep.subr.mxu1 %v5201_v7 }
 0xa48   :  { %v3577_v1 = vpop.f32.mrb[8].mxu1 }
 0xa49   :  { %v3584_v16 = vsel %vm3217_vm12, %v3577_v1, 0.0  ;;  %v3591_v53 = vmul.f32 %v3577_v1, %v3577_v1  ;;  %v4635_v54 = vpop.f32.mrb[9].mxu1 }
 0xa4a   :  { %v3585_v55 = vrot.slane %v3584_v16, 4 }
 0xa4b   :  { %v3592_v56 = vsel %vm3217_vm12, %v3591_v53, 0.0 }
 0xa4c   :  { %v3586_v57 = vadd.f32 %v3585_v55, %v3584_v16  ;;  %v3593_v58 = vrot.slane %v3592_v56, 4 }
 0xa4e   :  { %v3587_v59 = vrot.slane %v3586_v57, 2  ;;  %v3594_v41 = vadd.f32 %v3593_v58, %v3592_v56 }
 0xa50   :  { %v3588_v60 = vadd.f32 %v3587_v59, %v3586_v57  ;;  %v3595_v63 = vrot.slane %v3594_v41, 2 }
 0xa52   :  { %v3589_v0 = vrot.slane %v3588_v60, 1  ;;  %v3596_v2 = vadd.f32 %v3595_v63, %v3594_v41 }
 0xa54   :  { %v3590_v31 = vadd.f32 %v3589_v0, %v3588_v60  ;;  %v3597_v3 = vrot.slane %v3596_v2, 1 }
 0xa56   :  { %v3598_v4 = vadd.f32 %v3597_v3, %v3596_v2  ;;  %v3599_v5 = vmul.f32 0.5, %v3590_v31 }
 0xa58   :  { %v3600_v49 = vmul.f32 0.5, %v3598_v4  ;;  %v3601_v62 = vmul.f32 %v3599_v5, %v3599_v5 }
 0xa5a   :  { %v3602_v6 = vsub.f32 %v3600_v49, %v3601_v62 }
 0xa5c   :  { %v3603_v8 = vmax.f32 %v3602_v6, 0.0 }
 0xa5e   :  { %v3604_v9 = vadd.f32 1e-05, %v3603_v8 }
 0xa60   :  { %4962 = vrsqrt.f32 %v3604_v9 }
 0xa6a   :  { %v4963_v11 = vpop.eup %4962 }
 0xa6b   :  { %v3606_v33 = vmul.f32 %v4963_v11, %v3582_v10 }
 0xa6d   :  { %v3607_v13 = vmul.f32 %v3606_v33, %v3599_v5  ;;  %v3612_v14 = vrot.slane %v3606_v33, %v5402_v48 }
 0xa6f   :  { %v3608_v15 = vsub.f32 %v3583_v12, %v3607_v13  ;;  %v3613_v18 = vmul.f32 %v3612_v14, %v3577_v1 }
 0xa71   :  { %v3617_v61 = vrot.slane %v3608_v15, %v5402_v48  ;;  %v3948_v15 = vld [vmem:[#allocation14 + $0x4] sm:$0x1] }
 0xa73   :  { %v3618_v21 = vadd.f32 %v3617_v61, %v3613_v18 }
 0xa75   :  { %v3619_v22 = vsub.f32 0.0, %v3618_v21 }
 0xa77   :  { %v3620_v24 = vmul.f32 1.442695, %v3619_v22 }
 0xa79   :  { %4964 = vpow2.f32 %v3620_v24 }
 0xa83   :  { %v4965_v25 = vpop.eup %4964 }
 0xa84   :  { %v3622_v26 = vadd.f32 1.0, %v4965_v25 }
 0xa86   :  { %4966 = vrcp.f32 %v3622_v26 }
 0xa90   :  { %v4967_v20 = vpop.eup %4966 }
 0xa91   :  { %v3624_v27 = vmul.f32 %v4967_v20, %v3622_v26 }
 0xa93   :  { %v3625_v38 = vsub.f32 2.0, %v3624_v27 }
 0xa95   :  { %v3626_v23 = vmul.f32 %v4967_v20, %v3625_v38 }
 0xa97   :  { %v3627_v28 = vmul.f32 %v3626_v23, %v3618_v21  ;;  %v3949_v21 = vld [vmem:[#allocation14 + $0x5] sm:$0x1] }
 0xa99   :  { %v3629_v29 = vrot.slane %v3627_v28, 5  ;;  %v3632_v30 = vrot.slane %v3627_v28, 6 }
 0xa9b   :  { %v3631_v32 = vsel %vm262_vm4, 0.0, %v3629_v29  ;;  %v3634_v34 = vsel %vm262_vm4, 0.0, %v3632_v30 }
 0xa9c   :  { %v3640_v36 = vrot.slane %v3631_v32, 1  ;;  %v3789_v39 = vrot.slane %v3631_v32, 2  ;;  %v3791_v40 = vrot.slane %v3634_v34, 1  ;;  %v3636_v37 = vrot.slane %v3634_v34, 7 }
 0xa9d   :  { %v3868_v45 = vrot.slane %v3631_v32, 3  ;;  %v3870_v46 = vrot.slane %v3634_v34, 2 }
 0xa9e   :  { %v3642_v43 = vsel %vm1535_vm8, %v3640_v36, %v3634_v34  ;;  %v3793_v35 = vsel %vm1535_vm8, %v3789_v39, %v3791_v40  ;;  %v3638_v44 = vsel %vm1535_vm8, %v3631_v32, %v3636_v37 }
 0xa9f   :  { %4639 = vmatmul.mubr.msk.f32.vlgmr.msra.gmra.mrb[8].mxu0 %vm3277_vm13, %v3642_v43  ;;  %4649 = vmatmul.mubr.msk.f32.vlgmr.msra.gmra.mrb[10].mxu1 %vm3277_vm13, %v3793_v35  ;;  %v3872_v47 = vsel %vm1535_vm8, %v3868_v45, %v3870_v46 }
 0xaa0   :  { %4642 = vmatpush3.msra.mxu0 %v4208_v42  ;;  %4643 = vmatprep.mubr.msk.f32.mxu0 %vm5200_vm11, %v5201_v7 }
 0xaa1   :  { %4651 = vmatprep.subr.mxu0 %v5201_v7  ;;  %4658 = vmatprep.mubr.msk.f32.mxu1 %vm5200_vm11, %v5201_v7 }
 0xaa2   :  { %4657 = vmatpush3.msra.mxu1 %v4034_v50 }
 0xaa3   :  { %4644 = vmatmul.mubr.msk.f32.vlgmr.msra.gmra.mrb[10].mxu0 %vm3277_vm13, %v3638_v44 }
 0xaa4   :  { %4652 = vmatpush3.msra.mxu0 %v4211_v19  ;;  %4653 = vmatprep.mubr.msk.f32.mxu0 %vm5200_vm11, %v5201_v7 }
 0xaa7   :  { %4654 = vmatmul.mubr.msk.f32.vlgmr.msra.gmra.mrb[12].mxu0 %vm3277_vm13, %v3872_v47 }
 0xb72   :  { %v3712_v17 = vpop.f32.mrb[8].mxu0  ;;  %v3863_v51 = vpop.f32.mrb[10].mxu1 }
 0xb73   :  { %v4640_v1 = vpop.f32.mrb[9].mxu0  ;;  %v4650_v16 = vpop.f32.mrb[11].mxu1 }
 0xb76   :  { %v3785_v53 = vpop.f32.mrb[10].mxu0 }
 0xb77   :  { %v3786_v54 = vadd.f32 %v3785_v53, %v3712_v17  ;;  %v4645_v55 = vpop.f32.mrb[11].mxu0 }
 0xb79   :  { %v3867_v56 = vadd.f32 %v3863_v51, %v3786_v54 }
 0xb7a   :  { %v3942_v57 = vpop.f32.mrb[12].mxu0 }
 0xb7b   :  { %v3946_v58 = vadd.f32 %v3942_v57, %v3867_v56  ;;  %v4655_v7 = vpop.f32.mrb[13].mxu0 }
 0xb7d   :  { %v3947_v59 = vadd.f32 %v3946_v58, %v5700_v52 }
 0xb7f   :  { %v3950_v41 = vsel %vm3217_vm12, %v3947_v59, 0.0  ;;  %v3957_v60 = vmul.f32 %v3947_v59, %v3947_v59 }
 0xb80   :  { %v3951_v63 = vrot.slane %v3950_v41, 4 }
 0xb81   :  { %v3958_v0 = vsel %vm3217_vm12, %v3957_v60, 0.0 }
 0xb82   :  { %v3952_v2 = vadd.f32 %v3951_v63, %v3950_v41  ;;  %v3959_v31 = vrot.slane %v3958_v0, 4 }
 0xb84   :  { %v3953_v3 = vrot.slane %v3952_v2, 2  ;;  %v3960_v4 = vadd.f32 %v3959_v31, %v3958_v0  ;;  %v4224_v31 = vld [vmem:[%s5820_s11] ss:$0 sm:$0xff]  ;;  %s5202_s11 = smov [#allocation16]  }
 0xb85   :  { %s4137_s13 = sshll.u32 %s5202_s11, 4  ;;  %s4138_s13 = int_to_ptr.vmem [resolvable:$true] %s4137_s13 }
 0xb86   :  { %v3954_v5 = vadd.f32 %v3953_v3, %v3952_v2  ;;  %v3961_v49 = vrot.slane %v3960_v4, 2  ;;  %s5154_s14 = scalar_lea.vmem %s4138_s13, 32  ;;  %p5159_p9 = scmp.lt.s32.totalorder %s4138_s13, %s4138_s13 }
 0xb87   :  { %p5155_p8 = scmp.ne.s32.totalorder %s4138_s13, %s5154_s14  ;;  %p5160_p10 = scmp.lt.s32.totalorder %s5154_s14, %s5154_s14 }
 0xb88   :  { %v3955_v62 = vrot.slane %v3954_v5, 1  ;;  %v3962_v6 = vadd.f32 %v3961_v49, %v3960_v4 }
 0xb89   :  { %p5161_p11 = por %p5160_p10, %p5159_p9 }
 0xb8a   :  { %v3956_v8 = vadd.f32 %v3955_v62, %v3954_v5  ;;  %v3963_v9 = vrot.slane %v3962_v6, 1 }
 0xb8b   :  { %p5162_p12 = pnand %p5161_p11, %p5155_p8 }
 0xb8c   :  { %v3964_v10 = vadd.f32 %v3963_v9, %v3962_v6  ;;  %v3965_v11 = vmul.f32 0.5, %v3956_v8 }
 0xb8e   :  { %v3966_v33 = vmul.f32 0.5, %v3964_v10  ;;  %v3967_v52 = vmul.f32 %v3965_v11, %v3965_v11 }
 0xb90   :  { %v3968_v12 = vsub.f32 %v3966_v33, %v3967_v52 }
 0xb92   :  { %v3969_v13 = vmax.f32 %v3968_v12, 0.0 }
 0xb94   :  { %v3970_v14 = vadd.f32 1e-05, %v3969_v13 }
 0xb96   :  { %4968 = vrsqrt.f32 %v3970_v14 }
 0xba0   :  { %v4969_v18 = vpop.eup %4968 }
 0xba1   :  { %v3972_v61 = vmul.f32 %v4969_v18, %v3948_v15 }
 0xba3   :  { %v3973_v22 = vmul.f32 %v3972_v61, %v3965_v11  ;;  %v3978_v24 = vrot.slane %v3972_v61, %v5402_v48 }
 0xba5   :  { %v3974_v25 = vsub.f32 %v3949_v21, %v3973_v22  ;;  %v3979_v26 = vmul.f32 %v3978_v24, %v3947_v59 }
 0xba7   :  { %v3983_v20 = vrot.slane %v3974_v25, %v5402_v48 }
 0xba9   :  { %v3984_v27 = vadd.f32 %v3983_v20, %v3979_v26 }
 0xbab   :  { %v3985_v38 = vsub.f32 0.0, %v3984_v27 }
 0xbad   :  { %v3986_v23 = vmul.f32 1.442695, %v3985_v38 }
 0xbaf   :  { %4970 = vpow2.f32 %v3986_v23 }
 0xbb9   :  { %v4971_v28 = vpop.eup %4970 }
 0xbba   :  { %v3988_v29 = vadd.f32 1.0, %v4971_v28 }
 0xbbc   :  { %4972 = vrcp.f32 %v3988_v29 }
 0xbc6   :  { %v4973_v30 = vpop.eup %4972 }
 0xbc7   :  { %v3990_v32 = vmul.f32 %v4973_v30, %v3988_v29 }
 0xbc9   :  { %v3991_v34 = vsub.f32 2.0, %v3990_v32 }
 0xbcb   :  { %v3992_v36 = vmul.f32 %v4973_v30, %v3991_v34 }
 0xbcd   :  { %v3993_v39 = vmul.f32 %v3992_v36, %v3984_v27 }
 0xbcf   :  { %v3995_v40 = vrot.slane %v3993_v39, 5  ;;  %v3998_v42 = vrot.slane %v3993_v39, 6 }
 0xbd1   :  { %v3997_v43 = vsel %vm262_vm4, 0.0, %v3995_v40  ;;  %v4000_v35 = vsel %vm262_vm4, 0.0, %v3998_v42 }
 0xbd2   :  { %v4002_v37 = vrot.slane %v3997_v43, 1  ;;  %v4010_v48 = vrot.slane %v4000_v35, 1 }
 0xbd4   :  { %v4004_v19 = vmax.f32 %v3997_v43, %v4002_v37  ;;  %v4012_v44 = vmax.f32 %v4000_v35, %v4010_v48 }
 0xbd6   :  { %v4006_v45 = vrot.slane %v4004_v19, 1  ;;  %v4014_v46 = vrot.slane %v4012_v44, 1 }
 0xbd8   :  { %v4008_v47 = vsel %vm1535_vm8, %v4004_v19, %v4006_v45  ;;  %v4016_v50 = vsel %vm1535_vm8, %v4012_v44, %v4014_v46 }
 0xbd9   :  { %v4017_v17 = vsel %vm3217_vm12, %v4008_v47, 0.0  ;;  %v4025_v51 = vsel %vm3217_vm12, %v4016_v50, 0.0 }
 0xbda   :  { %v4018_v1 = vrot.slane %v4017_v17, 4  ;;  %v4026_v16 = vrot.slane %v4025_v51, 4 }
 0xbdc   :  { %v4019_v53 = vadd.f32 %v4018_v1, %v4017_v17  ;;  %v4027_v54 = vadd.f32 %v4026_v16, %v4025_v51 }
 0xbde   :  { %v4020_v55 = vrot.slane %v4019_v53, 2  ;;  %v4028_v56 = vrot.slane %v4027_v54, 2 }
 0xbe0   :  { %v4021_v57 = vadd.f32 %v4020_v55, %v4019_v53  ;;  %v4029_v58 = vadd.f32 %v4028_v56, %v4027_v54 }
 0xbe2   :  { %v4022_v7 = vrot.slane %v4021_v57, 1  ;;  %v4030_v59 = vrot.slane %v4029_v58, 1 }
 0xbe4   :  { %v4023_v41 = vadd.f32 %v4022_v7, %v4021_v57  ;;  %v4031_v60 = vadd.f32 %v4030_v59, %v4029_v58 }
 0xbe6   :  { %v4024_v63 = vmul.f32 0.5, %v4023_v41  ;;  %v4032_v0 = vmul.f32 0.5, %v4031_v60 }
 0xbe8   :  { %v4033_v2 = vsel %vm1535_vm8, %v4024_v63, %v4032_v0 }
 0xbe9   :  { %4659 = vmatmul.mubr.msk.f32.vlgmr.msra.gmra.mrb[12].mxu1 %vm3277_vm13, %v4033_v2 }
 0xcbc   :  { %v4111_v3 = vpop.f32.mrb[12].mxu1 }
 0xcbd   :  { %v4112_v4 = vadd.f32 %v4224_v31, %v4111_v3  ;;  %v4660_v5 = vpop.f32.mrb[13].mxu1 }
 0xcbf   :  { %v4116_v49 = vsel %vm4115_vm14, %v4112_v4, -inf }
 0xcc0   :  { %4117 = vmax.xlane.f32.xlu0 %v4116_v49 }
 0xd4d   :  { %v4118_v62 = vpop.xlane.xlu0 %4117 }
 0xd4e   :  { %v4119_v6 = vsub.f32 %v4112_v4, %v4118_v62 }
 0xd50   :  { %v4120_v8 = vmul.f32 1.442695, %v4119_v6 }
 0xd52   :  { %4974 = vpow2.f32 %v4120_v8 }
 0xd5c   :  { %v4975_v9 = vpop.eup %4974 }
 0xd5d   :  { %v4122_v10 = vsel %vm4115_vm14, %v4975_v9, 0.0 }
 0xd5e   :  { %4123 = vadd.xlane.f32.xlu1 %v4122_v10 }
 0xdeb   :  { %v4124_v11 = vpop.xlane.xlu1 %4123 }
 0xdec   :  { %4976 = vrcp.f32 %v4124_v11 }
 0xdf6   :  { %v4977_v33 = vpop.eup %4976 }
 0xdf7   :  { %v4126_v52 = vmul.f32 %v4977_v33, %v4124_v11 }
 0xdf9   :  { %v4127_v12 = vsub.f32 2.0, %v4126_v52 }
 0xdfb   :  { %v4128_v13 = vmul.f32 %v4977_v33, %v4127_v12 }
 0xdfd   :  { %v4129_v14 = vmul.f32 %v4975_v9, %v4128_v13 }
 0xdff   :  { %4130 = vst.msk [vmem:[#allocation16] sm:$0x3] %vm4115_vm14, %v4129_v14 }
 0xe00   :  { %5165 = shalt.err (!%p5162_p12)
}
 0xe01   :  { %s5166_s4 = scalar_lea.hbm %s5821_s12, 32 }
 0xe02   :  { %p5167_p13 = scmp.ne.s32.totalorder %s5821_s12, %s5166_s4  ;;  %p5170_p0 = scmp.lt.u32.totalorder %s5166_s4, %s5821_s12 }
 0xe04   :  { %p5172_p1 = pnand %p5170_p0, %p5167_p13 }
 0xe06   :  { %5175 = shalt.err (!%p5172_p1)
}
 0xe07   :  { %4140 = dma.vmem_to_hbm [thread:$0]  %s4138_s13, 32, %s5821_s12, [#allocation4]  }
 0xe08   :  { %5186 = dma.done.wait [#allocation4], 32  }
 0xe09   :  { %5187 = vsyncadd [#allocation4], 4294967264 }
 0xe0a   :  { %4144 = vsyncpa [#allocation3], 1 }
 0xe0b   :  { %4145 = vsyncpa [#allocation6], 1 }
 0xe0c   :  { %4146 = vsyncpa [#allocation9], 1 }
 0xe0d   :  { %4147 = vsyncpa [#allocation12], 1 }
 0xe0e   :  { %4148 = vsyncpa [#allocation15], 1 }
 0xe0f   :  { %4149 = vsyncpa [#allocation4], 1 }

</bundles_post_ra>
